<compile_context>
chip_gen: v7x
topology: tpu7x:2x2x1
jax: 0.10.0
libtpu: 0.0.40
codegen_flags: <defaults>
</compile_context>

<pallas_src>
import numpy as np

import jax
import jax.numpy as jnp
from jax.experimental import pallas as pl
from jax.experimental.pallas import tpu as pltpu

NUM_CLASSES = 10
_TM_MAX = 128                                  # max images per grid step
_TAPS = ((0, 0), (0, 1), (1, 0), (1, 1))       # 2x2 max-pool taps (dy, dx)


# ---------------------------------------------------------------------------
# Fused kernel: conv1+pool+relu -> conv2+pool+relu -> fc1+relu -> fc2 ->
# log_softmax for one tile of T images, entirely in VMEM.
# ---------------------------------------------------------------------------
def _net_kernel(strips_ref, w1_ref, b1_ref, w2_ref, b2_ref,
                wf1_ref, bf1_ref, wf2_ref, bf2_ref, o_ref):
    """
    strips_ref : (12*T, 168) bf16  6x28 image strip per (pooled_row ph, image)
    w1_ref     : (168, 512) bf16   conv1 GEMM weight, 4 taps x (pw*10+c -> pad 128)
    b1_ref     : (1, 128)   f32    conv1 bias tiled over pw (zeros beyond 120)
    w2_ref     : (12, 128, 1536) bf16  conv2 weight per conv1 row, 4 taps x ((py,px,co) -> pad 384)
    b2_ref     : (1, 384)   f32    conv2 bias tiled over (py, px)
    wf1_ref    : (384, 128) bf16   fc1 weight, rows in (py, px, co) order, padded
    bf1_ref    : (1, 128)   f32
    wf2_ref    : (128, 128) bf16   fc2 weight, padded
    bf2_ref    : (1, 128)   f32
    o_ref      : (T, 128)   f32    log-probs (lanes >= 10 are junk, sliced off outside)
    """
    t = strips_ref.shape[0] // 12
    s = strips_ref[...]                                            # (12T, 168)

    # --- conv1 + bias + 2x2 maxpool + relu (taps stacked along w1 lanes) ------
    w1 = w1_ref[...]
    z1 = jnp.dot(s, w1[:, 0:128], preferred_element_type=jnp.float32)
    z1 = jnp.maximum(z1, jnp.dot(s, w1[:, 128:256], preferred_element_type=jnp.float32))
    z1 = jnp.maximum(z1, jnp.dot(s, w1[:, 256:384], preferred_element_type=jnp.float32))
    z1 = jnp.maximum(z1, jnp.dot(s, w1[:, 384:512], preferred_element_type=jnp.float32))
    a1 = jnp.maximum(z1 + b1_ref[...], 0.0).astype(jnp.bfloat16)   # (12T, 128), rows (ph, n)

    # --- conv2 (+Dropout2d) + bias + 2x2 maxpool + relu -----------------------
    # TODO(synk): nn.Dropout2d stochastic training mode not implemented (eval identity).
    z2 = jnp.dot(a1[0:t], w2_ref[0], preferred_element_type=jnp.float32)
    for iy in range(1, 12):
        z2 = z2 + jnp.dot(a1[iy * t:(iy + 1) * t], w2_ref[iy],
                          preferred_element_type=jnp.float32)      # (T, 1536)
    p2 = jnp.maximum(jnp.maximum(z2[:, 0:384], z2[:, 384:768]),
                     jnp.maximum(z2[:, 768:1152], z2[:, 1152:1536]))
    a2 = jnp.maximum(p2 + b2_ref[...], 0.0).astype(jnp.bfloat16)   # (T, 384), lanes>=320 are 0

    # --- fc1 + relu (+dropout eval identity) -> fc2 -> log_softmax ------------
    # TODO(synk): F.dropout stochastic training mode not implemented (eval identity).
    h = jnp.dot(a2, wf1_ref[...], preferred_element_type=jnp.float32) + bf1_ref[...]
    h = jnp.maximum(h, 0.0).astype(jnp.bfloat16)                   # (T, 128)
    zl = jnp.dot(h, wf2_ref[...], preferred_element_type=jnp.float32) + bf2_ref[...]
    lane = jax.lax.broadcasted_iota(jnp.int32, zl.shape, 1)
    zl = jnp.where(lane < NUM_CLASSES, zl, -1e30)                  # mask padded logits
    m = jnp.max(zl, axis=1, keepdims=True)
    e = jnp.exp(zl - m)
    lse = jnp.log(jnp.sum(e, axis=1, keepdims=True))
    o_ref[...] = (zl - m) - lse


def _batch_tile(n):
    """Images per grid step: multiple of 8, capped at _TM_MAX, and chosen so
    moderate batches split into >=2 'parallel' grid steps (v7x megacore)."""
    if n <= 16:
        return ((n + 7) // 8) * 8
    half = -(-n // 2)
    return min(_TM_MAX, ((half + 7) // 8) * 8)


# ---------------------------------------------------------------------------
# Parameter packing (done once, outside jit): convs become dense GEMM weights.
# ---------------------------------------------------------------------------
def init_params(key):
    """Torch-layout parameters with nn.{Conv2d,Linear}-style uniform init."""
    def uniform(k, shape, fan_in):
        bound = 1.0 / jnp.sqrt(jnp.float32(fan_in))
        return jax.random.uniform(k, shape, jnp.float32, -bound, bound)

    ks = jax.random.split(key, 8)
    return {
        "conv1_w": uniform(ks[0], (10, 1, 5, 5), 1 * 5 * 5),
        "conv1_b": uniform(ks[1], (10,), 1 * 5 * 5),
        "conv2_w": uniform(ks[2], (20, 10, 5, 5), 10 * 5 * 5),
        "conv2_b": uniform(ks[3], (20,), 10 * 5 * 5),
        "fc1_w": uniform(ks[4], (50, 320), 320),
        "fc1_b": uniform(ks[5], (50,), 320),
        "fc2_w": uniform(ks[6], (10, 50), 50),
        "fc2_b": uniform(ks[7], (10,), 50),
    }


def prepare_params(raw):
    """Pack torch-layout weights into the fused-kernel GEMM layouts (once)."""
    w1 = np.asarray(raw["conv1_w"], np.float32)      # (co=10, ci=1, kh, kw)
    b1 = np.asarray(raw["conv1_b"], np.float32)
    w2 = np.asarray(raw["conv2_w"], np.float32)      # (co=20, ci=10, kh, kw)
    b2 = np.asarray(raw["conv2_b"], np.float32)
    f1 = np.asarray(raw["fc1_w"], np.float32)        # (50, 320)
    g1 = np.asarray(raw["fc1_b"], np.float32)
    f2 = np.asarray(raw["fc2_w"], np.float32)        # (10, 50)
    g2 = np.asarray(raw["fc2_b"], np.float32)

    # conv1: per-pooled-row GEMM over a 6x28 strip. Strip column j = jy*28 + jx.
    # Output lane (per tap) = pw*10 + c ; taps stacked along lanes (4 x 128).
    W1 = np.zeros((168, 4, 128), np.float32)
    for t, (dy, dx) in enumerate(_TAPS):
        for pw in range(12):
            for kh in range(5):
                for kw in range(5):
                    j = (dy + kh) * 28 + (2 * pw + dx + kw)
                    W1[j, t, pw * 10:pw * 10 + 10] = w1[:, 0, kh, kw]
    W1 = W1.reshape(168, 512)
    B1 = np.zeros((1, 128), np.float32)
    B1[0, :120] = np.tile(b1, 12)

    # conv2: sum over the 12 conv1 rows of (128 x 1536) GEMMs.
    # Input lane = ix*10 + ci ; output lane (per tap) = (py*4+px)*20 + co, taps 4 x 384.
    W2 = np.zeros((12, 128, 4, 384), np.float32)
    for t, (dy, dx) in enumerate(_TAPS):
        for py in range(4):
            for px in range(4):
                for kh in range(5):
                    for kw in range(5):
                        iy = 2 * py + dy + kh
                        ix = 2 * px + dx + kw
                        col = (py * 4 + px) * 20
                        W2[iy, ix * 10:ix * 10 + 10, t, col:col + 20] = w2[:, :, kh, kw].T
    W2 = W2.reshape(12, 128, 1536)
    B2 = np.zeros((1, 384), np.float32)
    B2[0, :320] = np.tile(b2, 16)

    # head: fc1 permuted to the in-kernel (py, px, co) feature order; fc2 padded.
    WF1 = np.zeros((384, 128), np.float32)
    WF1[:320, :50] = f1.reshape(50, 20, 4, 4).transpose(2, 3, 1, 0).reshape(320, 50)
    BF1 = np.zeros((1, 128), np.float32)
    BF1[0, :50] = g1
    WF2 = np.zeros((128, 128), np.float32)
    WF2[:50, :10] = f2.T
    BF2 = np.zeros((1, 128), np.float32)
    BF2[0, :10] = g2

    bf = lambda a: jnp.asarray(a, jnp.bfloat16)
    f32 = lambda a: jnp.asarray(a, jnp.float32)
    return {"w1": bf(W1), "b1": f32(B1), "w2": bf(W2), "b2": f32(B2),
            "wf1": bf(WF1), "bf1": f32(BF1), "wf2": bf(WF2), "bf2": f32(BF2)}


# ---------------------------------------------------------------------------
# Forward pass
# ---------------------------------------------------------------------------
@jax.jit
def net_forward(x, params):
    """Eval-mode forward: x (N, 1, 28, 28) f32 -> (N, 10) log-probabilities."""
    n = x.shape[0]
    tm = _batch_tile(n)
    n_pad = -(-n // tm) * tm
    n_tiles = n_pad // tm

    xs = x.reshape(n, 28, 28).astype(jnp.bfloat16)
    if n_pad != n:
        xs = jnp.pad(xs, ((0, n_pad - n), (0, 0), (0, 0)))

    # 6-row strips, one per pooled output row: strip[(ph, i), jy*28+jx] = x[i, 2ph+jy, jx]
    # Row order per batch tile is (ph, image) so the kernel needs no reshapes.
    strips = jnp.stack([xs[:, 2 * ph:2 * ph + 6, :] for ph in range(12)], axis=0)
    strips = strips.reshape(12, n_tiles, tm, 168)
    strips = strips.transpose(1, 0, 2, 3).reshape(n_tiles * 12 * tm, 168)

    cost = pl.CostEstimate(
        flops=int(n_pad * 7.0e6),
        transcendentals=int(n_pad * 128),
        bytes_accessed=int(n_pad * (12 * 168 * 2 + 128 * 4) + 11 * (1 << 20)),
    )
    out = pl.pallas_call(
        _net_kernel,
        grid=(n_tiles,),
        in_specs=[
            pl.BlockSpec((12 * tm, 168), lambda i: (i, 0)),        # image strips (tiled)
            pl.BlockSpec((168, 512), lambda i: (0, 0)),            # conv1 weight (resident)
            pl.BlockSpec((1, 128), lambda i: (0, 0)),
            pl.BlockSpec((12, 128, 1536), lambda i: (0, 0, 0)),    # conv2 weight (resident)
            pl.BlockSpec((1, 384), lambda i: (0, 0)),
            pl.BlockSpec((384, 128), lambda i: (0, 0)),            # fc1
            pl.BlockSpec((1, 128), lambda i: (0, 0)),
            pl.BlockSpec((128, 128), lambda i: (0, 0)),            # fc2
            pl.BlockSpec((1, 128), lambda i: (0, 0)),
        ],
        out_specs=pl.BlockSpec((tm, 128), lambda i: (i, 0)),
        out_shape=jax.ShapeDtypeStruct((n_pad, 128), jnp.float32),
        compiler_params=pltpu.CompilerParams(
            dimension_semantics=("parallel",),
            vmem_limit_bytes=32 * 1024 * 1024),
        cost_estimate=cost,
    )(strips, params["w1"], params["b1"], params["w2"], params["b2"],
      params["wf1"], params["bf1"], params["wf2"], params["bf2"])
    return out[:n, :NUM_CLASSES]


def _reference_forward(x, raw):
    """Pure-JAX f32 reference matching the PyTorch module (eval mode)."""
    z1 = jax.lax.conv_general_dilated(x, raw["conv1_w"], (1, 1), "VALID",
                                      dimension_numbers=("NCHW", "OIHW", "NCHW"))
    z1 = z1 + raw["conv1_b"].reshape(1, 10, 1, 1)
    a1 = jnp.maximum(jax.lax.reduce_window(z1, -jnp.inf, jax.lax.max,
                                           (1, 1, 2, 2), (1, 1, 2, 2), "VALID"), 0.0)
    z2 = jax.lax.conv_general_dilated(a1, raw["conv2_w"], (1, 1), "VALID",
                                      dimension_numbers=("NCHW", "OIHW", "NCHW"))
    z2 = z2 + raw["conv2_b"].reshape(1, 20, 1, 1)
    a2 = jnp.maximum(jax.lax.reduce_window(z2, -jnp.inf, jax.lax.max,
                                           (1, 1, 2, 2), (1, 1, 2, 2), "VALID"), 0.0)
    f = a2.reshape(x.shape[0], 320)
    h = jnp.maximum(f @ raw["fc1_w"].T + raw["fc1_b"], 0.0)
    z = h @ raw["fc2_w"].T + raw["fc2_b"]
    return jax.nn.log_softmax(z, axis=1)


if __name__ == "__main__":
    key = jax.random.PRNGKey(0)
    pkey, xkey = jax.random.split(key)
    raw = init_params(pkey)
    params = prepare_params(raw)
    x = jax.random.normal(xkey, (2, 1, 28, 28), jnp.float32)

    out = jax.block_until_ready(net_forward(x, params))
    assert out.shape == (2, 10)
    # log-softmax rows must normalize: logsumexp(row) ~= 0
    lse = jnp.log(jnp.sum(jnp.exp(out), axis=1))
    assert jnp.allclose(lse, 0.0, atol=1e-4), lse
    # compare against a pure-JAX f32 reference (loose tol: bf16 GEMM operands)
    ref = _reference_forward(x, raw)
    assert jnp.allclose(out, ref, atol=5e-2), (out, ref)
    print("KERNEL_OK")
</pallas_src>

<mosaic_0001>
module attributes {stable_mosaic.version = 11 : i64} {
  func.func @_net_kernel(%arg0: i32, %arg1: memref<96x168xbf16, #tpu.memory_space<vmem>>, %arg2: memref<168x512xbf16, #tpu.memory_space<vmem>>, %arg3: memref<1x128xf32, #tpu.memory_space<vmem>>, %arg4: memref<12x128x1536xbf16, #tpu.memory_space<vmem>>, %arg5: memref<1x384xf32, #tpu.memory_space<vmem>>, %arg6: memref<384x128xbf16, #tpu.memory_space<vmem>>, %arg7: memref<1x128xf32, #tpu.memory_space<vmem>>, %arg8: memref<128x128xbf16, #tpu.memory_space<vmem>>, %arg9: memref<1x128xf32, #tpu.memory_space<vmem>>, %arg10: memref<8x128xf32, #tpu.memory_space<vmem>>) attributes {dimension_semantics = [#tpu.dimension_semantics<parallel>], iteration_bounds = array<i64: 1>, scalar_prefetch = 0 : i64, scratch_operands = 0 : i64, tpu.core_type = #tpu.core_type<tc>, window_params = [{transform_indices = @transform_0, window_bounds = array<i64: 96, 168>}, {pipeline_mode = #tpu.pipeline_mode<synchronous>, transform_indices = @transform_1, window_bounds = array<i64: 168, 512>}, {pipeline_mode = #tpu.pipeline_mode<synchronous>, transform_indices = @transform_2, window_bounds = array<i64: 1, 128>}, {pipeline_mode = #tpu.pipeline_mode<synchronous>, transform_indices = @transform_3, window_bounds = array<i64: 12, 128, 1536>}, {pipeline_mode = #tpu.pipeline_mode<synchronous>, transform_indices = @transform_4, window_bounds = array<i64: 1, 384>}, {pipeline_mode = #tpu.pipeline_mode<synchronous>, transform_indices = @transform_5, window_bounds = array<i64: 384, 128>}, {pipeline_mode = #tpu.pipeline_mode<synchronous>, transform_indices = @transform_6, window_bounds = array<i64: 1, 128>}, {pipeline_mode = #tpu.pipeline_mode<synchronous>, transform_indices = @transform_7, window_bounds = array<i64: 128, 128>}, {pipeline_mode = #tpu.pipeline_mode<synchronous>, transform_indices = @transform_8, window_bounds = array<i64: 1, 128>}, {transform_indices = @transform_9, window_bounds = array<i64: 8, 128>}]} {
    %c0 = arith.constant 0 : index
    %c0_0 = arith.constant 0 : index
    %0 = vector.load %arg1[%c0, %c0_0] : memref<96x168xbf16, #tpu.memory_space<vmem>>, vector<96x168xbf16>
    %c0_1 = arith.constant 0 : index
    %c0_2 = arith.constant 0 : index
    %1 = vector.load %arg2[%c0_1, %c0_2] : memref<168x512xbf16, #tpu.memory_space<vmem>>, vector<168x512xbf16>
    %2 = vector.extract_strided_slice %1 {offsets = [0, 0], sizes = [168, 128], strides = [1, 1]} : vector<168x512xbf16> to vector<168x128xbf16>
    %cst = arith.constant dense<0.000000e+00> : vector<96x128xf32>
    %3 = tpu.matmul %0, %2, %cst {dimension_numbers = #tpu.dot_dimension_numbers<[1], [0], [0], [1], [0, 0, 1, 1], [], []>} : vector<96x168xbf16>, vector<168x128xbf16>, vector<96x128xf32> -> vector<96x128xf32>
    %4 = vector.extract_strided_slice %1 {offsets = [0, 128], sizes = [168, 128], strides = [1, 1]} : vector<168x512xbf16> to vector<168x128xbf16>
    %cst_3 = arith.constant dense<0.000000e+00> : vector<96x128xf32>
    %5 = tpu.matmul %0, %4, %cst_3 {dimension_numbers = #tpu.dot_dimension_numbers<[1], [0], [0], [1], [0, 0, 1, 1], [], []>} : vector<96x168xbf16>, vector<168x128xbf16>, vector<96x128xf32> -> vector<96x128xf32>
    %6 = arith.maximumf %3, %5 : vector<96x128xf32>
    %7 = vector.extract_strided_slice %1 {offsets = [0, 256], sizes = [168, 128], strides = [1, 1]} : vector<168x512xbf16> to vector<168x128xbf16>
    %cst_4 = arith.constant dense<0.000000e+00> : vector<96x128xf32>
    %8 = tpu.matmul %0, %7, %cst_4 {dimension_numbers = #tpu.dot_dimension_numbers<[1], [0], [0], [1], [0, 0, 1, 1], [], []>} : vector<96x168xbf16>, vector<168x128xbf16>, vector<96x128xf32> -> vector<96x128xf32>
    %9 = arith.maximumf %6, %8 : vector<96x128xf32>
    %10 = vector.extract_strided_slice %1 {offsets = [0, 384], sizes = [168, 128], strides = [1, 1]} : vector<168x512xbf16> to vector<168x128xbf16>
    %cst_5 = arith.constant dense<0.000000e+00> : vector<96x128xf32>
    %11 = tpu.matmul %0, %10, %cst_5 {dimension_numbers = #tpu.dot_dimension_numbers<[1], [0], [0], [1], [0, 0, 1, 1], [], []>} : vector<96x168xbf16>, vector<168x128xbf16>, vector<96x128xf32> -> vector<96x128xf32>
    %12 = arith.maximumf %9, %11 : vector<96x128xf32>
    %c0_6 = arith.constant 0 : index
    %c0_7 = arith.constant 0 : index
    %13 = vector.load %arg3[%c0_6, %c0_7] : memref<1x128xf32, #tpu.memory_space<vmem>>, vector<1x128xf32>
    %14 = vector.broadcast %13 : vector<1x128xf32> to vector<96x128xf32>
    %15 = arith.addf %12, %14 : vector<96x128xf32>
    %cst_8 = arith.constant 0.000000e+00 : f32
    %16 = vector.broadcast %cst_8 : f32 to vector<96x128xf32>
    %17 = arith.maximumf %15, %16 : vector<96x128xf32>
    %18 = arith.truncf %17 : vector<96x128xf32> to vector<96x128xbf16>
    %19 = vector.extract_strided_slice %18 {offsets = [0, 0], sizes = [8, 128], strides = [1, 1]} : vector<96x128xbf16> to vector<8x128xbf16>
    %c0_9 = arith.constant 0 : index
    %c0_10 = arith.constant 0 : index
    %c0_11 = arith.constant 0 : index
    %20 = vector.load %arg4[%c0_9, %c0_10, %c0_11] : memref<12x128x1536xbf16, #tpu.memory_space<vmem>>, vector<1x128x1536xbf16>
    %21 = vector.shape_cast %20 : vector<1x128x1536xbf16> to vector<128x1536xbf16>
    %cst_12 = arith.constant dense<0.000000e+00> : vector<8x1536xf32>
    %22 = tpu.matmul %19, %21, %cst_12 {dimension_numbers = #tpu.dot_dimension_numbers<[1], [0], [0], [1], [0, 0, 1, 1], [], []>} : vector<8x128xbf16>, vector<128x1536xbf16>, vector<8x1536xf32> -> vector<8x1536xf32>
    %23 = vector.extract_strided_slice %18 {offsets = [8, 0], sizes = [8, 128], strides = [1, 1]} : vector<96x128xbf16> to vector<8x128xbf16>
    %c1 = arith.constant 1 : index
    %c0_13 = arith.constant 0 : index
    %c0_14 = arith.constant 0 : index
    %24 = vector.load %arg4[%c1, %c0_13, %c0_14] : memref<12x128x1536xbf16, #tpu.memory_space<vmem>>, vector<1x128x1536xbf16>
    %25 = vector.shape_cast %24 : vector<1x128x1536xbf16> to vector<128x1536xbf16>
    %cst_15 = arith.constant dense<0.000000e+00> : vector<8x1536xf32>
    %26 = tpu.matmul %23, %25, %cst_15 {dimension_numbers = #tpu.dot_dimension_numbers<[1], [0], [0], [1], [0, 0, 1, 1], [], []>} : vector<8x128xbf16>, vector<128x1536xbf16>, vector<8x1536xf32> -> vector<8x1536xf32>
    %27 = arith.addf %22, %26 : vector<8x1536xf32>
    %28 = vector.extract_strided_slice %18 {offsets = [16, 0], sizes = [8, 128], strides = [1, 1]} : vector<96x128xbf16> to vector<8x128xbf16>
    %c2 = arith.constant 2 : index
    %c0_16 = arith.constant 0 : index
    %c0_17 = arith.constant 0 : index
    %29 = vector.load %arg4[%c2, %c0_16, %c0_17] : memref<12x128x1536xbf16, #tpu.memory_space<vmem>>, vector<1x128x1536xbf16>
    %30 = vector.shape_cast %29 : vector<1x128x1536xbf16> to vector<128x1536xbf16>
    %cst_18 = arith.constant dense<0.000000e+00> : vector<8x1536xf32>
    %31 = tpu.matmul %28, %30, %cst_18 {dimension_numbers = #tpu.dot_dimension_numbers<[1], [0], [0], [1], [0, 0, 1, 1], [], []>} : vector<8x128xbf16>, vector<128x1536xbf16>, vector<8x1536xf32> -> vector<8x1536xf32>
    %32 = arith.addf %27, %31 : vector<8x1536xf32>
    %33 = vector.extract_strided_slice %18 {offsets = [24, 0], sizes = [8, 128], strides = [1, 1]} : vector<96x128xbf16> to vector<8x128xbf16>
    %c3 = arith.constant 3 : index
    %c0_19 = arith.constant 0 : index
    %c0_20 = arith.constant 0 : index
    %34 = vector.load %arg4[%c3, %c0_19, %c0_20] : memref<12x128x1536xbf16, #tpu.memory_space<vmem>>, vector<1x128x1536xbf16>
    %35 = vector.shape_cast %34 : vector<1x128x1536xbf16> to vector<128x1536xbf16>
    %cst_21 = arith.constant dense<0.000000e+00> : vector<8x1536xf32>
    %36 = tpu.matmul %33, %35, %cst_21 {dimension_numbers = #tpu.dot_dimension_numbers<[1], [0], [0], [1], [0, 0, 1, 1], [], []>} : vector<8x128xbf16>, vector<128x1536xbf16>, vector<8x1536xf32> -> vector<8x1536xf32>
    %37 = arith.addf %32, %36 : vector<8x1536xf32>
    %38 = vector.extract_strided_slice %18 {offsets = [32, 0], sizes = [8, 128], strides = [1, 1]} : vector<96x128xbf16> to vector<8x128xbf16>
    %c4 = arith.constant 4 : index
    %c0_22 = arith.constant 0 : index
    %c0_23 = arith.constant 0 : index
    %39 = vector.load %arg4[%c4, %c0_22, %c0_23] : memref<12x128x1536xbf16, #tpu.memory_space<vmem>>, vector<1x128x1536xbf16>
    %40 = vector.shape_cast %39 : vector<1x128x1536xbf16> to vector<128x1536xbf16>
    %cst_24 = arith.constant dense<0.000000e+00> : vector<8x1536xf32>
    %41 = tpu.matmul %38, %40, %cst_24 {dimension_numbers = #tpu.dot_dimension_numbers<[1], [0], [0], [1], [0, 0, 1, 1], [], []>} : vector<8x128xbf16>, vector<128x1536xbf16>, vector<8x1536xf32> -> vector<8x1536xf32>
    %42 = arith.addf %37, %41 : vector<8x1536xf32>
    %43 = vector.extract_strided_slice %18 {offsets = [40, 0], sizes = [8, 128], strides = [1, 1]} : vector<96x128xbf16> to vector<8x128xbf16>
    %c5 = arith.constant 5 : index
    %c0_25 = arith.constant 0 : index
    %c0_26 = arith.constant 0 : index
    %44 = vector.load %arg4[%c5, %c0_25, %c0_26] : memref<12x128x1536xbf16, #tpu.memory_space<vmem>>, vector<1x128x1536xbf16>
    %45 = vector.shape_cast %44 : vector<1x128x1536xbf16> to vector<128x1536xbf16>
    %cst_27 = arith.constant dense<0.000000e+00> : vector<8x1536xf32>
    %46 = tpu.matmul %43, %45, %cst_27 {dimension_numbers = #tpu.dot_dimension_numbers<[1], [0], [0], [1], [0, 0, 1, 1], [], []>} : vector<8x128xbf16>, vector<128x1536xbf16>, vector<8x1536xf32> -> vector<8x1536xf32>
    %47 = arith.addf %42, %46 : vector<8x1536xf32>
    %48 = vector.extract_strided_slice %18 {offsets = [48, 0], sizes = [8, 128], strides = [1, 1]} : vector<96x128xbf16> to vector<8x128xbf16>
    %c6 = arith.constant 6 : index
    %c0_28 = arith.constant 0 : index
    %c0_29 = arith.constant 0 : index
    %49 = vector.load %arg4[%c6, %c0_28, %c0_29] : memref<12x128x1536xbf16, #tpu.memory_space<vmem>>, vector<1x128x1536xbf16>
    %50 = vector.shape_cast %49 : vector<1x128x1536xbf16> to vector<128x1536xbf16>
    %cst_30 = arith.constant dense<0.000000e+00> : vector<8x1536xf32>
    %51 = tpu.matmul %48, %50, %cst_30 {dimension_numbers = #tpu.dot_dimension_numbers<[1], [0], [0], [1], [0, 0, 1, 1], [], []>} : vector<8x128xbf16>, vector<128x1536xbf16>, vector<8x1536xf32> -> vector<8x1536xf32>
    %52 = arith.addf %47, %51 : vector<8x1536xf32>
    %53 = vector.extract_strided_slice %18 {offsets = [56, 0], sizes = [8, 128], strides = [1, 1]} : vector<96x128xbf16> to vector<8x128xbf16>
    %c7 = arith.constant 7 : index
    %c0_31 = arith.constant 0 : index
    %c0_32 = arith.constant 0 : index
    %54 = vector.load %arg4[%c7, %c0_31, %c0_32] : memref<12x128x1536xbf16, #tpu.memory_space<vmem>>, vector<1x128x1536xbf16>
    %55 = vector.shape_cast %54 : vector<1x128x1536xbf16> to vector<128x1536xbf16>
    %cst_33 = arith.constant dense<0.000000e+00> : vector<8x1536xf32>
    %56 = tpu.matmul %53, %55, %cst_33 {dimension_numbers = #tpu.dot_dimension_numbers<[1], [0], [0], [1], [0, 0, 1, 1], [], []>} : vector<8x128xbf16>, vector<128x1536xbf16>, vector<8x1536xf32> -> vector<8x1536xf32>
    %57 = arith.addf %52, %56 : vector<8x1536xf32>
    %58 = vector.extract_strided_slice %18 {offsets = [64, 0], sizes = [8, 128], strides = [1, 1]} : vector<96x128xbf16> to vector<8x128xbf16>
    %c8 = arith.constant 8 : index
    %c0_34 = arith.constant 0 : index
    %c0_35 = arith.constant 0 : index
    %59 = vector.load %arg4[%c8, %c0_34, %c0_35] : memref<12x128x1536xbf16, #tpu.memory_space<vmem>>, vector<1x128x1536xbf16>
    %60 = vector.shape_cast %59 : vector<1x128x1536xbf16> to vector<128x1536xbf16>
    %cst_36 = arith.constant dense<0.000000e+00> : vector<8x1536xf32>
    %61 = tpu.matmul %58, %60, %cst_36 {dimension_numbers = #tpu.dot_dimension_numbers<[1], [0], [0], [1], [0, 0, 1, 1], [], []>} : vector<8x128xbf16>, vector<128x1536xbf16>, vector<8x1536xf32> -> vector<8x1536xf32>
    %62 = arith.addf %57, %61 : vector<8x1536xf32>
    %63 = vector.extract_strided_slice %18 {offsets = [72, 0], sizes = [8, 128], strides = [1, 1]} : vector<96x128xbf16> to vector<8x128xbf16>
    %c9 = arith.constant 9 : index
    %c0_37 = arith.constant 0 : index
    %c0_38 = arith.constant 0 : index
    %64 = vector.load %arg4[%c9, %c0_37, %c0_38] : memref<12x128x1536xbf16, #tpu.memory_space<vmem>>, vector<1x128x1536xbf16>
    %65 = vector.shape_cast %64 : vector<1x128x1536xbf16> to vector<128x1536xbf16>
    %cst_39 = arith.constant dense<0.000000e+00> : vector<8x1536xf32>
    %66 = tpu.matmul %63, %65, %cst_39 {dimension_numbers = #tpu.dot_dimension_numbers<[1], [0], [0], [1], [0, 0, 1, 1], [], []>} : vector<8x128xbf16>, vector<128x1536xbf16>, vector<8x1536xf32> -> vector<8x1536xf32>
    %67 = arith.addf %62, %66 : vector<8x1536xf32>
    %68 = vector.extract_strided_slice %18 {offsets = [80, 0], sizes = [8, 128], strides = [1, 1]} : vector<96x128xbf16> to vector<8x128xbf16>
    %c10 = arith.constant 10 : index
    %c0_40 = arith.constant 0 : index
    %c0_41 = arith.constant 0 : index
    %69 = vector.load %arg4[%c10, %c0_40, %c0_41] : memref<12x128x1536xbf16, #tpu.memory_space<vmem>>, vector<1x128x1536xbf16>
    %70 = vector.shape_cast %69 : vector<1x128x1536xbf16> to vector<128x1536xbf16>
    %cst_42 = arith.constant dense<0.000000e+00> : vector<8x1536xf32>
    %71 = tpu.matmul %68, %70, %cst_42 {dimension_numbers = #tpu.dot_dimension_numbers<[1], [0], [0], [1], [0, 0, 1, 1], [], []>} : vector<8x128xbf16>, vector<128x1536xbf16>, vector<8x1536xf32> -> vector<8x1536xf32>
    %72 = arith.addf %67, %71 : vector<8x1536xf32>
    %73 = vector.extract_strided_slice %18 {offsets = [88, 0], sizes = [8, 128], strides = [1, 1]} : vector<96x128xbf16> to vector<8x128xbf16>
    %c11 = arith.constant 11 : index
    %c0_43 = arith.constant 0 : index
    %c0_44 = arith.constant 0 : index
    %74 = vector.load %arg4[%c11, %c0_43, %c0_44] : memref<12x128x1536xbf16, #tpu.memory_space<vmem>>, vector<1x128x1536xbf16>
    %75 = vector.shape_cast %74 : vector<1x128x1536xbf16> to vector<128x1536xbf16>
    %cst_45 = arith.constant dense<0.000000e+00> : vector<8x1536xf32>
    %76 = tpu.matmul %73, %75, %cst_45 {dimension_numbers = #tpu.dot_dimension_numbers<[1], [0], [0], [1], [0, 0, 1, 1], [], []>} : vector<8x128xbf16>, vector<128x1536xbf16>, vector<8x1536xf32> -> vector<8x1536xf32>
    %77 = arith.addf %72, %76 : vector<8x1536xf32>
    %78 = vector.extract_strided_slice %77 {offsets = [0, 0], sizes = [8, 384], strides = [1, 1]} : vector<8x1536xf32> to vector<8x384xf32>
    %79 = vector.extract_strided_slice %77 {offsets = [0, 384], sizes = [8, 384], strides = [1, 1]} : vector<8x1536xf32> to vector<8x384xf32>
    %80 = arith.maximumf %78, %79 : vector<8x384xf32>
    %81 = vector.extract_strided_slice %77 {offsets = [0, 768], sizes = [8, 384], strides = [1, 1]} : vector<8x1536xf32> to vector<8x384xf32>
    %82 = vector.extract_strided_slice %77 {offsets = [0, 1152], sizes = [8, 384], strides = [1, 1]} : vector<8x1536xf32> to vector<8x384xf32>
    %83 = arith.maximumf %81, %82 : vector<8x384xf32>
    %84 = arith.maximumf %80, %83 : vector<8x384xf32>
    %c0_46 = arith.constant 0 : index
    %c0_47 = arith.constant 0 : index
    %85 = vector.load %arg5[%c0_46, %c0_47] : memref<1x384xf32, #tpu.memory_space<vmem>>, vector<1x384xf32>
    %86 = vector.broadcast %85 : vector<1x384xf32> to vector<8x384xf32>
    %87 = arith.addf %84, %86 : vector<8x384xf32>
    %cst_48 = arith.constant 0.000000e+00 : f32
    %88 = vector.broadcast %cst_48 : f32 to vector<8x384xf32>
    %89 = arith.maximumf %87, %88 : vector<8x384xf32>
    %90 = arith.truncf %89 : vector<8x384xf32> to vector<8x384xbf16>
    %c0_49 = arith.constant 0 : index
    %c0_50 = arith.constant 0 : index
    %91 = vector.load %arg6[%c0_49, %c0_50] : memref<384x128xbf16, #tpu.memory_space<vmem>>, vector<384x128xbf16>
    %cst_51 = arith.constant dense<0.000000e+00> : vector<8x128xf32>
    %92 = tpu.matmul %90, %91, %cst_51 {dimension_numbers = #tpu.dot_dimension_numbers<[1], [0], [0], [1], [0, 0, 1, 1], [], []>} : vector<8x384xbf16>, vector<384x128xbf16>, vector<8x128xf32> -> vector<8x128xf32>
    %c0_52 = arith.constant 0 : index
    %c0_53 = arith.constant 0 : index
    %93 = vector.load %arg7[%c0_52, %c0_53] : memref<1x128xf32, #tpu.memory_space<vmem>>, vector<1x128xf32>
    %94 = vector.broadcast %93 : vector<1x128xf32> to vector<8x128xf32>
    %95 = arith.addf %92, %94 : vector<8x128xf32>
    %cst_54 = arith.constant 0.000000e+00 : f32
    %96 = vector.broadcast %cst_54 : f32 to vector<8x128xf32>
    %97 = arith.maximumf %95, %96 : vector<8x128xf32>
    %98 = arith.truncf %97 : vector<8x128xf32> to vector<8x128xbf16>
    %c0_55 = arith.constant 0 : index
    %c0_56 = arith.constant 0 : index
    %99 = vector.load %arg8[%c0_55, %c0_56] : memref<128x128xbf16, #tpu.memory_space<vmem>>, vector<128x128xbf16>
    %cst_57 = arith.constant dense<0.000000e+00> : vector<8x128xf32>
    %100 = tpu.matmul %98, %99, %cst_57 {dimension_numbers = #tpu.dot_dimension_numbers<[1], [0], [0], [1], [0, 0, 1, 1], [], []>} : vector<8x128xbf16>, vector<128x128xbf16>, vector<8x128xf32> -> vector<8x128xf32>
    %c0_58 = arith.constant 0 : index
    %c0_59 = arith.constant 0 : index
    %101 = vector.load %arg9[%c0_58, %c0_59] : memref<1x128xf32, #tpu.memory_space<vmem>>, vector<1x128xf32>
    %102 = vector.broadcast %101 : vector<1x128xf32> to vector<8x128xf32>
    %103 = arith.addf %100, %102 : vector<8x128xf32>
    %104 = tpu.iota {dimensions = array<i32: 1>} : vector<8x128xi32>
    %c10_i32 = arith.constant 10 : i32
    %105 = vector.broadcast %c10_i32 : i32 to vector<8x128xi32>
    %106 = arith.cmpi slt, %104, %105 : vector<8x128xi32>
    %cst_60 = arith.constant -1.000000e+30 : f32
    %107 = vector.broadcast %cst_60 : f32 to vector<8x128xf32>
    %108 = arith.select %106, %103, %107 : vector<8x128xi1>, vector<8x128xf32>
    %cst_61 = arith.constant dense<0xFF800000> : vector<8xf32>
    %109 = vector.multi_reduction <maximumf>, %108, %cst_61 [1] : vector<8x128xf32> to vector<8xf32>
    %110 = vector.shape_cast %109 : vector<8xf32> to vector<8x1xf32>
    %111 = vector.broadcast %110 : vector<8x1xf32> to vector<8x128xf32>
    %112 = arith.subf %108, %111 : vector<8x128xf32>
    %113 = math.exp %112 : vector<8x128xf32>
    %cst_62 = arith.constant dense<0.000000e+00> : vector<8xf32>
    %114 = vector.multi_reduction <add>, %113, %cst_62 [1] : vector<8x128xf32> to vector<8xf32>
    %115 = vector.shape_cast %114 : vector<8xf32> to vector<8x1xf32>
    %116 = math.log %115 : vector<8x1xf32>
    %117 = vector.broadcast %110 : vector<8x1xf32> to vector<8x128xf32>
    %118 = arith.subf %108, %117 : vector<8x128xf32>
    %119 = vector.broadcast %116 : vector<8x1xf32> to vector<8x128xf32>
    %120 = arith.subf %118, %119 : vector<8x128xf32>
    %c0_63 = arith.constant 0 : index
    %c0_64 = arith.constant 0 : index
    %121 = vector.load %arg10[%c0_63, %c0_64] : memref<8x128xf32, #tpu.memory_space<vmem>>, vector<8x128xf32>
    tpu.vector_store %arg10[%c0_63, %c0_64], %120 {strides = array<i32>} : memref<8x128xf32, #tpu.memory_space<vmem>>, vector<8x128xf32>,
    return
  }
  func.func @transform_0(%arg0: i32) -> (i32, i32) {
    %c0_i32 = arith.constant 0 : i32
    %c0_i32_0 = arith.constant 0 : i32
    return %arg0, %c0_i32 : i32, i32
  }
  func.func @transform_1(%arg0: i32) -> (i32, i32) {
    %c0_i32 = arith.constant 0 : i32
    %c0_i32_0 = arith.constant 0 : i32
    %c0_i32_1 = arith.constant 0 : i32
    return %c0_i32, %c0_i32_0 : i32, i32
  }
  func.func @transform_2(%arg0: i32) -> (i32, i32) {
    %c0_i32 = arith.constant 0 : i32
    %c0_i32_0 = arith.constant 0 : i32
    %c0_i32_1 = arith.constant 0 : i32
    return %c0_i32, %c0_i32_0 : i32, i32
  }
  func.func @transform_3(%arg0: i32) -> (i32, i32, i32) {
    %c0_i32 = arith.constant 0 : i32
    %c0_i32_0 = arith.constant 0 : i32
    %c0_i32_1 = arith.constant 0 : i32
    %c0_i32_2 = arith.constant 0 : i32
    return %c0_i32, %c0_i32_0, %c0_i32_1 : i32, i32, i32
  }
  func.func @transform_4(%arg0: i32) -> (i32, i32) {
    %c0_i32 = arith.constant 0 : i32
    %c0_i32_0 = arith.constant 0 : i32
    %c0_i32_1 = arith.constant 0 : i32
    return %c0_i32, %c0_i32_0 : i32, i32
  }
  func.func @transform_5(%arg0: i32) -> (i32, i32) {
    %c0_i32 = arith.constant 0 : i32
    %c0_i32_0 = arith.constant 0 : i32
    %c0_i32_1 = arith.constant 0 : i32
    return %c0_i32, %c0_i32_0 : i32, i32
  }
  func.func @transform_6(%arg0: i32) -> (i32, i32) {
    %c0_i32 = arith.constant 0 : i32
    %c0_i32_0 = arith.constant 0 : i32
    %c0_i32_1 = arith.constant 0 : i32
    return %c0_i32, %c0_i32_0 : i32, i32
  }
  func.func @transform_7(%arg0: i32) -> (i32, i32) {
    %c0_i32 = arith.constant 0 : i32
    %c0_i32_0 = arith.constant 0 : i32
    %c0_i32_1 = arith.constant 0 : i32
    return %c0_i32, %c0_i32_0 : i32, i32
  }
  func.func @transform_8(%arg0: i32) -> (i32, i32) {
    %c0_i32 = arith.constant 0 : i32
    %c0_i32_0 = arith.constant 0 : i32
    %c0_i32_1 = arith.constant 0 : i32
    return %c0_i32, %c0_i32_0 : i32, i32
  }
  func.func @transform_9(%arg0: i32) -> (i32, i32) {
    %c0_i32 = arith.constant 0 : i32
    %c0_i32_0 = arith.constant 0 : i32
    return %arg0, %c0_i32 : i32, i32
  }
}

</mosaic_0001>

<bundles_post_ra>
// kernel: net_forward.1
= control target key start
LH: loop header
LB: loop body
LE: loop exit
PB: predicated region body
PF: predicated region fallthrough
CT: control target
= control target key end

     0   :  { %14 = vsyncpa [#allocation3], 0  ;;  %s15646_s0 = inlined_call_operand.vmem [shape: bf16[96,168], index: 0, kind: input, shape index: {}]   ;;  %s15647_s1 = inlined_call_operand.hbm [shape: bf16[168,512], index: 1, kind: input, shape index: {}]   ;;  %s15648_s2 = inlined_call_operand.hbm [shape: f32[1,128], index: 2, kind: input, shape index: {}]   ;;  %s15649_s3 = inlined_call_operand.hbm [shape: bf16[12,128,1536], index: 3, kind: input, shape index: {}]   ;;  %s15650_s4 = inlined_call_operand.hbm [shape: f32[1,384], index: 4, kind: input, shape index: {}]   ;;  %s15651_s5 = inlined_call_operand.hbm [shape: bf16[384,128], index: 5, kind: input, shape index: {}]   ;;  %s15652_s6 = inlined_call_operand.hbm [shape: f32[1,128], index: 6, kind: input, shape index: {}]   ;;  %s15653_s7 = inlined_call_operand.hbm [shape: bf16[128,128], index: 7, kind: input, shape index: {}]   ;;  %s15654_s8 = inlined_call_operand.hbm [shape: f32[1,128], index: 8, kind: input, shape index: {}]   ;;  %s15655_s9 = inlined_call_operand.vmem [shape: f32[8,128], index: 9, kind: output, shape index: {}]  }
   0x1   :  { %15 = vsyncpa [#allocation5], 0 }
   0x2   :  { %16 = vsyncpa [#allocation8], 0 }
   0x3   :  { %17 = vsyncpa [#allocation11], 0 }
   0x4   :  { %18 = vsyncpa [#allocation14], 0  ;;  %s15005_s30 = smov [#allocation4]   ;;  %s15006_s11 = smov [#allocation7]  }
   0x5   :  { %s39_s10 = sshll.u32 %s15005_s30, 4  ;;  %s61_s12 = sshll.u32 %s15006_s11, 4  ;;  %s40_s10 = int_to_ptr.vmem [resolvable:$true] %s39_s10  ;;  %s62_s12 = int_to_ptr.vmem [resolvable:$true] %s61_s12 }
   0x6   :  { %s14819_s15 = scalar_lea.hbm %s15648_s2, 16 }
   0x7   :  { %p14820_p0 = scmp.ne.s32.totalorder %s15648_s2, %s14819_s15  ;;  %p14823_p1 = scmp.lt.u32.totalorder %s14819_s15, %s15648_s2 }
   0x9   :  { %p14825_p2 = pnand %p14823_p1, %p14820_p0 }
   0xb   :  { %14828 = shalt.err (!%p14825_p2)
}
   0xc   :  { %s14829_s20 = scalar_lea.vmem %s40_s10, 16  ;;  %s14833_s21 = scalar_lea.vmem %s40_s10, 32 }
   0xd   :  { %p14830_p3 = scmp.ne.s32.totalorder %s40_s10, %s14829_s20  ;;  %p14834_p4 = scmp.lt.s32.totalorder %s40_s10, %s40_s10 }
   0xe   :  { %p14835_p5 = scmp.lt.s32.totalorder %s14833_s21, %s14829_s20 }
  0x10   :  { %p14836_p6 = por %p14835_p5, %p14834_p4 }
  0x12   :  { %p14837_p7 = pnand %p14836_p6, %p14830_p3 }
  0x14   :  { %14840 = shalt.err (!%p14837_p7)
}
  0x15   :  { %42 = dma.hbm_to_vmem [thread:$0]  %s15648_s2, 16, %s40_s10, [#allocation5]  }
  0x16   :  { %s14841_s26 = scalar_lea.hbm %s15650_s4, 48 }
  0x17   :  { %p14842_p8 = scmp.ne.s32.totalorder %s15650_s4, %s14841_s26  ;;  %p14845_p9 = scmp.lt.u32.totalorder %s14841_s26, %s15650_s4 }
  0x19   :  { %p14847_p10 = pnand %p14845_p9, %p14842_p8 }
  0x1b   :  { %14850 = shalt.err (!%p14847_p10)
}
  0x1c   :  { %s14851_s11 = scalar_lea.vmem %s62_s12, 48  ;;  %s14855_s13 = scalar_lea.vmem %s62_s12, 64 }
  0x1d   :  { %p14852_p11 = scmp.ne.s32.totalorder %s62_s12, %s14851_s11  ;;  %p14856_p12 = scmp.lt.s32.totalorder %s62_s12, %s62_s12 }
  0x1e   :  { %p14857_p13 = scmp.lt.s32.totalorder %s14855_s13, %s14851_s11 }
  0x20   :  { %p14858_p0 = por %p14857_p13, %p14856_p12 }
  0x22   :  { %p14859_p1 = pnand %p14858_p0, %p14852_p11 }
  0x24   :  { %14862 = shalt.err (!%p14859_p1)
}
  0x25   :  { %64 = dma.hbm_to_vmem [thread:$0]  %s15650_s4, 48, %s62_s12, [#allocation8]  }
  0x26   :  { %s15007_s14 = smov [#allocation10]   ;;  %s15008_s16 = smov [#allocation2]  }
  0x27   :  { %s83_s15 = sshll.u32 %s15007_s14, 4  ;;  %s26_s17 = sshll.u32 %s15008_s16, 4  ;;  %s84_s15 = int_to_ptr.vmem [resolvable:$true] %s83_s15  ;;  %s15096_s17 = int_to_ptr.vmem [resolvable:$true] %s26_s17 }
  0x28   :  { %s14863_s20 = scalar_lea.hbm %s15652_s6, 16 }
  0x29   :  { %p14864_p2 = scmp.ne.s32.totalorder %s15652_s6, %s14863_s20  ;;  %p14867_p3 = scmp.lt.u32.totalorder %s14863_s20, %s15652_s6 }
  0x2b   :  { %p14869_p4 = pnand %p14867_p3, %p14864_p2 }
  0x2d   :  { %14872 = shalt.err (!%p14869_p4)
}
  0x2e   :  { %s14873_s4 = scalar_lea.vmem %s84_s15, 16  ;;  %s14877_s12 = scalar_lea.vmem %s84_s15, 32 }
  0x2f   :  { %p14874_p5 = scmp.ne.s32.totalorder %s84_s15, %s14873_s4  ;;  %p14878_p6 = scmp.lt.s32.totalorder %s84_s15, %s84_s15 }
  0x30   :  { %p14879_p7 = scmp.lt.s32.totalorder %s14877_s12, %s14873_s4 }
  0x32   :  { %p14880_p8 = por %p14879_p7, %p14878_p6 }
  0x34   :  { %p14881_p9 = pnand %p14880_p8, %p14874_p5 }
  0x36   :  { %14884 = shalt.err (!%p14881_p9)
}
  0x37   :  { %86 = dma.hbm_to_vmem [thread:$0]  %s15652_s6, 16, %s84_s15, [#allocation11]  }
  0x38   :  { %s14885_s29 = scalar_lea.hbm %s15647_s1, 5376 }
  0x39   :  { %p14886_p10 = scmp.ne.s32.totalorder %s15647_s1, %s14885_s29  ;;  %p14889_p11 = scmp.lt.u32.totalorder %s14885_s29, %s15647_s1 }
  0x3b   :  { %p14891_p12 = pnand %p14889_p11, %p14886_p10 }
  0x3d   :  { %14894 = shalt.err (!%p14891_p12)
}
  0x3e   :  { %s14895_s10 = scalar_lea.vmem %s15096_s17, 5376  ;;  %p14900_p0 = scmp.lt.s32.totalorder %s15096_s17, %s15096_s17 }
  0x3f   :  { %p14896_p13 = scmp.ne.s32.totalorder %s15096_s17, %s14895_s10  ;;  %p14901_p1 = scmp.lt.s32.totalorder %s14895_s10, %s14895_s10 }
  0x41   :  { %p14902_p2 = por %p14901_p1, %p14900_p0 }
  0x43   :  { %p14903_p3 = pnand %p14902_p2, %p14896_p13 }
  0x45   :  { %14906 = shalt.err (!%p14903_p3)
}
  0x46   :  { %s15009_s6 = smov 256   ;;  %s15010_s14 = smov 16  }
  0x47   :  { %32 = dma.hbm_to_vmem [thread:$0]  %s15647_s1, 5376, %s15096_s17, [#allocation3], %s15009_s6, %s15009_s6, %s15010_s14  }
  0x48   :  { %s15011_s18 = smov [#allocation6]   ;;  %s14907_s22 = scalar_lea.hbm %s15649_s3, 147456 }
  0x49   :  { %s48_s19 = sshll.u32 %s15011_s18, 4  ;;  %p14908_p4 = scmp.ne.s32.totalorder %s15649_s3, %s14907_s22  ;;  %s49_s19 = int_to_ptr.vmem [resolvable:$true] %s48_s19 }
  0x4a   :  { %p14911_p5 = scmp.lt.u32.totalorder %s14907_s22, %s15649_s3 }
  0x4c   :  { %p14913_p6 = pnand %p14911_p5, %p14908_p4 }
  0x4e   :  { %14916 = shalt.err (!%p14913_p6)
}
  0x4f   :  { %s14917_s25 = scalar_lea.vmem %s49_s19, 147456  ;;  %p14922_p8 = scmp.lt.s32.totalorder %s49_s19, %s49_s19 }
  0x50   :  { %p14918_p7 = scmp.ne.s32.totalorder %s49_s19, %s14917_s25  ;;  %p14923_p9 = scmp.lt.s32.totalorder %s14917_s25, %s14917_s25 }
  0x52   :  { %p14924_p10 = por %p14923_p9, %p14922_p8 }
  0x54   :  { %p14925_p11 = pnand %p14924_p10, %p14918_p7 }
  0x56   :  { %14928 = shalt.err (!%p14925_p11)
}
  0x57   :  { %s15012_s1 = smov 768   ;;  %s15013_s17 = smov 48  }
  0x58   :  { %54 = dma.hbm_to_vmem [thread:$0]  %s15649_s3, 147456, %s49_s19, [#allocation5], %s15012_s1, %s15012_s1, %s15013_s17  }
  0x59   :  { %s15014_s28 = smov [#allocation9]   ;;  %s14929_s13 = scalar_lea.hbm %s15651_s5, 3072 }
  0x5a   :  { %s70_s29 = sshll.u32 %s15014_s28, 4  ;;  %p14930_p12 = scmp.ne.s32.totalorder %s15651_s5, %s14929_s13  ;;  %s71_s29 = int_to_ptr.vmem [resolvable:$true] %s70_s29 }
  0x5b   :  { %p14933_p13 = scmp.lt.u32.totalorder %s14929_s13, %s15651_s5 }
  0x5d   :  { %p14935_p0 = pnand %p14933_p13, %p14930_p12 }
  0x5f   :  { %14938 = shalt.err (!%p14935_p0)
}
  0x60   :  { %s14939_s15 = scalar_lea.vmem %s71_s29, 3072  ;;  %p14944_p2 = scmp.lt.s32.totalorder %s71_s29, %s71_s29 }
  0x61   :  { %p14940_p1 = scmp.ne.s32.totalorder %s71_s29, %s14939_s15  ;;  %p14945_p3 = scmp.lt.s32.totalorder %s14939_s15, %s14939_s15 }
  0x63   :  { %p14946_p4 = por %p14945_p3, %p14944_p2 }
  0x65   :  { %p14947_p5 = pnand %p14946_p4, %p14940_p1 }
  0x67   :  { %14950 = shalt.err (!%p14947_p5)
}
  0x68   :  { %s15015_s3 = smov 64   ;;  %s15016_s16 = smov 4  }
  0x69   :  { %76 = dma.hbm_to_vmem [thread:$0]  %s15651_s5, 3072, %s71_s29, [#allocation8], %s15015_s3, %s15015_s3, %s15016_s16  }
  0x6a   :  { %s15017_s20 = smov [#allocation12]   ;;  %s15018_s22 = smov [#allocation13]  }
  0x6b   :  { %s92_s21 = sshll.u32 %s15017_s20, 4  ;;  %s105_s23 = sshll.u32 %s15018_s22, 4  ;;  %s93_s21 = int_to_ptr.vmem [resolvable:$true] %s92_s21  ;;  %s106_s23 = int_to_ptr.vmem [resolvable:$true] %s105_s23 }
  0x6c   :  { %s14951_s12 = scalar_lea.hbm %s15653_s7, 1024 }
  0x6d   :  { %p14952_p6 = scmp.ne.s32.totalorder %s15653_s7, %s14951_s12  ;;  %p14955_p7 = scmp.lt.u32.totalorder %s14951_s12, %s15653_s7 }
  0x6f   :  { %p14957_p8 = pnand %p14955_p7, %p14952_p6 }
  0x71   :  { %14960 = shalt.err (!%p14957_p8)
}
  0x72   :  { %s14961_s5 = scalar_lea.vmem %s93_s21, 1024  ;;  %p14966_p10 = scmp.lt.s32.totalorder %s93_s21, %s93_s21 }
  0x73   :  { %p14962_p9 = scmp.ne.s32.totalorder %s93_s21, %s14961_s5  ;;  %p14967_p11 = scmp.lt.s32.totalorder %s14961_s5, %s14961_s5 }
  0x75   :  { %p14968_p12 = por %p14967_p11, %p14966_p10 }
  0x77   :  { %p14969_p13 = pnand %p14968_p12, %p14962_p9 }
  0x79   :  { %14972 = shalt.err (!%p14969_p13)
}
  0x7a   :  { %98 = dma.hbm_to_vmem [thread:$0]  %s15653_s7, 1024, %s93_s21, [#allocation11], %s15015_s3, %s15015_s3, %s15016_s16  }
  0x7b   :  { %s14973_s11 = scalar_lea.hbm %s15654_s8, 16 }
  0x7c   :  { %p14974_p0 = scmp.ne.s32.totalorder %s15654_s8, %s14973_s11  ;;  %p14977_p1 = scmp.lt.u32.totalorder %s14973_s11, %s15654_s8 }
  0x7e   :  { %p14979_p2 = pnand %p14977_p1, %p14974_p0 }
  0x80   :  { %14982 = shalt.err (!%p14979_p2)
}
  0x81   :  { %s14983_s14 = scalar_lea.vmem %s106_s23, 16  ;;  %s14987_s15 = scalar_lea.vmem %s106_s23, 32 }
  0x82   :  { %p14984_p3 = scmp.ne.s32.totalorder %s106_s23, %s14983_s14  ;;  %p14988_p4 = scmp.lt.s32.totalorder %s106_s23, %s106_s23 }
  0x83   :  { %p14989_p5 = scmp.lt.s32.totalorder %s14987_s15, %s14983_s14 }
  0x85   :  { %p14990_p6 = por %p14989_p5, %p14988_p4 }
  0x87   :  { %p14991_p7 = pnand %p14990_p6, %p14984_p3 }
  0x89   :  { %14994 = shalt.err (!%p14991_p7)
}
  0x8a   :  { %108 = dma.hbm_to_vmem [thread:$0]  %s15654_s8, 16, %s106_s23, [#allocation14]  }
  0x8b   :  { %14995 = dma.done.wait [#allocation3], 5376  }
  0x8c   :  { %14996 = vsyncadd [#allocation3], 4294961920 }
  0x8d   :  { %14997 = dma.done.wait [#allocation5], 147472  }
  0x8e   :  { %14998 = vsyncadd [#allocation5], 4294819824 }
  0x8f   :  { %14999 = dma.done.wait [#allocation8], 3120  }
  0x90   :  { %15000 = vsyncadd [#allocation8], 4294964176 }
  0x91   :  { %15001 = dma.done.wait [#allocation11], 1040  }
  0x92   :  { %15002 = vsyncadd [#allocation11], 4294966256 }
  0x93   :  { %15003 = dma.done.wait [#allocation14], 16  }
  0x94   :  { %15004 = vsyncadd [#allocation14], 4294967280  ;;  %v15019_v0 = vmov 0   ;;  %v12973_v1 = vld [vmem:[#allocation2] ss:$16 sps:$4 sm:$0xff]   ;;  %vm305_vm0 = vcmask 326656  }
  0x95   :  { %328 = vmatprep.subr.bf16.mxu0 %v15019_v0  ;;  %454 = vmatprep.subr.bf16.mxu1 %v15019_v0  ;;  %v12975_v2 = vld [vmem:[#allocation2 + $0x4] ss:$16 sps:$4 sm:$0xff]   ;;  %v12976_v3 = vld [vmem:[#allocation2 + $0x20] ss:$16 sps:$4 sm:$0xff]   ;;  %vm324_vm1 = vcmask 1043456   ;;  %v187_v55 = vld [vmem:[#allocation2 + $0x148] sm:$0xff] }
  0x96   :  { %329 = vmatpush1.bf16.msra.mxu0 %v12973_v1  ;;  %455 = vmatpush1.bf16.msra.mxu1 %v12975_v2  ;;  %v12978_v4 = vld [vmem:[#allocation2 + $0x24] ss:$16 sps:$4 sm:$0xff]   ;;  %v12979_v5 = vld [vmem:[#allocation2 + $0x40] ss:$16 sps:$4 sm:$0xff]   ;;  %v13008_v28 = vld [vmem:[#allocation2 + $0x8] ss:$16 sps:$4 sm:$0xff]   ;;  %v11401_v59 = vcombine.low %v187_v55, %v187_v55  ;;  %v11418_v60 = vcombine.high %v187_v55, %v187_v55 }
  0x97   :  { %330 = vmatprep.subr.bf16.mxu0 %v15019_v0  ;;  %456 = vmatprep.subr.bf16.mxu1 %v15019_v0  ;;  %v12981_v6 = vld [vmem:[#allocation2 + $0x44] ss:$16 sps:$4 sm:$0xff]   ;;  %v12982_v7 = vld [vmem:[#allocation2 + $0x60] ss:$16 sps:$4 sm:$0xff]   ;;  %v13010_v29 = vld [vmem:[#allocation2 + $0xc] ss:$16 sps:$4 sm:$0xff]  }
  0x98   :  { %v12984_v8 = vld [vmem:[#allocation2 + $0x64] ss:$16 sps:$4 sm:$0xff]   ;;  %v12985_v9 = vld [vmem:[#allocation2 + $0x80] ss:$16 sps:$4 sm:$0xff]   ;;  %v13011_v31 = vld [vmem:[#allocation2 + $0x28] ss:$16 sps:$4 sm:$0xff]  }
  0x99   :  { %v15186_v10 = vld [vmem:[%s15646_s0 + $0x4] ss:$8 sps:$4 sm:$0xff]   ;;  %v12988_v12 = vld [vmem:[#allocation2 + $0xa0] ss:$16 sps:$4 sm:$0xff]   ;;  %v15216_v30 = vld [vmem:[%s15646_s0 + $0x14] ss:$8 sps:$4 sm:$0xff]  }
  0x9a   :  { %331 = vmatpush1.bf16.msra.mxu0 %v12976_v3  ;;  %457 = vmatpush1.bf16.msra.mxu1 %v12978_v4  ;;  %v12987_v11 = vld [vmem:[#allocation2 + $0x84] ss:$16 sps:$4 sm:$0xff]   ;;  %v12991_v14 = vld [vmem:[#allocation2 + $0xc0] ss:$16 sps:$4 sm:$0xff]   ;;  %v13016_v32 = vld [vmem:[#allocation2 + $0x2c] ss:$16 sps:$4 sm:$0xff]  }
  0x9b   :  { %332 = vmatprep.subr.bf16.mxu0 %v15019_v0  ;;  %458 = vmatprep.subr.bf16.mxu1 %v15019_v0  ;;  %v12990_v13 = vld [vmem:[#allocation2 + $0xa4] ss:$16 sps:$4 sm:$0xff]   ;;  %v12994_v16 = vld [vmem:[#allocation2 + $0xe0] ss:$16 sps:$4 sm:$0xff]   ;;  %v13017_v34 = vld [vmem:[#allocation2 + $0x48] ss:$16 sps:$4 sm:$0xff]  }
  0x9c   :  { %11368 = vmatprep.mubr.msk.bf16.mxu0 %vm305_vm0, %v15186_v10  ;;  %11385 = vmatprep.mubr.msk.bf16.mxu1 %vm305_vm0, %v15186_v10  ;;  %v12993_v15 = vld [vmem:[#allocation2 + $0xc4] ss:$16 sps:$4 sm:$0xff]   ;;  %v12997_v18 = vld [vmem:[#allocation2 + $0x100] ss:$16 sps:$4 sm:$0xff]   ;;  %v13019_v35 = vld [vmem:[#allocation2 + $0x4c] ss:$16 sps:$4 sm:$0xff]  }
  0x9d   :  { %v12996_v17 = vld [vmem:[#allocation2 + $0xe4] ss:$16 sps:$4 sm:$0xff]   ;;  %v13000_v21 = vld [vmem:[#allocation2 + $0x120] ss:$16 sps:$4 sm:$0xff]   ;;  %v13022_v37 = vld [vmem:[#allocation2 + $0x68] ss:$16 sps:$4 sm:$0xff]  }
  0x9e   :  { %333 = vmatpush1.bf16.msra.mxu0 %v12979_v5  ;;  %459 = vmatpush1.bf16.msra.mxu1 %v12981_v6  ;;  %v12999_v19 = vld [vmem:[#allocation2 + $0x104] ss:$16 sps:$4 sm:$0xff]   ;;  %v15209_v26 = vld [vmem:[%s15646_s0] ss:$8 sps:$4 sm:$0xff]   ;;  %v15226_v33 = vld [vmem:[%s15646_s0 + $0x10] ss:$8 sps:$4 sm:$0xff]  }
  0x9f   :  { %334 = vmatprep.subr.bf16.mxu0 %v15019_v0  ;;  %460 = vmatprep.subr.bf16.mxu1 %v15019_v0  ;;  %v186_v20 = vld [vmem:[#allocation2 + $0x140] sm:$0xff]  ;;  %v13025_v38 = vld [vmem:[#allocation2 + $0x6c] ss:$16 sps:$4 sm:$0xff]   ;;  %v13026_v40 = vld [vmem:[#allocation2 + $0x88] ss:$16 sps:$4 sm:$0xff]   ;;  %v611_v61 = vsel %vm324_vm1, %v11401_v59, 0 }
  0xa0   :  { %v13002_v22 = vld [vmem:[#allocation2 + $0x124] ss:$16 sps:$4 sm:$0xff]   ;;  %v11367_v23 = vcombine.low %v186_v20, %v186_v20  ;;  %v11384_v24 = vcombine.high %v186_v20, %v186_v20  ;;  %v15246_v39 = vld [vmem:[%s15646_s0 + $0x20] ss:$8 sps:$4 sm:$0xff]   ;;  %v13028_v41 = vld [vmem:[#allocation2 + $0x8c] ss:$16 sps:$4 sm:$0xff]  }
  0xa1   :  { %v15236_v36 = vld [vmem:[%s15646_s0 + $0x24] ss:$8 sps:$4 sm:$0xff]   ;;  %v15256_v42 = vld [vmem:[%s15646_s0 + $0x34] ss:$8 sps:$4 sm:$0xff]   ;;  %v13031_v43 = vld [vmem:[#allocation2 + $0xa8] ss:$16 sps:$4 sm:$0xff]  }
  0xa2   :  { %335 = vmatpush1.bf16.msra.mxu0 %v12982_v7  ;;  %461 = vmatpush1.bf16.msra.mxu1 %v12984_v8  ;;  %v326_v25 = vsel %vm324_vm1, %v11367_v23, 0  ;;  %v452_v27 = vsel %vm324_vm1, %v11384_v24, 0  ;;  %v13034_v44 = vld [vmem:[#allocation2 + $0xac] ss:$16 sps:$4 sm:$0xff]   ;;  %v15266_v45 = vld [vmem:[%s15646_s0 + $0x30] ss:$8 sps:$4 sm:$0xff]  }
  0xa3   :  { %336 = vmatprep.subr.bf16.mxu0 %v15019_v0  ;;  %462 = vmatprep.subr.bf16.mxu1 %v15019_v0  ;;  %v13035_v46 = vld [vmem:[#allocation2 + $0xc8] ss:$16 sps:$4 sm:$0xff]   ;;  %v13037_v47 = vld [vmem:[#allocation2 + $0xcc] ss:$16 sps:$4 sm:$0xff]   ;;  %v749_v62 = vsel %vm324_vm1, %v11418_v60, 0  ;;  %vm15021_vm2 = vmmov 0  }
  0xa4   :  { %v15276_v48 = vld [vmem:[%s15646_s0 + $0x44] ss:$8 sps:$4 sm:$0xff]   ;;  %v13041_v49 = vld [vmem:[#allocation2 + $0xe8] ss:$16 sps:$4 sm:$0xff]   ;;  %v13047_v54 = vld [vmem:[%s15646_s0 + $0x54] ss:$8 sps:$4 sm:$0xff]  }
  0xa5   :  { %v13043_v50 = vld [vmem:[#allocation2 + $0xec] ss:$16 sps:$4 sm:$0xff]   ;;  %v13040_v51 = vld [vmem:[%s15646_s0 + $0x40] ss:$8 sps:$4 sm:$0xff]   ;;  %v13049_v58 = vld [vmem:[%s15646_s0 + $0x50] ss:$8 sps:$4 sm:$0xff]  }
  0xa6   :  { %337 = vmatpush1.bf16.msra.mxu0 %v12985_v9  ;;  %463 = vmatpush1.bf16.msra.mxu1 %v12987_v11  ;;  %v13044_v52 = vld [vmem:[#allocation2 + $0x108] ss:$16 sps:$4 sm:$0xff]   ;;  %v13046_v53 = vld [vmem:[#allocation2 + $0x10c] ss:$16 sps:$4 sm:$0xff]   ;;  %v13055_v63 = vld [vmem:[#allocation6 + $0x300] ss:$48 sps:$4 sm:$0xff]  }
  0xa7   :  { %338 = vmatprep.subr.bf16.mxu0 %v15019_v0  ;;  %464 = vmatprep.subr.bf16.mxu1 %v15019_v0  ;;  %v13050_v56 = vld [vmem:[#allocation2 + $0x128] ss:$16 sps:$4 sm:$0xff]   ;;  %v13052_v57 = vld [vmem:[#allocation2 + $0x12c] ss:$16 sps:$4 sm:$0xff]   ;;  %v13061_v4 = vld [vmem:[#allocation6 + $0x360] ss:$48 sps:$4 sm:$0xff]  }
  0xa8   :  { %v13057_v1 = vld [vmem:[#allocation6 + $0x304] ss:$48 sps:$4 sm:$0xff]   ;;  %v13058_v2 = vld [vmem:[#allocation6 + $0x308] ss:$48 sps:$4 sm:$0xff]   ;;  %v13060_v3 = vld [vmem:[#allocation6 + $0x30c] ss:$48 sps:$4 sm:$0xff]  }
  0xa9   :  { %v13063_v5 = vld [vmem:[#allocation6 + $0x364] ss:$48 sps:$4 sm:$0xff]   ;;  %v13064_v6 = vld [vmem:[#allocation6 + $0x368] ss:$48 sps:$4 sm:$0xff]   ;;  %v13066_v7 = vld [vmem:[#allocation6 + $0x36c] ss:$48 sps:$4 sm:$0xff]  }
  0xaa   :  { %339 = vmatpush1.bf16.msra.mxu0 %v12988_v12  ;;  %465 = vmatpush1.bf16.msra.mxu1 %v12990_v13  ;;  %v13067_v8 = vld [vmem:[#allocation6 + $0x3c0] ss:$48 sps:$4 sm:$0xff]   ;;  %v13069_v9 = vld [vmem:[#allocation6 + $0x3c4] ss:$48 sps:$4 sm:$0xff]   ;;  %v13072_v11 = vld [vmem:[#allocation6 + $0x3cc] ss:$48 sps:$4 sm:$0xff]  }
  0xab   :  { %340 = vmatprep.subr.bf16.mxu0 %v15019_v0  ;;  %466 = vmatprep.subr.bf16.mxu1 %v15019_v0  ;;  %v13073_v12 = vld [vmem:[#allocation6 + $0x420] ss:$48 sps:$4 sm:$0xff]   ;;  %v13075_v13 = vld [vmem:[#allocation6 + $0x424] ss:$48 sps:$4 sm:$0xff]   ;;  %v13090_v23 = vld [vmem:[#allocation6 + $0x4ec] ss:$48 sps:$4 sm:$0xff]  }
  0xac   :  { %v13085_v20 = vld [vmem:[#allocation6 + $0x4e0] ss:$48 sps:$4 sm:$0xff]   ;;  %v13093_v24 = vld [vmem:[#allocation6 + $0x544] ss:$48 sps:$4 sm:$0xff]  }
  0xae   :  { %341 = vmatpush1.bf16.msra.mxu0 %v12991_v14  ;;  %467 = vmatpush1.bf16.msra.mxu1 %v12993_v15  ;;  %v13076_v14 = vld [vmem:[#allocation6 + $0x428] ss:$48 sps:$4 sm:$0xff]   ;;  %v13078_v15 = vld [vmem:[#allocation6 + $0x42c] ss:$48 sps:$4 sm:$0xff]  }
  0xaf   :  { %342 = vmatprep.subr.bf16.mxu0 %v15019_v0  ;;  %468 = vmatprep.subr.bf16.mxu1 %v15019_v0 }
  0xb2   :  { %343 = vmatpush1.bf16.msra.mxu0 %v12994_v16  ;;  %469 = vmatpush1.bf16.msra.mxu1 %v12996_v17  ;;  %v13079_v16 = vld [vmem:[#allocation6 + $0x480] ss:$48 sps:$4 sm:$0xff]   ;;  %v13081_v17 = vld [vmem:[#allocation6 + $0x484] ss:$48 sps:$4 sm:$0xff]  }
  0xb3   :  { %344 = vmatprep.subr.bf16.mxu0 %v15019_v0  ;;  %470 = vmatprep.subr.bf16.mxu1 %v15019_v0 }
  0xb6   :  { %345 = vmatpush1.bf16.msra.mxu0 %v12997_v18  ;;  %471 = vmatpush1.bf16.msra.mxu1 %v12999_v19  ;;  %v13082_v18 = vld [vmem:[#allocation6 + $0x488] ss:$48 sps:$4 sm:$0xff]   ;;  %v13084_v19 = vld [vmem:[#allocation6 + $0x48c] ss:$48 sps:$4 sm:$0xff]  }
  0xb7   :  { %346 = vmatprep.subr.bf16.mxu0 %v15019_v0  ;;  %472 = vmatprep.subr.bf16.mxu1 %v15019_v0 }
  0xba   :  { %347 = vmatpush1.bf16.msra.mxu0 %v13000_v21  ;;  %473 = vmatpush1.bf16.msra.mxu1 %v13002_v22  ;;  %v13087_v21 = vld [vmem:[#allocation6 + $0x4e4] ss:$48 sps:$4 sm:$0xff]   ;;  %v13088_v22 = vld [vmem:[#allocation6 + $0x4e8] ss:$48 sps:$4 sm:$0xff]  }
  0xbb   :  { %348 = vmatprep.subr.bf16.mxu0 %v15019_v0  ;;  %474 = vmatprep.subr.bf16.mxu1 %v15019_v0 }
  0xbe   :  { %349 = vmatpush1.bf16.msra.mxu0 %v326_v25  ;;  %475 = vmatpush1.bf16.msra.mxu1 %v452_v27  ;;  %v13096_v25 = vld [vmem:[#allocation6 + $0x54c] ss:$48 sps:$4 sm:$0xff]   ;;  %v13094_v27 = vld [vmem:[#allocation6 + $0x548] ss:$48 sps:$4 sm:$0xff]  }
  0xbf   :  { %613 = vmatprep.subr.bf16.mxu0 %v15019_v0  ;;  %751 = vmatprep.subr.bf16.mxu1 %v15019_v0 }
  0xc1   :  { %361 = vmatmul.mubr.bf16.vlgmr.msra.gmra.mrb[0].mxu0 %v15209_v26  ;;  %487 = vmatmul.mubr.bf16.vlgmr.msra.gmra.mrb[0].mxu1 %v15209_v26 }
  0xc2   :  { %614 = vmatpush1.bf16.msra.mxu0 %v13008_v28  ;;  %752 = vmatpush1.bf16.msra.mxu1 %v13010_v29  ;;  %v13099_v28 = vld [vmem:[#allocation6 + $0x5a4] ss:$48 sps:$4 sm:$0xff]   ;;  %v13102_v29 = vld [vmem:[#allocation6 + $0x5ac] ss:$48 sps:$4 sm:$0xff]  }
  0xc3   :  { %615 = vmatprep.subr.bf16.mxu0 %v15019_v0  ;;  %11369 = vmatprep.mubr.msk.bf16.mxu0 %vm305_vm0, %v15216_v30 }
  0xc4   :  { %11386 = vmatprep.mubr.msk.bf16.mxu1 %vm305_vm0, %v15216_v30  ;;  %753 = vmatprep.subr.bf16.mxu1 %v15019_v0 }
  0xc6   :  { %616 = vmatpush1.bf16.msra.mxu0 %v13011_v31  ;;  %754 = vmatpush1.bf16.msra.mxu1 %v13016_v32  ;;  %v13100_v31 = vld [vmem:[#allocation6 + $0x5a8] ss:$48 sps:$4 sm:$0xff]   ;;  %v13105_v32 = vld [vmem:[#allocation6 + $0x314] ss:$48 sps:$4 sm:$0xff]  }
  0xc7   :  { %617 = vmatprep.subr.bf16.mxu0 %v15019_v0  ;;  %755 = vmatprep.subr.bf16.mxu1 %v15019_v0 }
  0xc9   :  { %369 = vmatmul.mubr.bf16.gmra.mrb[4].mxu0 %v15226_v33  ;;  %495 = vmatmul.mubr.bf16.gmra.mrb[4].mxu1 %v15226_v33 }
  0xca   :  { %618 = vmatpush1.bf16.msra.mxu0 %v13017_v34  ;;  %756 = vmatpush1.bf16.msra.mxu1 %v13019_v35 }
  0xcb   :  { %619 = vmatprep.subr.bf16.mxu0 %v15019_v0  ;;  %11370 = vmatprep.mubr.msk.bf16.mxu0 %vm305_vm0, %v15236_v36 }
  0xcc   :  { %11387 = vmatprep.mubr.msk.bf16.mxu1 %vm305_vm0, %v15236_v36  ;;  %757 = vmatprep.subr.bf16.mxu1 %v15019_v0 }
  0xce   :  { %620 = vmatpush1.bf16.msra.mxu0 %v13022_v37  ;;  %758 = vmatpush1.bf16.msra.mxu1 %v13025_v38 }
  0xcf   :  { %621 = vmatprep.subr.bf16.mxu0 %v15019_v0  ;;  %759 = vmatprep.subr.bf16.mxu1 %v15019_v0 }
  0xd1   :  { %377 = vmatmul.mubr.bf16.gmra.mrb[8].mxu0 %v15246_v39  ;;  %503 = vmatmul.mubr.bf16.gmra.mrb[8].mxu1 %v15246_v39 }
  0xd2   :  { %622 = vmatpush1.bf16.msra.mxu0 %v13026_v40  ;;  %760 = vmatpush1.bf16.msra.mxu1 %v13028_v41 }
  0xd3   :  { %623 = vmatprep.subr.bf16.mxu0 %v15019_v0  ;;  %11371 = vmatprep.mubr.msk.bf16.mxu0 %vm305_vm0, %v15256_v42 }
  0xd4   :  { %11388 = vmatprep.mubr.msk.bf16.mxu1 %vm305_vm0, %v15256_v42  ;;  %761 = vmatprep.subr.bf16.mxu1 %v15019_v0 }
  0xd6   :  { %624 = vmatpush1.bf16.msra.mxu0 %v13031_v43  ;;  %762 = vmatpush1.bf16.msra.mxu1 %v13034_v44 }
  0xd7   :  { %625 = vmatprep.subr.bf16.mxu0 %v15019_v0  ;;  %763 = vmatprep.subr.bf16.mxu1 %v15019_v0 }
  0xd9   :  { %385 = vmatmul.mubr.bf16.gmra.mrb[12].mxu0 %v15266_v45  ;;  %511 = vmatmul.mubr.bf16.gmra.mrb[12].mxu1 %v15266_v45 }
  0xda   :  { %626 = vmatpush1.bf16.msra.mxu0 %v13035_v46  ;;  %764 = vmatpush1.bf16.msra.mxu1 %v13037_v47 }
  0xdb   :  { %11372 = vmatprep.mubr.msk.bf16.mxu0 %vm305_vm0, %v15276_v48  ;;  %11389 = vmatprep.mubr.msk.bf16.mxu1 %vm305_vm0, %v15276_v48 }
  0xdc   :  { %627 = vmatprep.subr.bf16.mxu0 %v15019_v0  ;;  %765 = vmatprep.subr.bf16.mxu1 %v15019_v0 }
  0xde   :  { %628 = vmatpush1.bf16.msra.mxu0 %v13041_v49  ;;  %766 = vmatpush1.bf16.msra.mxu1 %v13043_v50 }
  0xdf   :  { %629 = vmatprep.subr.bf16.mxu0 %v15019_v0  ;;  %767 = vmatprep.subr.bf16.mxu1 %v15019_v0 }
  0xe1   :  { %393 = vmatmul.mubr.bf16.gmra.mrb[16].mxu0 %v13040_v51  ;;  %519 = vmatmul.mubr.bf16.gmra.mrb[16].mxu1 %v13040_v51 }
  0xe2   :  { %630 = vmatpush1.bf16.msra.mxu0 %v13044_v52  ;;  %768 = vmatpush1.bf16.msra.mxu1 %v13046_v53 }
  0xe3   :  { %11373 = vmatprep.mubr.msk.bf16.mxu0 %vm305_vm0, %v13047_v54  ;;  %11390 = vmatprep.mubr.msk.bf16.mxu1 %vm305_vm0, %v13047_v54 }
  0xe4   :  { %631 = vmatprep.subr.bf16.mxu0 %v15019_v0  ;;  %769 = vmatprep.subr.bf16.mxu1 %v15019_v0 }
  0xe6   :  { %632 = vmatpush1.bf16.msra.mxu0 %v13050_v56  ;;  %770 = vmatpush1.bf16.msra.mxu1 %v13052_v57 }
  0xe7   :  { %633 = vmatprep.subr.bf16.mxu0 %v15019_v0  ;;  %771 = vmatprep.subr.bf16.mxu1 %v15019_v0 }
  0xe9   :  { %401 = vmatmul.mubr.bf16.gmra.mrb[20].mxu0 %v13049_v58  ;;  %527 = vmatmul.mubr.bf16.gmra.mrb[20].mxu1 %v13049_v58 }
  0xea   :  { %634 = vmatpush1.bf16.msra.mxu0 %v611_v61  ;;  %772 = vmatpush1.bf16.msra.mxu1 %v749_v62 }
  0xeb   :  { %11402 = vmatprep.mubr.msk.bf16.mxu0 %vm305_vm0, %v15186_v10  ;;  %11419 = vmatprep.mubr.msk.bf16.mxu1 %vm305_vm0, %v15186_v10  ;;  %v13070_v10 = vld [vmem:[#allocation6 + $0x3c8] ss:$48 sps:$4 sm:$0xff]  }
  0xec   :  { %1557 = vmatprep.subr.bf16.mxu0 %v13057_v1  ;;  %1598 = vmatprep.subr.bf16.mxu1 %v13060_v3 }
  0xf1   :  { %646 = vmatmul.mubr.bf16.vlgmr.msra.gmra.mrb[24].mxu0 %v15209_v26  ;;  %784 = vmatmul.mubr.bf16.vlgmr.msra.gmra.mrb[24].mxu1 %v15209_v26  ;;  %v13091_v26 = vld [vmem:[#allocation6 + $0x540] ss:$48 sps:$4 sm:$0xff]  }
  0xf2   :  { %11403 = vmatprep.mubr.msk.bf16.mxu0 %vm305_vm0, %v15216_v30  ;;  %11420 = vmatprep.mubr.msk.bf16.mxu1 %vm305_vm0, %v15216_v30  ;;  %v13097_v30 = vld [vmem:[#allocation6 + $0x5a0] ss:$48 sps:$4 sm:$0xff]  }
  0xf3   :  { %1558 = vmatpush1.bf16.msra.mxu0 %v13055_v63  ;;  %1599 = vmatpush1.bf16.msra.mxu1 %v13058_v2 }
  0xf4   :  { %1559 = vmatprep.subr.bf16.mxu0 %v13063_v5  ;;  %1600 = vmatprep.subr.bf16.mxu1 %v13066_v7 }
  0xf7   :  { %1560 = vmatpush1.bf16.msra.mxu0 %v13061_v4  ;;  %1601 = vmatpush1.bf16.msra.mxu1 %v13064_v6 }
  0xf8   :  { %1561 = vmatprep.subr.bf16.mxu0 %v13069_v9  ;;  %1602 = vmatprep.subr.bf16.mxu1 %v13072_v11 }
  0xf9   :  { %654 = vmatmul.mubr.bf16.gmra.mrb[28].mxu0 %v15226_v33  ;;  %792 = vmatmul.mubr.bf16.gmra.mrb[28].mxu1 %v15226_v33  ;;  %v13108_v33 = vld [vmem:[#allocation6 + $0x31c] ss:$48 sps:$4 sm:$0xff]  }
  0xfa   :  { %11404 = vmatprep.mubr.msk.bf16.mxu0 %vm305_vm0, %v15236_v36  ;;  %11421 = vmatprep.mubr.msk.bf16.mxu1 %vm305_vm0, %v15236_v36 }
  0xfb   :  { %1562 = vmatpush1.bf16.msra.mxu0 %v13067_v8  ;;  %1603 = vmatpush1.bf16.msra.mxu1 %v13070_v10 }
  0xfc   :  { %1563 = vmatprep.subr.bf16.mxu0 %v13075_v13  ;;  %1604 = vmatprep.subr.bf16.mxu1 %v13078_v15 }
  0xff   :  { %1564 = vmatpush1.bf16.msra.mxu0 %v13073_v12  ;;  %1605 = vmatpush1.bf16.msra.mxu1 %v13076_v14 }
 0x100   :  { %1565 = vmatprep.subr.bf16.mxu0 %v13081_v17  ;;  %1606 = vmatprep.subr.bf16.mxu1 %v13084_v19 }
 0x101   :  { %662 = vmatmul.mubr.bf16.gmra.mrb[32].mxu0 %v15246_v39  ;;  %800 = vmatmul.mubr.bf16.gmra.mrb[32].mxu1 %v15246_v39 }
 0x102   :  { %11405 = vmatprep.mubr.msk.bf16.mxu0 %vm305_vm0, %v15256_v42  ;;  %11422 = vmatprep.mubr.msk.bf16.mxu1 %vm305_vm0, %v15256_v42 }
 0x103   :  { %1566 = vmatpush1.bf16.msra.mxu0 %v13079_v16  ;;  %1607 = vmatpush1.bf16.msra.mxu1 %v13082_v18 }
 0x104   :  { %1567 = vmatprep.subr.bf16.mxu0 %v13087_v21  ;;  %1608 = vmatprep.subr.bf16.mxu1 %v13090_v23 }
 0x107   :  { %1568 = vmatpush1.bf16.msra.mxu0 %v13085_v20  ;;  %1609 = vmatpush1.bf16.msra.mxu1 %v13088_v22 }
 0x108   :  { %1569 = vmatprep.subr.bf16.mxu0 %v13093_v24  ;;  %1610 = vmatprep.subr.bf16.mxu1 %v13096_v25 }
 0x109   :  { %670 = vmatmul.mubr.bf16.gmra.mrb[36].mxu0 %v15266_v45  ;;  %808 = vmatmul.mubr.bf16.gmra.mrb[36].mxu1 %v15266_v45 }
 0x10a   :  { %11406 = vmatprep.mubr.msk.bf16.mxu0 %vm305_vm0, %v15276_v48  ;;  %11423 = vmatprep.mubr.msk.bf16.mxu1 %vm305_vm0, %v15276_v48 }
 0x10b   :  { %1570 = vmatpush1.bf16.msra.mxu0 %v13091_v26  ;;  %1611 = vmatpush1.bf16.msra.mxu1 %v13094_v27 }
 0x10c   :  { %1571 = vmatprep.subr.bf16.mxu0 %v13099_v28  ;;  %1612 = vmatprep.subr.bf16.mxu1 %v13102_v29 }
 0x10f   :  { %1572 = vmatpush1.bf16.msra.mxu0 %v13097_v30  ;;  %1613 = vmatpush1.bf16.msra.mxu1 %v13100_v31 }
 0x110   :  { %1639 = vmatprep.subr.bf16.mxu0 %v13105_v32  ;;  %1680 = vmatprep.subr.bf16.mxu1 %v13108_v33 }
 0x111   :  { %678 = vmatmul.mubr.bf16.gmra.mrb[40].mxu0 %v13040_v51  ;;  %816 = vmatmul.mubr.bf16.gmra.mrb[40].mxu1 %v13040_v51 }
 0x112   :  { %11407 = vmatprep.mubr.msk.bf16.mxu0 %vm305_vm0, %v13047_v54  ;;  %11424 = vmatprep.mubr.msk.bf16.mxu1 %vm305_vm0, %v13047_v54 }
 0x119   :  { %686 = vmatmul.mubr.bf16.gmra.mrb[44].mxu0 %v13049_v58  ;;  %824 = vmatmul.mubr.bf16.gmra.mrb[44].mxu1 %v13049_v58 }
 0x11a   :  { %1589 = vmatprep.mubr.bf16.mxu0 %v15019_v0  ;;  %1630 = vmatprep.mubr.bf16.mxu1 %v15019_v0 }
 0x194   :  { %v362_v34 = vpop.f32.mrb[0].mxu0  ;;  %v488_v35 = vpop.f32.mrb[0].mxu1 }
 0x195   :  { %v364_v36 = vpop.f32.mrb[1].mxu0  ;;  %v535_v37 = vmax.f32 %v362_v34, %v488_v35  ;;  %v490_v38 = vpop.f32.mrb[1].mxu1  ;;  %v15405_v34 = vld [vmem:[#allocation4] ss:$0 sm:$0xff] }
 0x196   :  { %v15339_v39 = vpop.f32.mrb[2].mxu0  ;;  %v15341_v40 = vpop.f32.mrb[2].mxu1 }
 0x197   :  { %v367_v41 = vpop.f32.mrb[3].mxu0  ;;  %v536_v42 = vmax.f32 %v15339_v39, %v15341_v40  ;;  %v493_v43 = vpop.f32.mrb[3].mxu1 }
 0x19c   :  { %v15345_v44 = vpop.f32.mrb[4].mxu0  ;;  %v15347_v45 = vpop.f32.mrb[4].mxu1 }
 0x19d   :  { %v372_v46 = vpop.f32.mrb[5].mxu0  ;;  %v537_v47 = vmax.f32 %v15345_v44, %v15347_v45  ;;  %v498_v48 = vpop.f32.mrb[5].mxu1 }
 0x19e   :  { %v15351_v49 = vpop.f32.mrb[6].mxu0  ;;  %v15353_v50 = vpop.f32.mrb[6].mxu1 }
 0x19f   :  { %v375_v51 = vpop.f32.mrb[7].mxu0  ;;  %v538_v52 = vmax.f32 %v15351_v49, %v15353_v50  ;;  %v501_v53 = vpop.f32.mrb[7].mxu1  ;;  %v13117_v50 = vld [vmem:[#allocation6 + $0x3d4] ss:$48 sps:$4 sm:$0xff]  }
 0x1a4   :  { %v15357_v54 = vpop.f32.mrb[8].mxu0  ;;  %v15359_v55 = vpop.f32.mrb[8].mxu1 }
 0x1a5   :  { %v380_v56 = vpop.f32.mrb[9].mxu0  ;;  %v539_v57 = vmax.f32 %v15357_v54, %v15359_v55  ;;  %v506_v58 = vpop.f32.mrb[9].mxu1  ;;  %v13115_v55 = vld [vmem:[#allocation6 + $0x3d0] ss:$48 sps:$4 sm:$0xff]  }
 0x1a6   :  { %v15363_v59 = vpop.f32.mrb[10].mxu0  ;;  %v15365_v60 = vpop.f32.mrb[10].mxu1 }
 0x1a7   :  { %v383_v61 = vpop.f32.mrb[11].mxu0  ;;  %v540_v62 = vmax.f32 %v15363_v59, %v15365_v60  ;;  %v509_v63 = vpop.f32.mrb[11].mxu1 }
 0x1ac   :  { %v15369_v1 = vpop.f32.mrb[12].mxu0  ;;  %v15371_v2 = vpop.f32.mrb[12].mxu1 }
 0x1ad   :  { %v388_v3 = vpop.f32.mrb[13].mxu0  ;;  %v541_v4 = vmax.f32 %v15369_v1, %v15371_v2  ;;  %v514_v5 = vpop.f32.mrb[13].mxu1  ;;  %v13130_v1 = vld [vmem:[#allocation6 + $0x498] ss:$48 sps:$4 sm:$0xff]  }
 0x1ae   :  { %v15375_v6 = vpop.f32.mrb[14].mxu0  ;;  %v15377_v7 = vpop.f32.mrb[14].mxu1 }
 0x1af   :  { %v391_v8 = vpop.f32.mrb[15].mxu0  ;;  %v542_v9 = vmax.f32 %v15375_v6, %v15377_v7  ;;  %v517_v10 = vpop.f32.mrb[15].mxu1 }
 0x1b0   :  { %v13106_v10 = vld [vmem:[#allocation6 + $0x318] ss:$48 sps:$4 sm:$0xff]  }
 0x1b4   :  { %v15381_v11 = vpop.f32.mrb[16].mxu0  ;;  %v15383_v12 = vpop.f32.mrb[16].mxu1 }
 0x1b5   :  { %v396_v13 = vpop.f32.mrb[17].mxu0  ;;  %v543_v14 = vmax.f32 %v15381_v11, %v15383_v12  ;;  %v522_v15 = vpop.f32.mrb[17].mxu1  ;;  %v13142_v11 = vld [vmem:[#allocation6 + $0x558] ss:$48 sps:$4 sm:$0xff]  }
 0x1b6   :  { %v15387_v16 = vpop.f32.mrb[18].mxu0  ;;  %v15389_v17 = vpop.f32.mrb[18].mxu1 }
 0x1b7   :  { %v399_v18 = vpop.f32.mrb[19].mxu0  ;;  %v544_v19 = vmax.f32 %v15387_v16, %v15389_v17  ;;  %v525_v20 = vpop.f32.mrb[19].mxu1 }
 0x1bc   :  { %v15393_v21 = vpop.f32.mrb[20].mxu0  ;;  %v15395_v22 = vpop.f32.mrb[20].mxu1 }
 0x1bd   :  { %v404_v23 = vpop.f32.mrb[21].mxu0  ;;  %v545_v24 = vmax.f32 %v15393_v21, %v15395_v22  ;;  %v530_v25 = vpop.f32.mrb[21].mxu1 }
 0x1be   :  { %v15399_v26 = vpop.f32.mrb[22].mxu0  ;;  %v15401_v27 = vpop.f32.mrb[22].mxu1 }
 0x1bf   :  { %v407_v28 = vpop.f32.mrb[23].mxu0  ;;  %v546_v29 = vmax.f32 %v15399_v26, %v15401_v27  ;;  %v533_v30 = vpop.f32.mrb[23].mxu1  ;;  %v13160_v26 = vld [vmem:[#allocation6 + $0x388] ss:$48 sps:$4 sm:$0xff]   ;;  %v13165_v27 = vld [vmem:[#allocation6 + $0x3e4] ss:$48 sps:$4 sm:$0xff]  }
 0x1c0   :  { %v13114_v30 = vld [vmem:[#allocation6 + $0x37c] ss:$48 sps:$4 sm:$0xff]  }
 0x1c4   :  { %v647_v31 = vpop.f32.mrb[24].mxu0  ;;  %v785_v33 = vpop.f32.mrb[24].mxu1 }
 0x1c5   :  { %v694_v32 = vmax.f32 %v535_v37, %v647_v31  ;;  %v649_v35 = vpop.f32.mrb[25].mxu0  ;;  %v787_v36 = vpop.f32.mrb[25].mxu1  ;;  %v13109_v31 = vld [vmem:[#allocation6 + $0x370] ss:$48 sps:$4 sm:$0xff]  }
 0x1c6   :  { %v650_v38 = vpop.f32.mrb[26].mxu0  ;;  %v788_v41 = vpop.f32.mrb[26].mxu1 }
 0x1c7   :  { %v832_v39 = vmax.f32 %v694_v32, %v785_v33  ;;  %v695_v40 = vmax.f32 %v536_v42, %v650_v38  ;;  %v652_v43 = vpop.f32.mrb[27].mxu0  ;;  %v790_v46 = vpop.f32.mrb[27].mxu1  ;;  %v13103_v42 = vld [vmem:[#allocation6 + $0x310] ss:$48 sps:$4 sm:$0xff]   ;;  %v13112_v32 = vld [vmem:[#allocation6 + $0x378] ss:$48 sps:$4 sm:$0xff]  }
 0x1c9   :  { %v851_v48 = vadd.f32 %v15405_v34, %v832_v39  ;;  %v833_v51 = vmax.f32 %v695_v40, %v788_v41 }
 0x1cb   :  { %v852_v53 = vadd.f32 %v15405_v34, %v833_v51  ;;  %v863_v58 = vmax.f32 %v851_v48, 0.0 }
 0x1cc   :  { %v655_v56 = vpop.f32.mrb[28].mxu0  ;;  %v793_v3 = vpop.f32.mrb[28].mxu1 }
 0x1cd   :  { %v864_v61 = vmax.f32 %v852_v53, 0.0  ;;  %v696_v37 = vmax.f32 %v537_v47, %v655_v56  ;;  %v657_v63 = vpop.f32.mrb[29].mxu0  ;;  %v795_v8 = vpop.f32.mrb[29].mxu1  ;;  %v13111_v47 = vld [vmem:[#allocation6 + $0x374] ss:$48 sps:$4 sm:$0xff]  }
 0x1ce   :  { %v658_v5 = vpop.f32.mrb[30].mxu0  ;;  %v796_v20 = vpop.f32.mrb[30].mxu1  ;;  %v13126_v63 = vld [vmem:[#allocation6 + $0x43c] ss:$48 sps:$4 sm:$0xff]  }
 0x1cf   :  { %v15412_v13 = vpack.c.bf16 %v864_v61, %v863_v58  ;;  %v697_v15 = vmax.f32 %v538_v52, %v658_v5  ;;  %v834_v18 = vmax.f32 %v696_v37, %v793_v3  ;;  %v660_v23 = vpop.f32.mrb[31].mxu0  ;;  %v798_v25 = vpop.f32.mrb[31].mxu1  ;;  %v13120_v52 = vld [vmem:[#allocation6 + $0x3dc] ss:$48 sps:$4 sm:$0xff]   ;;  %v13123_v37 = vld [vmem:[#allocation6 + $0x434] ss:$48 sps:$4 sm:$0xff]  }
 0x1d0   :  { %v13121_v3 = vld [vmem:[#allocation6 + $0x430] ss:$48 sps:$4 sm:$0xff]   ;;  %v13124_v5 = vld [vmem:[#allocation6 + $0x438] ss:$48 sps:$4 sm:$0xff]   ;;  %v13132_v8 = vld [vmem:[#allocation6 + $0x49c] ss:$48 sps:$4 sm:$0xff]  }
 0x1d1   :  { %v853_v28 = vadd.f32 %v15405_v34, %v834_v18  ;;  %v835_v44 = vmax.f32 %v697_v15, %v796_v20  ;;  %v15419_v45 = vrot.slane %v15412_v13, 4 }
 0x1d3   :  { %v854_v33 = vadd.f32 %v15405_v34, %v835_v44  ;;  %1590 = vmatmul.mubr.bf16.vlgmr.msra.gmra.mrb[48].mxu0 %v15419_v45  ;;  %1631 = vmatmul.mubr.bf16.vlgmr.msra.gmra.mrb[48].mxu1 %v15419_v45  ;;  %v865_v35 = vmax.f32 %v853_v28, 0.0 }
 0x1d4   :  { %1640 = vmatpush1.bf16.msra.mxu0 %v13103_v42  ;;  %1681 = vmatpush1.bf16.msra.mxu1 %v13106_v10  ;;  %v663_v49 = vpop.f32.mrb[32].mxu0  ;;  %v801_v40 = vpop.f32.mrb[32].mxu1 }
 0x1d5   :  { %v866_v36 = vmax.f32 %v854_v33, 0.0  ;;  %v698_v38 = vmax.f32 %v539_v57, %v663_v49  ;;  %v665_v39 = vpop.f32.mrb[33].mxu0  ;;  %1641 = vmatprep.subr.bf16.mxu0 %v13111_v47  ;;  %1682 = vmatprep.subr.bf16.mxu1 %v13114_v30  ;;  %v803_v43 = vpop.f32.mrb[33].mxu1  ;;  %v13118_v57 = vld [vmem:[#allocation6 + $0x3d8] ss:$48 sps:$4 sm:$0xff]  }
 0x1d6   :  { %v666_v41 = vpop.f32.mrb[34].mxu0  ;;  %1671 = vmatprep.mubr.bf16.mxu0 %v15019_v0  ;;  %1712 = vmatprep.mubr.bf16.mxu1 %v15019_v0  ;;  %v804_v53 = vpop.f32.mrb[34].mxu1  ;;  %v13135_v49 = vld [vmem:[#allocation6 + $0x4f4] ss:$48 sps:$4 sm:$0xff]  }
 0x1d7   :  { %v15429_v46 = vpack.c.bf16 %v866_v36, %v865_v35  ;;  %v699_v48 = vmax.f32 %v540_v62, %v666_v41  ;;  %v836_v51 = vmax.f32 %v698_v38, %v801_v40  ;;  %v668_v54 = vpop.f32.mrb[35].mxu0  ;;  %v806_v56 = vpop.f32.mrb[35].mxu1  ;;  %v13129_v62 = vld [vmem:[#allocation6 + $0x494] ss:$48 sps:$4 sm:$0xff]   ;;  %v13136_v35 = vld [vmem:[#allocation6 + $0x4f8] ss:$48 sps:$4 sm:$0xff]  }
 0x1d8   :  { %1642 = vmatpush1.bf16.msra.mxu0 %v13109_v31  ;;  %1683 = vmatpush1.bf16.msra.mxu1 %v13112_v32  ;;  %v13127_v32 = vld [vmem:[#allocation6 + $0x490] ss:$48 sps:$4 sm:$0xff]   ;;  %v13144_v36 = vld [vmem:[#allocation6 + $0x55c] ss:$48 sps:$4 sm:$0xff]  }
 0x1d9   :  { %v855_v58 = vadd.f32 %v15405_v34, %v836_v51  ;;  %v837_v61 = vmax.f32 %v699_v48, %v804_v53  ;;  %1643 = vmatprep.subr.bf16.mxu0 %v13117_v50  ;;  %1684 = vmatprep.subr.bf16.mxu1 %v13120_v52  ;;  %v13138_v50 = vld [vmem:[#allocation6 + $0x4fc] ss:$48 sps:$4 sm:$0xff]   ;;  %v13133_v52 = vld [vmem:[#allocation6 + $0x4f0] ss:$48 sps:$4 sm:$0xff]  }
 0x1db   :  { %v856_v59 = vadd.f32 %v15405_v34, %v837_v61  ;;  %v867_v42 = vmax.f32 %v855_v58, 0.0  ;;  %v13139_v58 = vld [vmem:[#allocation6 + $0x550] ss:$48 sps:$4 sm:$0xff]  }
 0x1dc   :  { %1644 = vmatpush1.bf16.msra.mxu0 %v13115_v55  ;;  %1685 = vmatpush1.bf16.msra.mxu1 %v13118_v57  ;;  %v671_v60 = vpop.f32.mrb[36].mxu0  ;;  %v809_v20 = vpop.f32.mrb[36].mxu1 }
 0x1dd   :  { %v868_v10 = vmax.f32 %v856_v59, 0.0  ;;  %v700_v15 = vmax.f32 %v541_v4, %v671_v60  ;;  %v673_v18 = vpop.f32.mrb[37].mxu0  ;;  %1645 = vmatprep.subr.bf16.mxu0 %v13123_v37  ;;  %1686 = vmatprep.subr.bf16.mxu1 %v13126_v63  ;;  %v811_v25 = vpop.f32.mrb[37].mxu1  ;;  %v13147_v37 = vld [vmem:[#allocation6 + $0x5b4] ss:$48 sps:$4 sm:$0xff]  }
 0x1de   :  { %v674_v23 = vpop.f32.mrb[38].mxu0  ;;  %v812_v30 = vpop.f32.mrb[38].mxu1  ;;  %v13150_v63 = vld [vmem:[#allocation6 + $0x5bc] ss:$48 sps:$4 sm:$0xff]  }
 0x1df   :  { %v15439_v28 = vpack.c.bf16 %v868_v10, %v867_v42  ;;  %v701_v44 = vmax.f32 %v542_v9, %v674_v23  ;;  %v838_v47 = vmax.f32 %v700_v15, %v809_v20  ;;  %v676_v31 = vpop.f32.mrb[39].mxu0  ;;  %v814_v2 = vpop.f32.mrb[39].mxu1  ;;  %v13141_v9 = vld [vmem:[#allocation6 + $0x554] ss:$48 sps:$4 sm:$0xff]   ;;  %v13156_v59 = vld [vmem:[#allocation6 + $0x32c] ss:$48 sps:$4 sm:$0xff]  }
 0x1e0   :  { %1646 = vmatpush1.bf16.msra.mxu0 %v13121_v3  ;;  %1687 = vmatpush1.bf16.msra.mxu1 %v13124_v5  ;;  %v13145_v3 = vld [vmem:[#allocation6 + $0x5b0] ss:$48 sps:$4 sm:$0xff]   ;;  %v13148_v5 = vld [vmem:[#allocation6 + $0x5b8] ss:$48 sps:$4 sm:$0xff]  }
 0x1e1   :  { %v857_v4 = vadd.f32 %v15405_v34, %v838_v47  ;;  %v839_v33 = vmax.f32 %v701_v44, %v812_v30  ;;  %1647 = vmatprep.subr.bf16.mxu0 %v13129_v62  ;;  %1688 = vmatprep.subr.bf16.mxu1 %v13132_v8  ;;  %v13151_v20 = vld [vmem:[#allocation6 + $0x320] ss:$48 sps:$4 sm:$0xff]   ;;  %v13154_v23 = vld [vmem:[#allocation6 + $0x328] ss:$48 sps:$4 sm:$0xff]  }
 0x1e2   :  { %v13157_v2 = vld [vmem:[#allocation6 + $0x380] ss:$48 sps:$4 sm:$0xff]  }
 0x1e3   :  { %v858_v6 = vadd.f32 %v15405_v34, %v839_v33  ;;  %v869_v38 = vmax.f32 %v857_v4, 0.0 }
 0x1e4   :  { %1648 = vmatpush1.bf16.msra.mxu0 %v13127_v32  ;;  %1689 = vmatpush1.bf16.msra.mxu1 %v13130_v1  ;;  %v679_v7 = vpop.f32.mrb[40].mxu0  ;;  %v817_v43 = vpop.f32.mrb[40].mxu1  ;;  %v13159_v32 = vld [vmem:[#allocation6 + $0x384] ss:$48 sps:$4 sm:$0xff]   ;;  %v13162_v1 = vld [vmem:[#allocation6 + $0x38c] ss:$48 sps:$4 sm:$0xff]  }
 0x1e5   :  { %v870_v39 = vmax.f32 %v858_v6, 0.0  ;;  %v702_v40 = vmax.f32 %v543_v14, %v679_v7  ;;  %v681_v41 = vpop.f32.mrb[41].mxu0  ;;  %1649 = vmatprep.subr.bf16.mxu0 %v13135_v49  ;;  %1690 = vmatprep.subr.bf16.mxu1 %v13138_v50  ;;  %v819_v51 = vpop.f32.mrb[41].mxu1  ;;  %v13168_v49 = vld [vmem:[#allocation6 + $0x3ec] ss:$48 sps:$4 sm:$0xff]  }
 0x1e6   :  { %v682_v48 = vpop.f32.mrb[42].mxu0  ;;  %v820_v57 = vpop.f32.mrb[42].mxu1  ;;  %v13174_v6 = vld [vmem:[#allocation6 + $0x44c] ss:$48 sps:$4 sm:$0xff]   ;;  %v13169_v7 = vld [vmem:[#allocation6 + $0x440] ss:$48 sps:$4 sm:$0xff]  }
 0x1e7   :  { %v15449_v53 = vpack.c.bf16 %v870_v39, %v869_v38  ;;  %v703_v54 = vmax.f32 %v544_v19, %v682_v48  ;;  %v840_v55 = vmax.f32 %v702_v40, %v817_v43  ;;  %v684_v56 = vpop.f32.mrb[43].mxu0  ;;  %v822_v12 = vpop.f32.mrb[43].mxu1  ;;  %v13153_v19 = vld [vmem:[#allocation6 + $0x324] ss:$48 sps:$4 sm:$0xff]   ;;  %v13180_v38 = vld [vmem:[#allocation6 + $0x4ac] ss:$48 sps:$4 sm:$0xff]  }
 0x1e8   :  { %1650 = vmatpush1.bf16.msra.mxu0 %v13133_v52  ;;  %1691 = vmatpush1.bf16.msra.mxu1 %v13136_v35  ;;  %v13166_v52 = vld [vmem:[#allocation6 + $0x3e8] ss:$48 sps:$4 sm:$0xff]   ;;  %v13171_v35 = vld [vmem:[#allocation6 + $0x444] ss:$48 sps:$4 sm:$0xff]   ;;  %v13175_v39 = vld [vmem:[#allocation6 + $0x4a0] ss:$48 sps:$4 sm:$0xff]  }
 0x1e9   :  { %v859_v14 = vadd.f32 %v15405_v34, %v840_v55  ;;  %v841_v61 = vmax.f32 %v703_v54, %v820_v57  ;;  %1651 = vmatprep.subr.bf16.mxu0 %v13141_v9  ;;  %1692 = vmatprep.subr.bf16.mxu1 %v13144_v36  ;;  %v13172_v9 = vld [vmem:[#allocation6 + $0x448] ss:$48 sps:$4 sm:$0xff]   ;;  %v13177_v36 = vld [vmem:[#allocation6 + $0x4a4] ss:$48 sps:$4 sm:$0xff]   ;;  %v13186_v43 = vld [vmem:[#allocation6 + $0x50c] ss:$48 sps:$4 sm:$0xff]  }
 0x1ea   :  { %v13178_v40 = vld [vmem:[#allocation6 + $0x4a8] ss:$48 sps:$4 sm:$0xff]   ;;  %v13183_v41 = vld [vmem:[#allocation6 + $0x504] ss:$48 sps:$4 sm:$0xff]   ;;  %v13181_v48 = vld [vmem:[#allocation6 + $0x500] ss:$48 sps:$4 sm:$0xff]  }
 0x1eb   :  { %v860_v16 = vadd.f32 %v15405_v34, %v841_v61  ;;  %v871_v60 = vmax.f32 %v859_v14, 0.0  ;;  %v13184_v51 = vld [vmem:[#allocation6 + $0x508] ss:$48 sps:$4 sm:$0xff]   ;;  %v13189_v54 = vld [vmem:[#allocation6 + $0x564] ss:$48 sps:$4 sm:$0xff]  }
 0x1ec   :  { %1652 = vmatpush1.bf16.msra.mxu0 %v13139_v58  ;;  %1693 = vmatpush1.bf16.msra.mxu1 %v13142_v11  ;;  %v687_v17 = vpop.f32.mrb[44].mxu0  ;;  %v825_v10 = vpop.f32.mrb[44].mxu1  ;;  %v13192_v55 = vld [vmem:[#allocation6 + $0x56c] ss:$48 sps:$4 sm:$0xff]   ;;  %v13187_v57 = vld [vmem:[#allocation6 + $0x560] ss:$48 sps:$4 sm:$0xff]  }
 0x1ed   :  { %v872_v62 = vmax.f32 %v860_v16, 0.0  ;;  %v704_v8 = vmax.f32 %v545_v24, %v687_v17  ;;  %v689_v42 = vpop.f32.mrb[45].mxu0  ;;  %1653 = vmatprep.subr.bf16.mxu0 %v13147_v37  ;;  %1694 = vmatprep.subr.bf16.mxu1 %v13150_v63  ;;  %v827_v18 = vpop.f32.mrb[45].mxu1  ;;  %v13190_v56 = vld [vmem:[#allocation6 + $0x568] ss:$48 sps:$4 sm:$0xff]  }
 0x1ee   :  { %v690_v15 = vpop.f32.mrb[46].mxu0  ;;  %v828_v30 = vpop.f32.mrb[46].mxu1  ;;  %v13195_v58 = vld [vmem:[#allocation6 + $0x5c4] ss:$48 sps:$4 sm:$0xff]   ;;  %v13198_v11 = vld [vmem:[#allocation6 + $0x5cc] ss:$48 sps:$4 sm:$0xff]  }
 0x1ef   :  { %v15459_v25 = vpack.c.bf16 %v872_v62, %v871_v60  ;;  %v705_v44 = vmax.f32 %v546_v29, %v690_v15  ;;  %v842_v47 = vmax.f32 %v704_v8, %v825_v10  ;;  %v692_v31 = vpop.f32.mrb[47].mxu0  ;;  %v830_v21 = vpop.f32.mrb[47].mxu1  ;;  %v13193_v12 = vld [vmem:[#allocation6 + $0x5c0] ss:$48 sps:$4 sm:$0xff]   ;;  %v13196_v14 = vld [vmem:[#allocation6 + $0x5c8] ss:$48 sps:$4 sm:$0xff]  }
 0x1f0   :  { %1654 = vmatpush1.bf16.msra.mxu0 %v13145_v3  ;;  %1695 = vmatpush1.bf16.msra.mxu1 %v13148_v5  ;;  %v13201_v61 = vld [vmem:[#allocation6 + $0x4] ss:$48 sps:$4 sm:$0xff]   ;;  %v13204_v37 = vld [vmem:[#allocation6 + $0xc] ss:$48 sps:$4 sm:$0xff]   ;;  %v13199_v63 = vld [vmem:[#allocation6] ss:$48 sps:$4 sm:$0xff]  }
 0x1f1   :  { %v861_v22 = vadd.f32 %v15405_v34, %v842_v47  ;;  %v843_v24 = vmax.f32 %v705_v44, %v828_v30  ;;  %1721 = vmatprep.subr.bf16.mxu0 %v13153_v19  ;;  %1762 = vmatprep.subr.bf16.mxu1 %v13156_v59  ;;  %v13202_v3 = vld [vmem:[#allocation6 + $0x8] ss:$48 sps:$4 sm:$0xff]   ;;  %v13207_v5 = vld [vmem:[#allocation6 + $0x64] ss:$48 sps:$4 sm:$0xff]   ;;  %v13210_v16 = vld [vmem:[#allocation6 + $0x6c] ss:$48 sps:$4 sm:$0xff]  }
 0x1f2   :  { %v13205_v17 = vld [vmem:[#allocation6 + $0x60] ss:$48 sps:$4 sm:$0xff]   ;;  %v13208_v19 = vld [vmem:[#allocation6 + $0x68] ss:$48 sps:$4 sm:$0xff]   ;;  %v13213_v59 = vld [vmem:[#allocation6 + $0xc4] ss:$48 sps:$4 sm:$0xff]  }
 0x1f3   :  { %v862_v4 = vadd.f32 %v15405_v34, %v843_v24  ;;  %1672 = vmatmul.mubr.bf16.vlgmr.msra.gmra.mrb[52].mxu0 %v15419_v45  ;;  %1713 = vmatmul.mubr.bf16.vlgmr.msra.gmra.mrb[52].mxu1 %v15419_v45  ;;  %v873_v29 = vmax.f32 %v861_v22, 0.0  ;;  %v13163_v34 = vld [vmem:[#allocation6 + $0x3e0] ss:$48 sps:$4 sm:$0xff]   ;;  %v13216_v60 = vld [vmem:[#allocation6 + $0xcc] ss:$48 sps:$4 sm:$0xff]  }
 0x1f4   :  { %1722 = vmatpush1.bf16.msra.mxu0 %v13151_v20  ;;  %1763 = vmatpush1.bf16.msra.mxu1 %v13154_v23  ;;  %v13211_v62 = vld [vmem:[#allocation6 + $0xc0] ss:$48 sps:$4 sm:$0xff]   ;;  %v13214_v8 = vld [vmem:[#allocation6 + $0xc8] ss:$48 sps:$4 sm:$0xff]   ;;  %v13219_v42 = vld [vmem:[#allocation6 + $0x124] ss:$48 sps:$4 sm:$0xff]  }
 0x1f5   :  { %v874_v33 = vmax.f32 %v862_v4, 0.0  ;;  %1723 = vmatprep.subr.bf16.mxu0 %v13159_v32  ;;  %1764 = vmatprep.subr.bf16.mxu1 %v13162_v1  ;;  %v13217_v10 = vld [vmem:[#allocation6 + $0x120] ss:$48 sps:$4 sm:$0xff]   ;;  %v13220_v15 = vld [vmem:[#allocation6 + $0x128] ss:$48 sps:$4 sm:$0xff]  }
 0x1f6   :  { %1753 = vmatprep.mubr.bf16.mxu0 %v15019_v0  ;;  %1794 = vmatprep.mubr.bf16.mxu1 %v15019_v0  ;;  %v13225_v18 = vld [vmem:[#allocation6 + $0x184] ss:$48 sps:$4 sm:$0xff]   ;;  %v13228_v20 = vld [vmem:[#allocation6 + $0x18c] ss:$48 sps:$4 sm:$0xff]   ;;  %v13223_v23 = vld [vmem:[#allocation6 + $0x180] ss:$48 sps:$4 sm:$0xff]  }
 0x1f7   :  { %v15470_v50 = vpack.c.bf16 %v874_v33, %v873_v29  ;;  %v13226_v44 = vld [vmem:[#allocation6 + $0x188] ss:$48 sps:$4 sm:$0xff]   ;;  %v13231_v47 = vld [vmem:[#allocation6 + $0x1e4] ss:$48 sps:$4 sm:$0xff]   ;;  %v13234_v30 = vld [vmem:[#allocation6 + $0x1ec] ss:$48 sps:$4 sm:$0xff]  }
 0x1f8   :  { %1724 = vmatpush1.bf16.msra.mxu0 %v13157_v2  ;;  %1765 = vmatpush1.bf16.msra.mxu1 %v13160_v26  ;;  %v13229_v31 = vld [vmem:[#allocation6 + $0x1e0] ss:$48 sps:$4 sm:$0xff]   ;;  %v13232_v21 = vld [vmem:[#allocation6 + $0x1e8] ss:$48 sps:$4 sm:$0xff]   ;;  %v13237_v22 = vld [vmem:[#allocation6 + $0x244] ss:$48 sps:$4 sm:$0xff]  }
 0x1f9   :  { %1725 = vmatprep.subr.bf16.mxu0 %v13165_v27  ;;  %1766 = vmatprep.subr.bf16.mxu1 %v13168_v49  ;;  %v13240_v24 = vld [vmem:[#allocation6 + $0x24c] ss:$48 sps:$4 sm:$0xff]   ;;  %v13235_v32 = vld [vmem:[#allocation6 + $0x240] ss:$48 sps:$4 sm:$0xff]   ;;  %v13238_v1 = vld [vmem:[#allocation6 + $0x248] ss:$48 sps:$4 sm:$0xff]  }
 0x1fa   :  { %v13243_v2 = vld [vmem:[#allocation6 + $0x2a4] ss:$48 sps:$4 sm:$0xff]   ;;  %v13246_v4 = vld [vmem:[#allocation6 + $0x2ac] ss:$48 sps:$4 sm:$0xff]   ;;  %v13241_v26 = vld [vmem:[#allocation6 + $0x2a0] ss:$48 sps:$4 sm:$0xff]  }
 0x1fb   :  { %v13244_v27 = vld [vmem:[#allocation6 + $0x2a8] ss:$48 sps:$4 sm:$0xff]   ;;  %v13249_v29 = vld [vmem:[#allocation6 + $0x14] ss:$48 sps:$4 sm:$0xff]   ;;  %v13252_v33 = vld [vmem:[#allocation6 + $0x1c] ss:$48 sps:$4 sm:$0xff]  }
 0x1fc   :  { %1726 = vmatpush1.bf16.msra.mxu0 %v13163_v34  ;;  %1767 = vmatpush1.bf16.msra.mxu1 %v13166_v52  ;;  %v13247_v49 = vld [vmem:[#allocation6 + $0x10] ss:$48 sps:$4 sm:$0xff]   ;;  %v13250_v34 = vld [vmem:[#allocation6 + $0x18] ss:$48 sps:$4 sm:$0xff]   ;;  %v13255_v52 = vld [vmem:[#allocation6 + $0x74] ss:$48 sps:$4 sm:$0xff]  }
 0x1fd   :  { %1727 = vmatprep.subr.bf16.mxu0 %v13171_v35  ;;  %1768 = vmatprep.subr.bf16.mxu1 %v13174_v6  ;;  %v13258_v35 = vld [vmem:[#allocation6 + $0x7c] ss:$48 sps:$4 sm:$0xff]   ;;  %v13253_v6 = vld [vmem:[#allocation6 + $0x70] ss:$48 sps:$4 sm:$0xff]  }
 0x200   :  { %1728 = vmatpush1.bf16.msra.mxu0 %v13169_v7  ;;  %1769 = vmatpush1.bf16.msra.mxu1 %v13172_v9  ;;  %v13256_v7 = vld [vmem:[#allocation6 + $0x78] ss:$48 sps:$4 sm:$0xff]   ;;  %v13261_v9 = vld [vmem:[#allocation6 + $0xd4] ss:$48 sps:$4 sm:$0xff]  }
 0x201   :  { %1729 = vmatprep.subr.bf16.mxu0 %v13177_v36  ;;  %1770 = vmatprep.subr.bf16.mxu1 %v13180_v38  ;;  %v13264_v36 = vld [vmem:[#allocation6 + $0xdc] ss:$48 sps:$4 sm:$0xff]   ;;  %v13259_v38 = vld [vmem:[#allocation6 + $0xd0] ss:$48 sps:$4 sm:$0xff]  }
 0x204   :  { %1730 = vmatpush1.bf16.msra.mxu0 %v13175_v39  ;;  %1771 = vmatpush1.bf16.msra.mxu1 %v13178_v40  ;;  %v13262_v39 = vld [vmem:[#allocation6 + $0xd8] ss:$48 sps:$4 sm:$0xff]   ;;  %v13267_v40 = vld [vmem:[#allocation6 + $0x134] ss:$48 sps:$4 sm:$0xff]  }
 0x205   :  { %1731 = vmatprep.subr.bf16.mxu0 %v13183_v41  ;;  %1772 = vmatprep.subr.bf16.mxu1 %v13186_v43  ;;  %v13270_v41 = vld [vmem:[#allocation6 + $0x13c] ss:$48 sps:$4 sm:$0xff]   ;;  %v13265_v43 = vld [vmem:[#allocation6 + $0x130] ss:$48 sps:$4 sm:$0xff]  }
 0x208   :  { %1732 = vmatpush1.bf16.msra.mxu0 %v13181_v48  ;;  %1773 = vmatpush1.bf16.msra.mxu1 %v13184_v51  ;;  %v13268_v48 = vld [vmem:[#allocation6 + $0x138] ss:$48 sps:$4 sm:$0xff]   ;;  %v13273_v51 = vld [vmem:[#allocation6 + $0x194] ss:$48 sps:$4 sm:$0xff]  }
 0x209   :  { %1733 = vmatprep.subr.bf16.mxu0 %v13189_v54  ;;  %1774 = vmatprep.subr.bf16.mxu1 %v13192_v55  ;;  %v13276_v54 = vld [vmem:[#allocation6 + $0x19c] ss:$48 sps:$4 sm:$0xff]   ;;  %v13271_v55 = vld [vmem:[#allocation6 + $0x190] ss:$48 sps:$4 sm:$0xff]  }
 0x20c   :  { %1734 = vmatpush1.bf16.msra.mxu0 %v13187_v57  ;;  %1775 = vmatpush1.bf16.msra.mxu1 %v13190_v56  ;;  %v13274_v57 = vld [vmem:[#allocation6 + $0x198] ss:$48 sps:$4 sm:$0xff]   ;;  %v13279_v56 = vld [vmem:[#allocation6 + $0x1f4] ss:$48 sps:$4 sm:$0xff]  }
 0x20d   :  { %1735 = vmatprep.subr.bf16.mxu0 %v13195_v58  ;;  %1776 = vmatprep.subr.bf16.mxu1 %v13198_v11  ;;  %v13282_v58 = vld [vmem:[#allocation6 + $0x1fc] ss:$48 sps:$4 sm:$0xff]   ;;  %v13277_v11 = vld [vmem:[#allocation6 + $0x1f0] ss:$48 sps:$4 sm:$0xff]  }
 0x210   :  { %1736 = vmatpush1.bf16.msra.mxu0 %v13193_v12  ;;  %1777 = vmatpush1.bf16.msra.mxu1 %v13196_v14  ;;  %v13280_v12 = vld [vmem:[#allocation6 + $0x1f8] ss:$48 sps:$4 sm:$0xff]   ;;  %v13285_v14 = vld [vmem:[#allocation6 + $0x254] ss:$48 sps:$4 sm:$0xff]  }
 0x211   :  { %2283 = vmatprep.subr.bf16.mxu0 %v13201_v61  ;;  %2324 = vmatprep.subr.bf16.mxu1 %v13204_v37  ;;  %v13288_v61 = vld [vmem:[#allocation6 + $0x25c] ss:$48 sps:$4 sm:$0xff]   ;;  %v13283_v37 = vld [vmem:[#allocation6 + $0x250] ss:$48 sps:$4 sm:$0xff]  }
 0x213   :  { %1754 = vmatmul.mubr.bf16.vlgmr.msra.gmra.mrb[56].mxu0 %v15419_v45  ;;  %1795 = vmatmul.mubr.bf16.vlgmr.msra.gmra.mrb[56].mxu1 %v15419_v45  ;;  %v13222_v45 = vld [vmem:[#allocation6 + $0x12c] ss:$48 sps:$4 sm:$0xff]  }
 0x214   :  { %2284 = vmatpush1.bf16.msra.mxu0 %v13199_v63  ;;  %2325 = vmatpush1.bf16.msra.mxu1 %v13202_v3  ;;  %v13286_v63 = vld [vmem:[#allocation6 + $0x258] ss:$48 sps:$4 sm:$0xff]   ;;  %v13291_v3 = vld [vmem:[#allocation6 + $0x2b4] ss:$48 sps:$4 sm:$0xff]  }
 0x215   :  { %2285 = vmatprep.subr.bf16.mxu0 %v13207_v5  ;;  %2326 = vmatprep.subr.bf16.mxu1 %v13210_v16  ;;  %v13294_v5 = vld [vmem:[#allocation6 + $0x2bc] ss:$48 sps:$4 sm:$0xff]   ;;  %v13289_v16 = vld [vmem:[#allocation6 + $0x2b0] ss:$48 sps:$4 sm:$0xff]  }
 0x216   :  { %2315 = vmatprep.mubr.bf16.mxu0 %v15019_v0  ;;  %2356 = vmatprep.mubr.bf16.mxu1 %v15019_v0 }
 0x218   :  { %2286 = vmatpush1.bf16.msra.mxu0 %v13205_v17  ;;  %2327 = vmatpush1.bf16.msra.mxu1 %v13208_v19  ;;  %v13292_v17 = vld [vmem:[#allocation6 + $0x2b8] ss:$48 sps:$4 sm:$0xff]   ;;  %v13297_v19 = vld [vmem:[#allocation6 + $0x24] ss:$48 sps:$4 sm:$0xff]  }
 0x219   :  { %2287 = vmatprep.subr.bf16.mxu0 %v13213_v59  ;;  %2328 = vmatprep.subr.bf16.mxu1 %v13216_v60  ;;  %v13300_v59 = vld [vmem:[#allocation6 + $0x2c] ss:$48 sps:$4 sm:$0xff]   ;;  %v13295_v60 = vld [vmem:[#allocation6 + $0x20] ss:$48 sps:$4 sm:$0xff]  }
 0x21c   :  { %2288 = vmatpush1.bf16.msra.mxu0 %v13211_v62  ;;  %2329 = vmatpush1.bf16.msra.mxu1 %v13214_v8  ;;  %v13298_v62 = vld [vmem:[#allocation6 + $0x28] ss:$48 sps:$4 sm:$0xff]   ;;  %v13303_v8 = vld [vmem:[#allocation6 + $0x84] ss:$48 sps:$4 sm:$0xff]  }
 0x21d   :  { %2289 = vmatprep.subr.bf16.mxu0 %v13219_v42  ;;  %2330 = vmatprep.subr.bf16.mxu1 %v13222_v45  ;;  %v13306_v42 = vld [vmem:[#allocation6 + $0x8c] ss:$48 sps:$4 sm:$0xff]   ;;  %v13301_v45 = vld [vmem:[#allocation6 + $0x80] ss:$48 sps:$4 sm:$0xff]  }
 0x220   :  { %2290 = vmatpush1.bf16.msra.mxu0 %v13217_v10  ;;  %2331 = vmatpush1.bf16.msra.mxu1 %v13220_v15  ;;  %v13304_v10 = vld [vmem:[#allocation6 + $0x88] ss:$48 sps:$4 sm:$0xff]   ;;  %v13309_v15 = vld [vmem:[#allocation6 + $0xe4] ss:$48 sps:$4 sm:$0xff]  }
 0x221   :  { %2291 = vmatprep.subr.bf16.mxu0 %v13225_v18  ;;  %2332 = vmatprep.subr.bf16.mxu1 %v13228_v20  ;;  %v13312_v18 = vld [vmem:[#allocation6 + $0xec] ss:$48 sps:$4 sm:$0xff]   ;;  %v13307_v20 = vld [vmem:[#allocation6 + $0xe0] ss:$48 sps:$4 sm:$0xff]  }
 0x224   :  { %2292 = vmatpush1.bf16.msra.mxu0 %v13223_v23  ;;  %2333 = vmatpush1.bf16.msra.mxu1 %v13226_v44  ;;  %v13310_v23 = vld [vmem:[#allocation6 + $0xe8] ss:$48 sps:$4 sm:$0xff]   ;;  %v13315_v44 = vld [vmem:[#allocation6 + $0x144] ss:$48 sps:$4 sm:$0xff]  }
 0x225   :  { %2293 = vmatprep.subr.bf16.mxu0 %v13231_v47  ;;  %2334 = vmatprep.subr.bf16.mxu1 %v13234_v30  ;;  %v13318_v47 = vld [vmem:[#allocation6 + $0x14c] ss:$48 sps:$4 sm:$0xff]   ;;  %v13313_v30 = vld [vmem:[#allocation6 + $0x140] ss:$48 sps:$4 sm:$0xff]  }
 0x228   :  { %2294 = vmatpush1.bf16.msra.mxu0 %v13229_v31  ;;  %2335 = vmatpush1.bf16.msra.mxu1 %v13232_v21  ;;  %v13316_v31 = vld [vmem:[#allocation6 + $0x148] ss:$48 sps:$4 sm:$0xff]   ;;  %v13321_v21 = vld [vmem:[#allocation6 + $0x1a4] ss:$48 sps:$4 sm:$0xff]  }
 0x229   :  { %2295 = vmatprep.subr.bf16.mxu0 %v13237_v22  ;;  %2336 = vmatprep.subr.bf16.mxu1 %v13240_v24  ;;  %v13324_v22 = vld [vmem:[#allocation6 + $0x1ac] ss:$48 sps:$4 sm:$0xff]   ;;  %v13319_v24 = vld [vmem:[#allocation6 + $0x1a0] ss:$48 sps:$4 sm:$0xff]  }
 0x22c   :  { %2296 = vmatpush1.bf16.msra.mxu0 %v13235_v32  ;;  %2337 = vmatpush1.bf16.msra.mxu1 %v13238_v1  ;;  %v13322_v32 = vld [vmem:[#allocation6 + $0x1a8] ss:$48 sps:$4 sm:$0xff]   ;;  %v13327_v1 = vld [vmem:[#allocation6 + $0x204] ss:$48 sps:$4 sm:$0xff]  }
 0x22d   :  { %2297 = vmatprep.subr.bf16.mxu0 %v13243_v2  ;;  %2338 = vmatprep.subr.bf16.mxu1 %v13246_v4  ;;  %v13330_v2 = vld [vmem:[#allocation6 + $0x20c] ss:$48 sps:$4 sm:$0xff]   ;;  %v13325_v4 = vld [vmem:[#allocation6 + $0x200] ss:$48 sps:$4 sm:$0xff]  }
 0x230   :  { %2298 = vmatpush1.bf16.msra.mxu0 %v13241_v26  ;;  %2339 = vmatpush1.bf16.msra.mxu1 %v13244_v27  ;;  %v13328_v26 = vld [vmem:[#allocation6 + $0x208] ss:$48 sps:$4 sm:$0xff]   ;;  %v13333_v27 = vld [vmem:[#allocation6 + $0x264] ss:$48 sps:$4 sm:$0xff]  }
 0x231   :  { %2365 = vmatprep.subr.bf16.mxu0 %v13249_v29  ;;  %2406 = vmatprep.subr.bf16.mxu1 %v13252_v33  ;;  %v13336_v29 = vld [vmem:[#allocation6 + $0x26c] ss:$48 sps:$4 sm:$0xff]   ;;  %v13331_v33 = vld [vmem:[#allocation6 + $0x260] ss:$48 sps:$4 sm:$0xff]  }
 0x233   :  { %2316 = vmatmul.mubr.bf16.vlgmr.msra.gmra.mrb[48].mxu0 %v15412_v13  ;;  %2357 = vmatmul.mubr.bf16.vlgmr.msra.gmra.mrb[48].mxu1 %v15412_v13 }
 0x234   :  { %2366 = vmatpush1.bf16.msra.mxu0 %v13247_v49  ;;  %2407 = vmatpush1.bf16.msra.mxu1 %v13250_v34  ;;  %v13334_v49 = vld [vmem:[#allocation6 + $0x268] ss:$48 sps:$4 sm:$0xff]   ;;  %v13339_v34 = vld [vmem:[#allocation6 + $0x2c4] ss:$48 sps:$4 sm:$0xff]  }
 0x235   :  { %2367 = vmatprep.subr.bf16.mxu0 %v13255_v52  ;;  %2408 = vmatprep.subr.bf16.mxu1 %v13258_v35  ;;  %v13342_v52 = vld [vmem:[#allocation6 + $0x2cc] ss:$48 sps:$4 sm:$0xff]   ;;  %v13337_v35 = vld [vmem:[#allocation6 + $0x2c0] ss:$48 sps:$4 sm:$0xff]  }
 0x236   :  { %2397 = vmatprep.mubr.bf16.mxu0 %v15019_v0  ;;  %2438 = vmatprep.mubr.bf16.mxu1 %v15019_v0 }
 0x238   :  { %2368 = vmatpush1.bf16.msra.mxu0 %v13253_v6  ;;  %2409 = vmatpush1.bf16.msra.mxu1 %v13256_v7  ;;  %v13340_v6 = vld [vmem:[#allocation6 + $0x2c8] ss:$48 sps:$4 sm:$0xff]   ;;  %v13345_v7 = vld [vmem:[#allocation6 + $0x604] ss:$48 sps:$4 sm:$0xff]  }
 0x239   :  { %2369 = vmatprep.subr.bf16.mxu0 %v13261_v9  ;;  %2410 = vmatprep.subr.bf16.mxu1 %v13264_v36  ;;  %v13348_v9 = vld [vmem:[#allocation6 + $0x60c] ss:$48 sps:$4 sm:$0xff]   ;;  %v13343_v36 = vld [vmem:[#allocation6 + $0x600] ss:$48 sps:$4 sm:$0xff]  }
 0x23c   :  { %2370 = vmatpush1.bf16.msra.mxu0 %v13259_v38  ;;  %2411 = vmatpush1.bf16.msra.mxu1 %v13262_v39  ;;  %v13346_v38 = vld [vmem:[#allocation6 + $0x608] ss:$48 sps:$4 sm:$0xff]   ;;  %v13351_v39 = vld [vmem:[#allocation6 + $0x664] ss:$48 sps:$4 sm:$0xff]  }
 0x23d   :  { %2371 = vmatprep.subr.bf16.mxu0 %v13267_v40  ;;  %2412 = vmatprep.subr.bf16.mxu1 %v13270_v41  ;;  %v13354_v40 = vld [vmem:[#allocation6 + $0x66c] ss:$48 sps:$4 sm:$0xff]   ;;  %v13349_v41 = vld [vmem:[#allocation6 + $0x660] ss:$48 sps:$4 sm:$0xff]  }
 0x240   :  { %2372 = vmatpush1.bf16.msra.mxu0 %v13265_v43  ;;  %2413 = vmatpush1.bf16.msra.mxu1 %v13268_v48  ;;  %v13352_v43 = vld [vmem:[#allocation6 + $0x668] ss:$48 sps:$4 sm:$0xff]   ;;  %v13357_v48 = vld [vmem:[#allocation6 + $0x6c4] ss:$48 sps:$4 sm:$0xff]  }
 0x241   :  { %2373 = vmatprep.subr.bf16.mxu0 %v13273_v51  ;;  %2414 = vmatprep.subr.bf16.mxu1 %v13276_v54  ;;  %v13360_v51 = vld [vmem:[#allocation6 + $0x6cc] ss:$48 sps:$4 sm:$0xff]   ;;  %v13355_v54 = vld [vmem:[#allocation6 + $0x6c0] ss:$48 sps:$4 sm:$0xff]  }
 0x244   :  { %2374 = vmatpush1.bf16.msra.mxu0 %v13271_v55  ;;  %2415 = vmatpush1.bf16.msra.mxu1 %v13274_v57  ;;  %v13358_v55 = vld [vmem:[#allocation6 + $0x6c8] ss:$48 sps:$4 sm:$0xff]   ;;  %v13363_v57 = vld [vmem:[#allocation6 + $0x724] ss:$48 sps:$4 sm:$0xff]  }
 0x245   :  { %2375 = vmatprep.subr.bf16.mxu0 %v13279_v56  ;;  %2416 = vmatprep.subr.bf16.mxu1 %v13282_v58  ;;  %v13361_v56 = vld [vmem:[#allocation6 + $0x720] ss:$48 sps:$4 sm:$0xff]   ;;  %v13364_v58 = vld [vmem:[#allocation6 + $0x728] ss:$48 sps:$4 sm:$0xff]  }
 0x248   :  { %2376 = vmatpush1.bf16.msra.mxu0 %v13277_v11  ;;  %2417 = vmatpush1.bf16.msra.mxu1 %v13280_v12  ;;  %v13369_v11 = vld [vmem:[#allocation6 + $0x784] ss:$48 sps:$4 sm:$0xff]   ;;  %v13372_v12 = vld [vmem:[#allocation6 + $0x78c] ss:$48 sps:$4 sm:$0xff]  }
 0x249   :  { %2377 = vmatprep.subr.bf16.mxu0 %v13285_v14  ;;  %2418 = vmatprep.subr.bf16.mxu1 %v13288_v61  ;;  %v13367_v14 = vld [vmem:[#allocation6 + $0x780] ss:$48 sps:$4 sm:$0xff]   ;;  %v13370_v61 = vld [vmem:[#allocation6 + $0x788] ss:$48 sps:$4 sm:$0xff]  }
 0x24c   :  { %2378 = vmatpush1.bf16.msra.mxu0 %v13283_v37  ;;  %2419 = vmatpush1.bf16.msra.mxu1 %v13286_v63  ;;  %v13375_v37 = vld [vmem:[#allocation6 + $0x7e4] ss:$48 sps:$4 sm:$0xff]   ;;  %v13378_v63 = vld [vmem:[#allocation6 + $0x7ec] ss:$48 sps:$4 sm:$0xff]  }
 0x24d   :  { %2379 = vmatprep.subr.bf16.mxu0 %v13291_v3  ;;  %2420 = vmatprep.subr.bf16.mxu1 %v13294_v5  ;;  %v13373_v3 = vld [vmem:[#allocation6 + $0x7e0] ss:$48 sps:$4 sm:$0xff]   ;;  %v13376_v5 = vld [vmem:[#allocation6 + $0x7e8] ss:$48 sps:$4 sm:$0xff]  }
 0x250   :  { %2380 = vmatpush1.bf16.msra.mxu0 %v13289_v16  ;;  %2421 = vmatpush1.bf16.msra.mxu1 %v13292_v17  ;;  %v13381_v16 = vld [vmem:[#allocation6 + $0x844] ss:$48 sps:$4 sm:$0xff]   ;;  %v13384_v17 = vld [vmem:[#allocation6 + $0x84c] ss:$48 sps:$4 sm:$0xff]  }
 0x251   :  { %2447 = vmatprep.subr.bf16.mxu0 %v13297_v19  ;;  %2488 = vmatprep.subr.bf16.mxu1 %v13300_v59  ;;  %v13379_v19 = vld [vmem:[#allocation6 + $0x840] ss:$48 sps:$4 sm:$0xff]   ;;  %v13382_v59 = vld [vmem:[#allocation6 + $0x848] ss:$48 sps:$4 sm:$0xff]  }
 0x253   :  { %2398 = vmatmul.mubr.bf16.vlgmr.msra.gmra.mrb[52].mxu0 %v15412_v13  ;;  %2439 = vmatmul.mubr.bf16.vlgmr.msra.gmra.mrb[52].mxu1 %v15412_v13 }
 0x254   :  { %2448 = vmatpush1.bf16.msra.mxu0 %v13295_v60  ;;  %2489 = vmatpush1.bf16.msra.mxu1 %v13298_v62  ;;  %v13387_v60 = vld [vmem:[#allocation6 + $0x8a4] ss:$48 sps:$4 sm:$0xff]   ;;  %v13390_v62 = vld [vmem:[#allocation6 + $0x8ac] ss:$48 sps:$4 sm:$0xff]  }
 0x255   :  { %2449 = vmatprep.subr.bf16.mxu0 %v13303_v8  ;;  %2490 = vmatprep.subr.bf16.mxu1 %v13306_v42  ;;  %v13385_v8 = vld [vmem:[#allocation6 + $0x8a0] ss:$48 sps:$4 sm:$0xff]   ;;  %v13388_v42 = vld [vmem:[#allocation6 + $0x8a8] ss:$48 sps:$4 sm:$0xff]  }
 0x256   :  { %2479 = vmatprep.mubr.bf16.mxu0 %v15019_v0  ;;  %2520 = vmatprep.mubr.bf16.mxu1 %v15019_v0 }
 0x258   :  { %2450 = vmatpush1.bf16.msra.mxu0 %v13301_v45  ;;  %2491 = vmatpush1.bf16.msra.mxu1 %v13304_v10  ;;  %v13393_v45 = vld [vmem:[#allocation6 + $0x614] ss:$48 sps:$4 sm:$0xff]   ;;  %v13396_v10 = vld [vmem:[#allocation6 + $0x61c] ss:$48 sps:$4 sm:$0xff]  }
 0x259   :  { %2451 = vmatprep.subr.bf16.mxu0 %v13309_v15  ;;  %2492 = vmatprep.subr.bf16.mxu1 %v13312_v18  ;;  %v13391_v15 = vld [vmem:[#allocation6 + $0x610] ss:$48 sps:$4 sm:$0xff]   ;;  %v13394_v18 = vld [vmem:[#allocation6 + $0x618] ss:$48 sps:$4 sm:$0xff]  }
 0x25c   :  { %2452 = vmatpush1.bf16.msra.mxu0 %v13307_v20  ;;  %2493 = vmatpush1.bf16.msra.mxu1 %v13310_v23  ;;  %v13399_v20 = vld [vmem:[#allocation6 + $0x674] ss:$48 sps:$4 sm:$0xff]   ;;  %v13402_v23 = vld [vmem:[#allocation6 + $0x67c] ss:$48 sps:$4 sm:$0xff]  }
 0x25d   :  { %2453 = vmatprep.subr.bf16.mxu0 %v13315_v44  ;;  %2494 = vmatprep.subr.bf16.mxu1 %v13318_v47  ;;  %v13397_v44 = vld [vmem:[#allocation6 + $0x670] ss:$48 sps:$4 sm:$0xff]   ;;  %v13400_v47 = vld [vmem:[#allocation6 + $0x678] ss:$48 sps:$4 sm:$0xff]  }
 0x260   :  { %2454 = vmatpush1.bf16.msra.mxu0 %v13313_v30  ;;  %2495 = vmatpush1.bf16.msra.mxu1 %v13316_v31  ;;  %v13405_v30 = vld [vmem:[#allocation6 + $0x6d4] ss:$48 sps:$4 sm:$0xff]   ;;  %v13408_v31 = vld [vmem:[#allocation6 + $0x6dc] ss:$48 sps:$4 sm:$0xff]  }
 0x261   :  { %2455 = vmatprep.subr.bf16.mxu0 %v13321_v21  ;;  %2496 = vmatprep.subr.bf16.mxu1 %v13324_v22  ;;  %v13403_v21 = vld [vmem:[#allocation6 + $0x6d0] ss:$48 sps:$4 sm:$0xff]   ;;  %v13406_v22 = vld [vmem:[#allocation6 + $0x6d8] ss:$48 sps:$4 sm:$0xff]  }
 0x264   :  { %2456 = vmatpush1.bf16.msra.mxu0 %v13319_v24  ;;  %2497 = vmatpush1.bf16.msra.mxu1 %v13322_v32  ;;  %v13411_v24 = vld [vmem:[#allocation6 + $0x734] ss:$48 sps:$4 sm:$0xff]   ;;  %v13414_v32 = vld [vmem:[#allocation6 + $0x73c] ss:$48 sps:$4 sm:$0xff]  }
 0x265   :  { %2457 = vmatprep.subr.bf16.mxu0 %v13327_v1  ;;  %2498 = vmatprep.subr.bf16.mxu1 %v13330_v2  ;;  %v13409_v1 = vld [vmem:[#allocation6 + $0x730] ss:$48 sps:$4 sm:$0xff]   ;;  %v13412_v2 = vld [vmem:[#allocation6 + $0x738] ss:$48 sps:$4 sm:$0xff]  }
 0x268   :  { %2458 = vmatpush1.bf16.msra.mxu0 %v13325_v4  ;;  %2499 = vmatpush1.bf16.msra.mxu1 %v13328_v26  ;;  %v13417_v4 = vld [vmem:[#allocation6 + $0x794] ss:$48 sps:$4 sm:$0xff]   ;;  %v13420_v26 = vld [vmem:[#allocation6 + $0x79c] ss:$48 sps:$4 sm:$0xff]  }
 0x269   :  { %2459 = vmatprep.subr.bf16.mxu0 %v13333_v27  ;;  %2500 = vmatprep.subr.bf16.mxu1 %v13336_v29  ;;  %v13415_v27 = vld [vmem:[#allocation6 + $0x790] ss:$48 sps:$4 sm:$0xff]   ;;  %v13418_v29 = vld [vmem:[#allocation6 + $0x798] ss:$48 sps:$4 sm:$0xff]  }
 0x26c   :  { %2460 = vmatpush1.bf16.msra.mxu0 %v13331_v33  ;;  %2501 = vmatpush1.bf16.msra.mxu1 %v13334_v49  ;;  %v13423_v33 = vld [vmem:[#allocation6 + $0x7f4] ss:$48 sps:$4 sm:$0xff]   ;;  %v13426_v49 = vld [vmem:[#allocation6 + $0x7fc] ss:$48 sps:$4 sm:$0xff]  }
 0x26d   :  { %2461 = vmatprep.subr.bf16.mxu0 %v13339_v34  ;;  %2502 = vmatprep.subr.bf16.mxu1 %v13342_v52  ;;  %v13421_v34 = vld [vmem:[#allocation6 + $0x7f0] ss:$48 sps:$4 sm:$0xff]   ;;  %v13424_v52 = vld [vmem:[#allocation6 + $0x7f8] ss:$48 sps:$4 sm:$0xff]  }
 0x270   :  { %2462 = vmatpush1.bf16.msra.mxu0 %v13337_v35  ;;  %2503 = vmatpush1.bf16.msra.mxu1 %v13340_v6  ;;  %v13429_v35 = vld [vmem:[#allocation6 + $0x854] ss:$48 sps:$4 sm:$0xff]   ;;  %v13432_v6 = vld [vmem:[#allocation6 + $0x85c] ss:$48 sps:$4 sm:$0xff]  }
 0x271   :  { %3106 = vmatprep.subr.bf16.mxu0 %v13345_v7  ;;  %3147 = vmatprep.subr.bf16.mxu1 %v13348_v9  ;;  %v13427_v7 = vld [vmem:[#allocation6 + $0x850] ss:$48 sps:$4 sm:$0xff]   ;;  %v13430_v9 = vld [vmem:[#allocation6 + $0x858] ss:$48 sps:$4 sm:$0xff]  }
 0x273   :  { %2480 = vmatmul.mubr.bf16.vlgmr.msra.gmra.mrb[56].mxu0 %v15412_v13  ;;  %2521 = vmatmul.mubr.bf16.vlgmr.msra.gmra.mrb[56].mxu1 %v15412_v13  ;;  %v13366_v13 = vld [vmem:[#allocation6 + $0x72c] ss:$48 sps:$4 sm:$0xff]  }
 0x274   :  { %3107 = vmatpush1.bf16.msra.mxu0 %v13343_v36  ;;  %3148 = vmatpush1.bf16.msra.mxu1 %v13346_v38  ;;  %v13435_v36 = vld [vmem:[#allocation6 + $0x8b4] ss:$48 sps:$4 sm:$0xff]   ;;  %v13438_v38 = vld [vmem:[#allocation6 + $0x8bc] ss:$48 sps:$4 sm:$0xff]  }
 0x275   :  { %3108 = vmatprep.subr.bf16.mxu0 %v13351_v39  ;;  %3149 = vmatprep.subr.bf16.mxu1 %v13354_v40  ;;  %v13433_v39 = vld [vmem:[#allocation6 + $0x8b0] ss:$48 sps:$4 sm:$0xff]   ;;  %v13436_v40 = vld [vmem:[#allocation6 + $0x8b8] ss:$48 sps:$4 sm:$0xff]  }
 0x276   :  { %3138 = vmatprep.mubr.bf16.mxu0 %v15019_v0  ;;  %3179 = vmatprep.mubr.bf16.mxu1 %v15019_v0 }
 0x278   :  { %3109 = vmatpush1.bf16.msra.mxu0 %v13349_v41  ;;  %3150 = vmatpush1.bf16.msra.mxu1 %v13352_v43  ;;  %v13441_v41 = vld [vmem:[#allocation6 + $0x624] ss:$48 sps:$4 sm:$0xff]   ;;  %v13444_v43 = vld [vmem:[#allocation6 + $0x62c] ss:$48 sps:$4 sm:$0xff]  }
 0x279   :  { %3110 = vmatprep.subr.bf16.mxu0 %v13357_v48  ;;  %3151 = vmatprep.subr.bf16.mxu1 %v13360_v51  ;;  %v13439_v48 = vld [vmem:[#allocation6 + $0x620] ss:$48 sps:$4 sm:$0xff]   ;;  %v13442_v51 = vld [vmem:[#allocation6 + $0x628] ss:$48 sps:$4 sm:$0xff]  }
 0x27c   :  { %3111 = vmatpush1.bf16.msra.mxu0 %v13355_v54  ;;  %3152 = vmatpush1.bf16.msra.mxu1 %v13358_v55  ;;  %v13447_v54 = vld [vmem:[#allocation6 + $0x684] ss:$48 sps:$4 sm:$0xff]   ;;  %v13450_v55 = vld [vmem:[#allocation6 + $0x68c] ss:$48 sps:$4 sm:$0xff]  }
 0x27d   :  { %3112 = vmatprep.subr.bf16.mxu0 %v13363_v57  ;;  %3153 = vmatprep.subr.bf16.mxu1 %v13366_v13  ;;  %v13445_v57 = vld [vmem:[#allocation6 + $0x680] ss:$48 sps:$4 sm:$0xff]   ;;  %v13448_v13 = vld [vmem:[#allocation6 + $0x688] ss:$48 sps:$4 sm:$0xff]  }
 0x280   :  { %3113 = vmatpush1.bf16.msra.mxu0 %v13361_v56  ;;  %3154 = vmatpush1.bf16.msra.mxu1 %v13364_v58  ;;  %v13453_v56 = vld [vmem:[#allocation6 + $0x6e4] ss:$48 sps:$4 sm:$0xff]   ;;  %v13456_v58 = vld [vmem:[#allocation6 + $0x6ec] ss:$48 sps:$4 sm:$0xff]  }
 0x281   :  { %3114 = vmatprep.subr.bf16.mxu0 %v13369_v11  ;;  %3155 = vmatprep.subr.bf16.mxu1 %v13372_v12  ;;  %v13451_v11 = vld [vmem:[#allocation6 + $0x6e0] ss:$48 sps:$4 sm:$0xff]   ;;  %v13454_v12 = vld [vmem:[#allocation6 + $0x6e8] ss:$48 sps:$4 sm:$0xff]  }
 0x284   :  { %3115 = vmatpush1.bf16.msra.mxu0 %v13367_v14  ;;  %3156 = vmatpush1.bf16.msra.mxu1 %v13370_v61  ;;  %v13459_v14 = vld [vmem:[#allocation6 + $0x744] ss:$48 sps:$4 sm:$0xff]   ;;  %v13462_v61 = vld [vmem:[#allocation6 + $0x74c] ss:$48 sps:$4 sm:$0xff]  }
 0x285   :  { %3116 = vmatprep.subr.bf16.mxu0 %v13375_v37  ;;  %3157 = vmatprep.subr.bf16.mxu1 %v13378_v63  ;;  %v13457_v37 = vld [vmem:[#allocation6 + $0x740] ss:$48 sps:$4 sm:$0xff]   ;;  %v13460_v63 = vld [vmem:[#allocation6 + $0x748] ss:$48 sps:$4 sm:$0xff]  }
 0x288   :  { %3117 = vmatpush1.bf16.msra.mxu0 %v13373_v3  ;;  %3158 = vmatpush1.bf16.msra.mxu1 %v13376_v5  ;;  %v13465_v3 = vld [vmem:[#allocation6 + $0x7a4] ss:$48 sps:$4 sm:$0xff]   ;;  %v13468_v5 = vld [vmem:[#allocation6 + $0x7ac] ss:$48 sps:$4 sm:$0xff]  }
 0x289   :  { %3118 = vmatprep.subr.bf16.mxu0 %v13381_v16  ;;  %3159 = vmatprep.subr.bf16.mxu1 %v13384_v17  ;;  %v13463_v16 = vld [vmem:[#allocation6 + $0x7a0] ss:$48 sps:$4 sm:$0xff]   ;;  %v13466_v17 = vld [vmem:[#allocation6 + $0x7a8] ss:$48 sps:$4 sm:$0xff]  }
 0x28c   :  { %3119 = vmatpush1.bf16.msra.mxu0 %v13379_v19  ;;  %3160 = vmatpush1.bf16.msra.mxu1 %v13382_v59  ;;  %v13471_v19 = vld [vmem:[#allocation6 + $0x804] ss:$48 sps:$4 sm:$0xff]   ;;  %v13474_v59 = vld [vmem:[#allocation6 + $0x80c] ss:$48 sps:$4 sm:$0xff]  }
 0x28d   :  { %3120 = vmatprep.subr.bf16.mxu0 %v13387_v60  ;;  %3161 = vmatprep.subr.bf16.mxu1 %v13390_v62  ;;  %v13469_v60 = vld [vmem:[#allocation6 + $0x800] ss:$48 sps:$4 sm:$0xff]   ;;  %v13472_v62 = vld [vmem:[#allocation6 + $0x808] ss:$48 sps:$4 sm:$0xff]  }
 0x290   :  { %3121 = vmatpush1.bf16.msra.mxu0 %v13385_v8  ;;  %3162 = vmatpush1.bf16.msra.mxu1 %v13388_v42  ;;  %v13477_v8 = vld [vmem:[#allocation6 + $0x864] ss:$48 sps:$4 sm:$0xff]   ;;  %v13480_v42 = vld [vmem:[#allocation6 + $0x86c] ss:$48 sps:$4 sm:$0xff]  }
 0x291   :  { %3188 = vmatprep.subr.bf16.mxu0 %v13393_v45  ;;  %3229 = vmatprep.subr.bf16.mxu1 %v13396_v10  ;;  %v13475_v45 = vld [vmem:[#allocation6 + $0x860] ss:$48 sps:$4 sm:$0xff]   ;;  %v13478_v10 = vld [vmem:[#allocation6 + $0x868] ss:$48 sps:$4 sm:$0xff]  }
 0x293   :  { %3139 = vmatmul.mubr.bf16.vlgmr.msra.gmra.mrb[48].mxu0 %v15429_v46  ;;  %3180 = vmatmul.mubr.bf16.vlgmr.msra.gmra.mrb[48].mxu1 %v15429_v46 }
 0x294   :  { %3189 = vmatpush1.bf16.msra.mxu0 %v13391_v15  ;;  %3230 = vmatpush1.bf16.msra.mxu1 %v13394_v18  ;;  %v13483_v15 = vld [vmem:[#allocation6 + $0x8c4] ss:$48 sps:$4 sm:$0xff]   ;;  %v13486_v18 = vld [vmem:[#allocation6 + $0x8cc] ss:$48 sps:$4 sm:$0xff]  }
 0x295   :  { %3190 = vmatprep.subr.bf16.mxu0 %v13399_v20  ;;  %3231 = vmatprep.subr.bf16.mxu1 %v13402_v23  ;;  %v13481_v20 = vld [vmem:[#allocation6 + $0x8c0] ss:$48 sps:$4 sm:$0xff]   ;;  %v13484_v23 = vld [vmem:[#allocation6 + $0x8c8] ss:$48 sps:$4 sm:$0xff]  }
 0x296   :  { %3220 = vmatprep.mubr.bf16.mxu0 %v15019_v0  ;;  %3261 = vmatprep.mubr.bf16.mxu1 %v15019_v0 }
 0x298   :  { %3191 = vmatpush1.bf16.msra.mxu0 %v13397_v44  ;;  %3232 = vmatpush1.bf16.msra.mxu1 %v13400_v47  ;;  %v13489_v44 = vld [vmem:[#allocation6 + $0x904] ss:$48 sps:$4 sm:$0xff]   ;;  %v13492_v47 = vld [vmem:[#allocation6 + $0x90c] ss:$48 sps:$4 sm:$0xff]  }
 0x299   :  { %3192 = vmatprep.subr.bf16.mxu0 %v13405_v30  ;;  %3233 = vmatprep.subr.bf16.mxu1 %v13408_v31  ;;  %v13487_v30 = vld [vmem:[#allocation6 + $0x900] ss:$48 sps:$4 sm:$0xff]   ;;  %v13490_v31 = vld [vmem:[#allocation6 + $0x908] ss:$48 sps:$4 sm:$0xff]  }
 0x29c   :  { %3193 = vmatpush1.bf16.msra.mxu0 %v13403_v21  ;;  %3234 = vmatpush1.bf16.msra.mxu1 %v13406_v22  ;;  %v13495_v21 = vld [vmem:[#allocation6 + $0x964] ss:$48 sps:$4 sm:$0xff]   ;;  %v13498_v22 = vld [vmem:[#allocation6 + $0x96c] ss:$48 sps:$4 sm:$0xff]  }
 0x29d   :  { %3194 = vmatprep.subr.bf16.mxu0 %v13411_v24  ;;  %3235 = vmatprep.subr.bf16.mxu1 %v13414_v32  ;;  %v13493_v24 = vld [vmem:[#allocation6 + $0x960] ss:$48 sps:$4 sm:$0xff]   ;;  %v13496_v32 = vld [vmem:[#allocation6 + $0x968] ss:$48 sps:$4 sm:$0xff]  }
 0x2a0   :  { %3195 = vmatpush1.bf16.msra.mxu0 %v13409_v1  ;;  %3236 = vmatpush1.bf16.msra.mxu1 %v13412_v2  ;;  %v13501_v1 = vld [vmem:[#allocation6 + $0x9c4] ss:$48 sps:$4 sm:$0xff]   ;;  %v13504_v2 = vld [vmem:[#allocation6 + $0x9cc] ss:$48 sps:$4 sm:$0xff]  }
 0x2a1   :  { %3196 = vmatprep.subr.bf16.mxu0 %v13417_v4  ;;  %3237 = vmatprep.subr.bf16.mxu1 %v13420_v26  ;;  %v13499_v4 = vld [vmem:[#allocation6 + $0x9c0] ss:$48 sps:$4 sm:$0xff]   ;;  %v13502_v26 = vld [vmem:[#allocation6 + $0x9c8] ss:$48 sps:$4 sm:$0xff]  }
 0x2a4   :  { %3197 = vmatpush1.bf16.msra.mxu0 %v13415_v27  ;;  %3238 = vmatpush1.bf16.msra.mxu1 %v13418_v29  ;;  %v13507_v27 = vld [vmem:[#allocation6 + $0xa24] ss:$48 sps:$4 sm:$0xff]   ;;  %v13510_v29 = vld [vmem:[#allocation6 + $0xa2c] ss:$48 sps:$4 sm:$0xff]  }
 0x2a5   :  { %3198 = vmatprep.subr.bf16.mxu0 %v13423_v33  ;;  %3239 = vmatprep.subr.bf16.mxu1 %v13426_v49  ;;  %v13505_v33 = vld [vmem:[#allocation6 + $0xa20] ss:$48 sps:$4 sm:$0xff]   ;;  %v13508_v49 = vld [vmem:[#allocation6 + $0xa28] ss:$48 sps:$4 sm:$0xff]  }
 0x2a8   :  { %3199 = vmatpush1.bf16.msra.mxu0 %v13421_v34  ;;  %3240 = vmatpush1.bf16.msra.mxu1 %v13424_v52  ;;  %v13513_v34 = vld [vmem:[#allocation6 + $0xa84] ss:$48 sps:$4 sm:$0xff]   ;;  %v13516_v52 = vld [vmem:[#allocation6 + $0xa8c] ss:$48 sps:$4 sm:$0xff]  }
 0x2a9   :  { %3200 = vmatprep.subr.bf16.mxu0 %v13429_v35  ;;  %3241 = vmatprep.subr.bf16.mxu1 %v13432_v6  ;;  %v13511_v35 = vld [vmem:[#allocation6 + $0xa80] ss:$48 sps:$4 sm:$0xff]   ;;  %v13514_v6 = vld [vmem:[#allocation6 + $0xa88] ss:$48 sps:$4 sm:$0xff]  }
 0x2ac   :  { %3201 = vmatpush1.bf16.msra.mxu0 %v13427_v7  ;;  %3242 = vmatpush1.bf16.msra.mxu1 %v13430_v9  ;;  %v13519_v7 = vld [vmem:[#allocation6 + $0xae4] ss:$48 sps:$4 sm:$0xff]   ;;  %v13522_v9 = vld [vmem:[#allocation6 + $0xaec] ss:$48 sps:$4 sm:$0xff]  }
 0x2ad   :  { %3202 = vmatprep.subr.bf16.mxu0 %v13435_v36  ;;  %3243 = vmatprep.subr.bf16.mxu1 %v13438_v38  ;;  %v13517_v36 = vld [vmem:[#allocation6 + $0xae0] ss:$48 sps:$4 sm:$0xff]   ;;  %v13520_v38 = vld [vmem:[#allocation6 + $0xae8] ss:$48 sps:$4 sm:$0xff]  }
 0x2b0   :  { %3203 = vmatpush1.bf16.msra.mxu0 %v13433_v39  ;;  %3244 = vmatpush1.bf16.msra.mxu1 %v13436_v40  ;;  %v13525_v39 = vld [vmem:[#allocation6 + $0xb44] ss:$48 sps:$4 sm:$0xff]   ;;  %v13528_v40 = vld [vmem:[#allocation6 + $0xb4c] ss:$48 sps:$4 sm:$0xff]  }
 0x2b1   :  { %3270 = vmatprep.subr.bf16.mxu0 %v13441_v41  ;;  %3311 = vmatprep.subr.bf16.mxu1 %v13444_v43  ;;  %v13523_v41 = vld [vmem:[#allocation6 + $0xb40] ss:$48 sps:$4 sm:$0xff]   ;;  %v13526_v43 = vld [vmem:[#allocation6 + $0xb48] ss:$48 sps:$4 sm:$0xff]  }
 0x2b3   :  { %3221 = vmatmul.mubr.bf16.vlgmr.msra.gmra.mrb[52].mxu0 %v15429_v46  ;;  %3262 = vmatmul.mubr.bf16.vlgmr.msra.gmra.mrb[52].mxu1 %v15429_v46 }
 0x2b4   :  { %3271 = vmatpush1.bf16.msra.mxu0 %v13439_v48  ;;  %3312 = vmatpush1.bf16.msra.mxu1 %v13442_v51  ;;  %v13531_v48 = vld [vmem:[#allocation6 + $0xba4] ss:$48 sps:$4 sm:$0xff]   ;;  %v13534_v51 = vld [vmem:[#allocation6 + $0xbac] ss:$48 sps:$4 sm:$0xff]  }
 0x2b5   :  { %3272 = vmatprep.subr.bf16.mxu0 %v13447_v54  ;;  %3313 = vmatprep.subr.bf16.mxu1 %v13450_v55  ;;  %v13529_v54 = vld [vmem:[#allocation6 + $0xba0] ss:$48 sps:$4 sm:$0xff]   ;;  %v13532_v55 = vld [vmem:[#allocation6 + $0xba8] ss:$48 sps:$4 sm:$0xff]  }
 0x2b6   :  { %3302 = vmatprep.mubr.bf16.mxu0 %v15019_v0  ;;  %3343 = vmatprep.mubr.bf16.mxu1 %v15019_v0 }
 0x2b8   :  { %3273 = vmatpush1.bf16.msra.mxu0 %v13445_v57  ;;  %3314 = vmatpush1.bf16.msra.mxu1 %v13448_v13  ;;  %v13537_v57 = vld [vmem:[#allocation6 + $0x914] ss:$48 sps:$4 sm:$0xff]   ;;  %v13540_v13 = vld [vmem:[#allocation6 + $0x91c] ss:$48 sps:$4 sm:$0xff]  }
 0x2b9   :  { %3274 = vmatprep.subr.bf16.mxu0 %v13453_v56  ;;  %3315 = vmatprep.subr.bf16.mxu1 %v13456_v58  ;;  %v13535_v56 = vld [vmem:[#allocation6 + $0x910] ss:$48 sps:$4 sm:$0xff]   ;;  %v13538_v58 = vld [vmem:[#allocation6 + $0x918] ss:$48 sps:$4 sm:$0xff]  }
 0x2bc   :  { %3275 = vmatpush1.bf16.msra.mxu0 %v13451_v11  ;;  %3316 = vmatpush1.bf16.msra.mxu1 %v13454_v12  ;;  %v15501_v11 = vrot.slane %v15429_v46, 4  ;;  %v13543_v12 = vld [vmem:[#allocation6 + $0x974] ss:$48 sps:$4 sm:$0xff]  }
 0x2bd   :  { %3276 = vmatprep.subr.bf16.mxu0 %v13459_v14  ;;  %3317 = vmatprep.subr.bf16.mxu1 %v13462_v61  ;;  %v13546_v14 = vld [vmem:[#allocation6 + $0x97c] ss:$48 sps:$4 sm:$0xff]   ;;  %v13541_v61 = vld [vmem:[#allocation6 + $0x970] ss:$48 sps:$4 sm:$0xff]  }
 0x2c0   :  { %3277 = vmatpush1.bf16.msra.mxu0 %v13457_v37  ;;  %3318 = vmatpush1.bf16.msra.mxu1 %v13460_v63  ;;  %v13544_v37 = vld [vmem:[#allocation6 + $0x978] ss:$48 sps:$4 sm:$0xff]   ;;  %v13549_v63 = vld [vmem:[#allocation6 + $0x9d4] ss:$48 sps:$4 sm:$0xff]  }
 0x2c1   :  { %3278 = vmatprep.subr.bf16.mxu0 %v13465_v3  ;;  %3319 = vmatprep.subr.bf16.mxu1 %v13468_v5  ;;  %v13552_v3 = vld [vmem:[#allocation6 + $0x9dc] ss:$48 sps:$4 sm:$0xff]   ;;  %v13550_v5 = vld [vmem:[#allocation6 + $0x9d8] ss:$48 sps:$4 sm:$0xff]  }
 0x2c4   :  { %3279 = vmatpush1.bf16.msra.mxu0 %v13463_v16  ;;  %3320 = vmatpush1.bf16.msra.mxu1 %v13466_v17  ;;  %v13555_v16 = vld [vmem:[#allocation6 + $0xa34] ss:$48 sps:$4 sm:$0xff]   ;;  %v13558_v17 = vld [vmem:[#allocation6 + $0xa3c] ss:$48 sps:$4 sm:$0xff]  }
 0x2c5   :  { %3280 = vmatprep.subr.bf16.mxu0 %v13471_v19  ;;  %3321 = vmatprep.subr.bf16.mxu1 %v13474_v59  ;;  %v13553_v19 = vld [vmem:[#allocation6 + $0xa30] ss:$48 sps:$4 sm:$0xff]   ;;  %v13556_v59 = vld [vmem:[#allocation6 + $0xa38] ss:$48 sps:$4 sm:$0xff]  }
 0x2c8   :  { %3281 = vmatpush1.bf16.msra.mxu0 %v13469_v60  ;;  %3322 = vmatpush1.bf16.msra.mxu1 %v13472_v62  ;;  %v13561_v60 = vld [vmem:[#allocation6 + $0xa94] ss:$48 sps:$4 sm:$0xff]   ;;  %v13564_v62 = vld [vmem:[#allocation6 + $0xa9c] ss:$48 sps:$4 sm:$0xff]  }
 0x2c9   :  { %3282 = vmatprep.subr.bf16.mxu0 %v13477_v8  ;;  %3323 = vmatprep.subr.bf16.mxu1 %v13480_v42  ;;  %v13559_v8 = vld [vmem:[#allocation6 + $0xa90] ss:$48 sps:$4 sm:$0xff]   ;;  %v13562_v42 = vld [vmem:[#allocation6 + $0xa98] ss:$48 sps:$4 sm:$0xff]  }
 0x2cc   :  { %3283 = vmatpush1.bf16.msra.mxu0 %v13475_v45  ;;  %3324 = vmatpush1.bf16.msra.mxu1 %v13478_v10  ;;  %v13567_v45 = vld [vmem:[#allocation6 + $0xaf4] ss:$48 sps:$4 sm:$0xff]   ;;  %v13570_v10 = vld [vmem:[#allocation6 + $0xafc] ss:$48 sps:$4 sm:$0xff]  }
 0x2cd   :  { %3284 = vmatprep.subr.bf16.mxu0 %v13483_v15  ;;  %3325 = vmatprep.subr.bf16.mxu1 %v13486_v18  ;;  %v13565_v15 = vld [vmem:[#allocation6 + $0xaf0] ss:$48 sps:$4 sm:$0xff]   ;;  %v13568_v18 = vld [vmem:[#allocation6 + $0xaf8] ss:$48 sps:$4 sm:$0xff]  }
 0x2d0   :  { %3285 = vmatpush1.bf16.msra.mxu0 %v13481_v20  ;;  %3326 = vmatpush1.bf16.msra.mxu1 %v13484_v23  ;;  %v13573_v20 = vld [vmem:[#allocation6 + $0xb54] ss:$48 sps:$4 sm:$0xff]   ;;  %v13576_v23 = vld [vmem:[#allocation6 + $0xb5c] ss:$48 sps:$4 sm:$0xff]  }
 0x2d1   :  { %3944 = vmatprep.subr.bf16.mxu0 %v13489_v44  ;;  %3985 = vmatprep.subr.bf16.mxu1 %v13492_v47  ;;  %v13571_v44 = vld [vmem:[#allocation6 + $0xb50] ss:$48 sps:$4 sm:$0xff]   ;;  %v13574_v47 = vld [vmem:[#allocation6 + $0xb58] ss:$48 sps:$4 sm:$0xff]  }
 0x2d3   :  { %3303 = vmatmul.mubr.bf16.vlgmr.msra.gmra.mrb[56].mxu0 %v15429_v46  ;;  %3344 = vmatmul.mubr.bf16.vlgmr.msra.gmra.mrb[56].mxu1 %v15429_v46  ;;  %v13547_v46 = vld [vmem:[#allocation6 + $0x9d0] ss:$48 sps:$4 sm:$0xff]  }
 0x2d4   :  { %3945 = vmatpush1.bf16.msra.mxu0 %v13487_v30  ;;  %3986 = vmatpush1.bf16.msra.mxu1 %v13490_v31  ;;  %v13579_v30 = vld [vmem:[#allocation6 + $0xbb4] ss:$48 sps:$4 sm:$0xff]   ;;  %v13582_v31 = vld [vmem:[#allocation6 + $0xbbc] ss:$48 sps:$4 sm:$0xff]  }
 0x2d5   :  { %3946 = vmatprep.subr.bf16.mxu0 %v13495_v21  ;;  %3987 = vmatprep.subr.bf16.mxu1 %v13498_v22  ;;  %v13577_v21 = vld [vmem:[#allocation6 + $0xbb0] ss:$48 sps:$4 sm:$0xff]   ;;  %v13580_v22 = vld [vmem:[#allocation6 + $0xbb8] ss:$48 sps:$4 sm:$0xff]  }
 0x2d6   :  { %3976 = vmatprep.mubr.bf16.mxu0 %v15019_v0  ;;  %4017 = vmatprep.mubr.bf16.mxu1 %v15019_v0 }
 0x2d8   :  { %3947 = vmatpush1.bf16.msra.mxu0 %v13493_v24  ;;  %3988 = vmatpush1.bf16.msra.mxu1 %v13496_v32  ;;  %v13585_v24 = vld [vmem:[#allocation6 + $0x924] ss:$48 sps:$4 sm:$0xff]   ;;  %v13588_v32 = vld [vmem:[#allocation6 + $0x92c] ss:$48 sps:$4 sm:$0xff]  }
 0x2d9   :  { %3948 = vmatprep.subr.bf16.mxu0 %v13501_v1  ;;  %3989 = vmatprep.subr.bf16.mxu1 %v13504_v2  ;;  %v13583_v1 = vld [vmem:[#allocation6 + $0x920] ss:$48 sps:$4 sm:$0xff]   ;;  %v13586_v2 = vld [vmem:[#allocation6 + $0x928] ss:$48 sps:$4 sm:$0xff]  }
 0x2dc   :  { %3949 = vmatpush1.bf16.msra.mxu0 %v13499_v4  ;;  %3990 = vmatpush1.bf16.msra.mxu1 %v13502_v26  ;;  %v13591_v4 = vld [vmem:[#allocation6 + $0x984] ss:$48 sps:$4 sm:$0xff]   ;;  %v13594_v26 = vld [vmem:[#allocation6 + $0x98c] ss:$48 sps:$4 sm:$0xff]  }
 0x2dd   :  { %3950 = vmatprep.subr.bf16.mxu0 %v13507_v27  ;;  %3991 = vmatprep.subr.bf16.mxu1 %v13510_v29  ;;  %v13589_v27 = vld [vmem:[#allocation6 + $0x980] ss:$48 sps:$4 sm:$0xff]   ;;  %v13592_v29 = vld [vmem:[#allocation6 + $0x988] ss:$48 sps:$4 sm:$0xff]  }
 0x2e0   :  { %3951 = vmatpush1.bf16.msra.mxu0 %v13505_v33  ;;  %3992 = vmatpush1.bf16.msra.mxu1 %v13508_v49  ;;  %v13597_v33 = vld [vmem:[#allocation6 + $0x9e4] ss:$48 sps:$4 sm:$0xff]   ;;  %v13600_v49 = vld [vmem:[#allocation6 + $0x9ec] ss:$48 sps:$4 sm:$0xff]  }
 0x2e1   :  { %3952 = vmatprep.subr.bf16.mxu0 %v13513_v34  ;;  %3993 = vmatprep.subr.bf16.mxu1 %v13516_v52  ;;  %v13595_v34 = vld [vmem:[#allocation6 + $0x9e0] ss:$48 sps:$4 sm:$0xff]   ;;  %v13598_v52 = vld [vmem:[#allocation6 + $0x9e8] ss:$48 sps:$4 sm:$0xff]  }
 0x2e4   :  { %3953 = vmatpush1.bf16.msra.mxu0 %v13511_v35  ;;  %3994 = vmatpush1.bf16.msra.mxu1 %v13514_v6  ;;  %v13603_v35 = vld [vmem:[#allocation6 + $0xa44] ss:$48 sps:$4 sm:$0xff]   ;;  %v13606_v6 = vld [vmem:[#allocation6 + $0xa4c] ss:$48 sps:$4 sm:$0xff]  }
 0x2e5   :  { %3954 = vmatprep.subr.bf16.mxu0 %v13519_v7  ;;  %3995 = vmatprep.subr.bf16.mxu1 %v13522_v9  ;;  %v13601_v7 = vld [vmem:[#allocation6 + $0xa40] ss:$48 sps:$4 sm:$0xff]   ;;  %v13604_v9 = vld [vmem:[#allocation6 + $0xa48] ss:$48 sps:$4 sm:$0xff]  }
 0x2e8   :  { %3955 = vmatpush1.bf16.msra.mxu0 %v13517_v36  ;;  %3996 = vmatpush1.bf16.msra.mxu1 %v13520_v38  ;;  %v13609_v36 = vld [vmem:[#allocation6 + $0xaa4] ss:$48 sps:$4 sm:$0xff]   ;;  %v13612_v38 = vld [vmem:[#allocation6 + $0xaac] ss:$48 sps:$4 sm:$0xff]  }
 0x2e9   :  { %3956 = vmatprep.subr.bf16.mxu0 %v13525_v39  ;;  %3997 = vmatprep.subr.bf16.mxu1 %v13528_v40  ;;  %v13607_v39 = vld [vmem:[#allocation6 + $0xaa0] ss:$48 sps:$4 sm:$0xff]   ;;  %v13610_v40 = vld [vmem:[#allocation6 + $0xaa8] ss:$48 sps:$4 sm:$0xff]  }
 0x2ec   :  { %3957 = vmatpush1.bf16.msra.mxu0 %v13523_v41  ;;  %3998 = vmatpush1.bf16.msra.mxu1 %v13526_v43  ;;  %v13615_v41 = vld [vmem:[#allocation6 + $0xb04] ss:$48 sps:$4 sm:$0xff]   ;;  %v13618_v43 = vld [vmem:[#allocation6 + $0xb0c] ss:$48 sps:$4 sm:$0xff]  }
 0x2ed   :  { %3958 = vmatprep.subr.bf16.mxu0 %v13531_v48  ;;  %3999 = vmatprep.subr.bf16.mxu1 %v13534_v51  ;;  %v13613_v48 = vld [vmem:[#allocation6 + $0xb00] ss:$48 sps:$4 sm:$0xff]   ;;  %v13616_v51 = vld [vmem:[#allocation6 + $0xb08] ss:$48 sps:$4 sm:$0xff]  }
 0x2f0   :  { %3959 = vmatpush1.bf16.msra.mxu0 %v13529_v54  ;;  %4000 = vmatpush1.bf16.msra.mxu1 %v13532_v55  ;;  %v13621_v54 = vld [vmem:[#allocation6 + $0xb64] ss:$48 sps:$4 sm:$0xff]   ;;  %v13624_v55 = vld [vmem:[#allocation6 + $0xb6c] ss:$48 sps:$4 sm:$0xff]  }
 0x2f1   :  { %4026 = vmatprep.subr.bf16.mxu0 %v13537_v57  ;;  %4067 = vmatprep.subr.bf16.mxu1 %v13540_v13  ;;  %v13619_v57 = vld [vmem:[#allocation6 + $0xb60] ss:$48 sps:$4 sm:$0xff]   ;;  %v13622_v13 = vld [vmem:[#allocation6 + $0xb68] ss:$48 sps:$4 sm:$0xff]  }
 0x2f3   :  { %3977 = vmatmul.mubr.bf16.vlgmr.msra.gmra.mrb[48].mxu0 %v15501_v11  ;;  %4018 = vmatmul.mubr.bf16.vlgmr.msra.gmra.mrb[48].mxu1 %v15501_v11 }
 0x2f4   :  { %4027 = vmatpush1.bf16.msra.mxu0 %v13535_v56  ;;  %4068 = vmatpush1.bf16.msra.mxu1 %v13538_v58  ;;  %v13627_v56 = vld [vmem:[#allocation6 + $0xbc4] ss:$48 sps:$4 sm:$0xff]   ;;  %v13630_v58 = vld [vmem:[#allocation6 + $0xbcc] ss:$48 sps:$4 sm:$0xff]  }
 0x2f5   :  { %4028 = vmatprep.subr.bf16.mxu0 %v13543_v12  ;;  %4069 = vmatprep.subr.bf16.mxu1 %v13546_v14  ;;  %v13625_v12 = vld [vmem:[#allocation6 + $0xbc0] ss:$48 sps:$4 sm:$0xff]   ;;  %v13628_v14 = vld [vmem:[#allocation6 + $0xbc8] ss:$48 sps:$4 sm:$0xff]  }
 0x2f6   :  { %4058 = vmatprep.mubr.bf16.mxu0 %v15019_v0  ;;  %4099 = vmatprep.mubr.bf16.mxu1 %v15019_v0 }
 0x2f8   :  { %4029 = vmatpush1.bf16.msra.mxu0 %v13541_v61  ;;  %4070 = vmatpush1.bf16.msra.mxu1 %v13544_v37  ;;  %v13633_v61 = vld [vmem:[#allocation6 + $0xc04] ss:$48 sps:$4 sm:$0xff]   ;;  %v13636_v37 = vld [vmem:[#allocation6 + $0xc0c] ss:$48 sps:$4 sm:$0xff]  }
 0x2f9   :  { %4030 = vmatprep.subr.bf16.mxu0 %v13549_v63  ;;  %4071 = vmatprep.subr.bf16.mxu1 %v13552_v3  ;;  %v13631_v63 = vld [vmem:[#allocation6 + $0xc00] ss:$48 sps:$4 sm:$0xff]   ;;  %v13634_v3 = vld [vmem:[#allocation6 + $0xc08] ss:$48 sps:$4 sm:$0xff]  }
 0x2fc   :  { %4031 = vmatpush1.bf16.msra.mxu0 %v13547_v46  ;;  %4072 = vmatpush1.bf16.msra.mxu1 %v13550_v5  ;;  %v13639_v46 = vld [vmem:[#allocation6 + $0xc64] ss:$48 sps:$4 sm:$0xff]   ;;  %v13642_v5 = vld [vmem:[#allocation6 + $0xc6c] ss:$48 sps:$4 sm:$0xff]  }
 0x2fd   :  { %4032 = vmatprep.subr.bf16.mxu0 %v13555_v16  ;;  %4073 = vmatprep.subr.bf16.mxu1 %v13558_v17  ;;  %v13637_v16 = vld [vmem:[#allocation6 + $0xc60] ss:$48 sps:$4 sm:$0xff]   ;;  %v13640_v17 = vld [vmem:[#allocation6 + $0xc68] ss:$48 sps:$4 sm:$0xff]  }
 0x300   :  { %4033 = vmatpush1.bf16.msra.mxu0 %v13553_v19  ;;  %4074 = vmatpush1.bf16.msra.mxu1 %v13556_v59  ;;  %v13645_v19 = vld [vmem:[#allocation6 + $0xcc4] ss:$48 sps:$4 sm:$0xff]   ;;  %v13648_v59 = vld [vmem:[#allocation6 + $0xccc] ss:$48 sps:$4 sm:$0xff]  }
 0x301   :  { %4034 = vmatprep.subr.bf16.mxu0 %v13561_v60  ;;  %4075 = vmatprep.subr.bf16.mxu1 %v13564_v62  ;;  %v13643_v60 = vld [vmem:[#allocation6 + $0xcc0] ss:$48 sps:$4 sm:$0xff]   ;;  %v13646_v62 = vld [vmem:[#allocation6 + $0xcc8] ss:$48 sps:$4 sm:$0xff]  }
 0x304   :  { %4035 = vmatpush1.bf16.msra.mxu0 %v13559_v8  ;;  %4076 = vmatpush1.bf16.msra.mxu1 %v13562_v42  ;;  %v13651_v8 = vld [vmem:[#allocation6 + $0xd24] ss:$48 sps:$4 sm:$0xff]   ;;  %v13649_v42 = vld [vmem:[#allocation6 + $0xd20] ss:$48 sps:$4 sm:$0xff]  }
 0x305   :  { %4036 = vmatprep.subr.bf16.mxu0 %v13567_v45  ;;  %4077 = vmatprep.subr.bf16.mxu1 %v13570_v10  ;;  %v13652_v45 = vld [vmem:[#allocation6 + $0xd28] ss:$48 sps:$4 sm:$0xff]   ;;  %v13657_v10 = vld [vmem:[#allocation6 + $0xd84] ss:$48 sps:$4 sm:$0xff]  }
 0x308   :  { %4037 = vmatpush1.bf16.msra.mxu0 %v13565_v15  ;;  %4078 = vmatpush1.bf16.msra.mxu1 %v13568_v18  ;;  %v13660_v15 = vld [vmem:[#allocation6 + $0xd8c] ss:$48 sps:$4 sm:$0xff]   ;;  %v13655_v18 = vld [vmem:[#allocation6 + $0xd80] ss:$48 sps:$4 sm:$0xff]  }
 0x309   :  { %4038 = vmatprep.subr.bf16.mxu0 %v13573_v20  ;;  %4079 = vmatprep.subr.bf16.mxu1 %v13576_v23  ;;  %v13658_v20 = vld [vmem:[#allocation6 + $0xd88] ss:$48 sps:$4 sm:$0xff]   ;;  %v13663_v23 = vld [vmem:[#allocation6 + $0xde4] ss:$48 sps:$4 sm:$0xff]  }
 0x30c   :  { %4039 = vmatpush1.bf16.msra.mxu0 %v13571_v44  ;;  %4080 = vmatpush1.bf16.msra.mxu1 %v13574_v47  ;;  %v13666_v44 = vld [vmem:[#allocation6 + $0xdec] ss:$48 sps:$4 sm:$0xff]   ;;  %v13661_v47 = vld [vmem:[#allocation6 + $0xde0] ss:$48 sps:$4 sm:$0xff]  }
 0x30d   :  { %4040 = vmatprep.subr.bf16.mxu0 %v13579_v30  ;;  %4081 = vmatprep.subr.bf16.mxu1 %v13582_v31  ;;  %v13664_v30 = vld [vmem:[#allocation6 + $0xde8] ss:$48 sps:$4 sm:$0xff]   ;;  %v13669_v31 = vld [vmem:[#allocation6 + $0xe44] ss:$48 sps:$4 sm:$0xff]  }
 0x310   :  { %4041 = vmatpush1.bf16.msra.mxu0 %v13577_v21  ;;  %4082 = vmatpush1.bf16.msra.mxu1 %v13580_v22  ;;  %v13672_v21 = vld [vmem:[#allocation6 + $0xe4c] ss:$48 sps:$4 sm:$0xff]   ;;  %v13667_v22 = vld [vmem:[#allocation6 + $0xe40] ss:$48 sps:$4 sm:$0xff]  }
 0x311   :  { %4108 = vmatprep.subr.bf16.mxu0 %v13585_v24  ;;  %4149 = vmatprep.subr.bf16.mxu1 %v13588_v32  ;;  %v13670_v24 = vld [vmem:[#allocation6 + $0xe48] ss:$48 sps:$4 sm:$0xff]   ;;  %v13675_v32 = vld [vmem:[#allocation6 + $0xea4] ss:$48 sps:$4 sm:$0xff]  }
 0x313   :  { %4059 = vmatmul.mubr.bf16.vlgmr.msra.gmra.mrb[52].mxu0 %v15501_v11  ;;  %4100 = vmatmul.mubr.bf16.vlgmr.msra.gmra.mrb[52].mxu1 %v15501_v11 }
 0x314   :  { %4109 = vmatpush1.bf16.msra.mxu0 %v13583_v1  ;;  %4150 = vmatpush1.bf16.msra.mxu1 %v13586_v2  ;;  %v13678_v1 = vld [vmem:[#allocation6 + $0xeac] ss:$48 sps:$4 sm:$0xff]   ;;  %v13673_v2 = vld [vmem:[#allocation6 + $0xea0] ss:$48 sps:$4 sm:$0xff]  }
 0x315   :  { %4110 = vmatprep.subr.bf16.mxu0 %v13591_v4  ;;  %4151 = vmatprep.subr.bf16.mxu1 %v13594_v26  ;;  %v13676_v4 = vld [vmem:[#allocation6 + $0xea8] ss:$48 sps:$4 sm:$0xff]   ;;  %v13681_v26 = vld [vmem:[#allocation6 + $0xc14] ss:$48 sps:$4 sm:$0xff]  }
 0x316   :  { %4140 = vmatprep.mubr.bf16.mxu0 %v15019_v0  ;;  %4181 = vmatprep.mubr.bf16.mxu1 %v15019_v0 }
 0x318   :  { %4111 = vmatpush1.bf16.msra.mxu0 %v13589_v27  ;;  %4152 = vmatpush1.bf16.msra.mxu1 %v13592_v29  ;;  %v13684_v27 = vld [vmem:[#allocation6 + $0xc1c] ss:$48 sps:$4 sm:$0xff]   ;;  %v13679_v29 = vld [vmem:[#allocation6 + $0xc10] ss:$48 sps:$4 sm:$0xff]  }
 0x319   :  { %4112 = vmatprep.subr.bf16.mxu0 %v13597_v33  ;;  %4153 = vmatprep.subr.bf16.mxu1 %v13600_v49  ;;  %v13682_v33 = vld [vmem:[#allocation6 + $0xc18] ss:$48 sps:$4 sm:$0xff]   ;;  %v13687_v49 = vld [vmem:[#allocation6 + $0xc74] ss:$48 sps:$4 sm:$0xff]  }
 0x31c   :  { %4113 = vmatpush1.bf16.msra.mxu0 %v13595_v34  ;;  %4154 = vmatpush1.bf16.msra.mxu1 %v13598_v52  ;;  %v13690_v34 = vld [vmem:[#allocation6 + $0xc7c] ss:$48 sps:$4 sm:$0xff]   ;;  %v13685_v52 = vld [vmem:[#allocation6 + $0xc70] ss:$48 sps:$4 sm:$0xff]  }
 0x31d   :  { %4114 = vmatprep.subr.bf16.mxu0 %v13603_v35  ;;  %4155 = vmatprep.subr.bf16.mxu1 %v13606_v6  ;;  %v13688_v35 = vld [vmem:[#allocation6 + $0xc78] ss:$48 sps:$4 sm:$0xff]   ;;  %v13693_v6 = vld [vmem:[#allocation6 + $0xcd4] ss:$48 sps:$4 sm:$0xff]  }
 0x320   :  { %4115 = vmatpush1.bf16.msra.mxu0 %v13601_v7  ;;  %4156 = vmatpush1.bf16.msra.mxu1 %v13604_v9  ;;  %v13696_v7 = vld [vmem:[#allocation6 + $0xcdc] ss:$48 sps:$4 sm:$0xff]   ;;  %v13691_v9 = vld [vmem:[#allocation6 + $0xcd0] ss:$48 sps:$4 sm:$0xff]  }
 0x321   :  { %4116 = vmatprep.subr.bf16.mxu0 %v13609_v36  ;;  %4157 = vmatprep.subr.bf16.mxu1 %v13612_v38  ;;  %v13694_v36 = vld [vmem:[#allocation6 + $0xcd8] ss:$48 sps:$4 sm:$0xff]   ;;  %v13699_v38 = vld [vmem:[#allocation6 + $0xd34] ss:$48 sps:$4 sm:$0xff]  }
 0x324   :  { %4117 = vmatpush1.bf16.msra.mxu0 %v13607_v39  ;;  %4158 = vmatpush1.bf16.msra.mxu1 %v13610_v40  ;;  %v13702_v39 = vld [vmem:[#allocation6 + $0xd3c] ss:$48 sps:$4 sm:$0xff]   ;;  %v13697_v40 = vld [vmem:[#allocation6 + $0xd30] ss:$48 sps:$4 sm:$0xff]  }
 0x325   :  { %4118 = vmatprep.subr.bf16.mxu0 %v13615_v41  ;;  %4159 = vmatprep.subr.bf16.mxu1 %v13618_v43  ;;  %v13700_v41 = vld [vmem:[#allocation6 + $0xd38] ss:$48 sps:$4 sm:$0xff]   ;;  %v13705_v43 = vld [vmem:[#allocation6 + $0xd94] ss:$48 sps:$4 sm:$0xff]  }
 0x328   :  { %4119 = vmatpush1.bf16.msra.mxu0 %v13613_v48  ;;  %4160 = vmatpush1.bf16.msra.mxu1 %v13616_v51  ;;  %v13708_v48 = vld [vmem:[#allocation6 + $0xd9c] ss:$48 sps:$4 sm:$0xff]   ;;  %v13703_v51 = vld [vmem:[#allocation6 + $0xd90] ss:$48 sps:$4 sm:$0xff]  }
 0x329   :  { %4120 = vmatprep.subr.bf16.mxu0 %v13621_v54  ;;  %4161 = vmatprep.subr.bf16.mxu1 %v13624_v55  ;;  %v13706_v54 = vld [vmem:[#allocation6 + $0xd98] ss:$48 sps:$4 sm:$0xff]   ;;  %v13711_v55 = vld [vmem:[#allocation6 + $0xdf4] ss:$48 sps:$4 sm:$0xff]  }
 0x32c   :  { %4121 = vmatpush1.bf16.msra.mxu0 %v13619_v57  ;;  %4162 = vmatpush1.bf16.msra.mxu1 %v13622_v13  ;;  %v13714_v57 = vld [vmem:[#allocation6 + $0xdfc] ss:$48 sps:$4 sm:$0xff]   ;;  %v13709_v13 = vld [vmem:[#allocation6 + $0xdf0] ss:$48 sps:$4 sm:$0xff]  }
 0x32d   :  { %4122 = vmatprep.subr.bf16.mxu0 %v13627_v56  ;;  %4163 = vmatprep.subr.bf16.mxu1 %v13630_v58  ;;  %v13712_v56 = vld [vmem:[#allocation6 + $0xdf8] ss:$48 sps:$4 sm:$0xff]   ;;  %v13717_v58 = vld [vmem:[#allocation6 + $0xe54] ss:$48 sps:$4 sm:$0xff]  }
 0x330   :  { %4123 = vmatpush1.bf16.msra.mxu0 %v13625_v12  ;;  %4164 = vmatpush1.bf16.msra.mxu1 %v13628_v14  ;;  %v13720_v12 = vld [vmem:[#allocation6 + $0xe5c] ss:$48 sps:$4 sm:$0xff]   ;;  %v13715_v14 = vld [vmem:[#allocation6 + $0xe50] ss:$48 sps:$4 sm:$0xff]  }
 0x331   :  { %4779 = vmatprep.subr.bf16.mxu0 %v13633_v61  ;;  %4820 = vmatprep.subr.bf16.mxu1 %v13636_v37  ;;  %v13718_v61 = vld [vmem:[#allocation6 + $0xe58] ss:$48 sps:$4 sm:$0xff]   ;;  %v13723_v37 = vld [vmem:[#allocation6 + $0xeb4] ss:$48 sps:$4 sm:$0xff]  }
 0x333   :  { %4141 = vmatmul.mubr.bf16.vlgmr.msra.gmra.mrb[56].mxu0 %v15501_v11  ;;  %4182 = vmatmul.mubr.bf16.vlgmr.msra.gmra.mrb[56].mxu1 %v15501_v11  ;;  %v13654_v11 = vld [vmem:[#allocation6 + $0xd2c] ss:$48 sps:$4 sm:$0xff]  }
 0x334   :  { %4780 = vmatpush1.bf16.msra.mxu0 %v13631_v63  ;;  %4821 = vmatpush1.bf16.msra.mxu1 %v13634_v3  ;;  %v13726_v63 = vld [vmem:[#allocation6 + $0xebc] ss:$48 sps:$4 sm:$0xff]   ;;  %v13721_v3 = vld [vmem:[#allocation6 + $0xeb0] ss:$48 sps:$4 sm:$0xff]  }
 0x335   :  { %4781 = vmatprep.subr.bf16.mxu0 %v13639_v46  ;;  %4822 = vmatprep.subr.bf16.mxu1 %v13642_v5  ;;  %v13724_v46 = vld [vmem:[#allocation6 + $0xeb8] ss:$48 sps:$4 sm:$0xff]   ;;  %v13729_v5 = vld [vmem:[#allocation6 + $0xc24] ss:$48 sps:$4 sm:$0xff]  }
 0x336   :  { %4811 = vmatprep.mubr.bf16.mxu0 %v15019_v0  ;;  %4852 = vmatprep.mubr.bf16.mxu1 %v15019_v0 }
 0x338   :  { %4782 = vmatpush1.bf16.msra.mxu0 %v13637_v16  ;;  %4823 = vmatpush1.bf16.msra.mxu1 %v13640_v17  ;;  %v13732_v16 = vld [vmem:[#allocation6 + $0xc2c] ss:$48 sps:$4 sm:$0xff]   ;;  %v13727_v17 = vld [vmem:[#allocation6 + $0xc20] ss:$48 sps:$4 sm:$0xff]  }
 0x339   :  { %4783 = vmatprep.subr.bf16.mxu0 %v13645_v19  ;;  %4824 = vmatprep.subr.bf16.mxu1 %v13648_v59  ;;  %v13730_v19 = vld [vmem:[#allocation6 + $0xc28] ss:$48 sps:$4 sm:$0xff]   ;;  %v13735_v59 = vld [vmem:[#allocation6 + $0xc84] ss:$48 sps:$4 sm:$0xff]  }
 0x33c   :  { %4784 = vmatpush1.bf16.msra.mxu0 %v13643_v60  ;;  %4825 = vmatpush1.bf16.msra.mxu1 %v13646_v62  ;;  %v13738_v60 = vld [vmem:[#allocation6 + $0xc8c] ss:$48 sps:$4 sm:$0xff]   ;;  %v13733_v62 = vld [vmem:[#allocation6 + $0xc80] ss:$48 sps:$4 sm:$0xff]  }
 0x33d   :  { %4785 = vmatprep.subr.bf16.mxu0 %v13651_v8  ;;  %4826 = vmatprep.subr.bf16.mxu1 %v13654_v11  ;;  %v13736_v8 = vld [vmem:[#allocation6 + $0xc88] ss:$48 sps:$4 sm:$0xff]   ;;  %v13741_v11 = vld [vmem:[#allocation6 + $0xce4] ss:$48 sps:$4 sm:$0xff]  }
 0x340   :  { %4786 = vmatpush1.bf16.msra.mxu0 %v13649_v42  ;;  %4827 = vmatpush1.bf16.msra.mxu1 %v13652_v45  ;;  %v13744_v42 = vld [vmem:[#allocation6 + $0xcec] ss:$48 sps:$4 sm:$0xff]   ;;  %v13739_v45 = vld [vmem:[#allocation6 + $0xce0] ss:$48 sps:$4 sm:$0xff]  }
 0x341   :  { %4787 = vmatprep.subr.bf16.mxu0 %v13657_v10  ;;  %4828 = vmatprep.subr.bf16.mxu1 %v13660_v15  ;;  %v13742_v10 = vld [vmem:[#allocation6 + $0xce8] ss:$48 sps:$4 sm:$0xff]   ;;  %v13747_v15 = vld [vmem:[#allocation6 + $0xd44] ss:$48 sps:$4 sm:$0xff]  }
 0x344   :  { %4788 = vmatpush1.bf16.msra.mxu0 %v13655_v18  ;;  %4829 = vmatpush1.bf16.msra.mxu1 %v13658_v20  ;;  %v13750_v18 = vld [vmem:[#allocation6 + $0xd4c] ss:$48 sps:$4 sm:$0xff]   ;;  %v13745_v20 = vld [vmem:[#allocation6 + $0xd40] ss:$48 sps:$4 sm:$0xff]  }
 0x345   :  { %4789 = vmatprep.subr.bf16.mxu0 %v13663_v23  ;;  %4830 = vmatprep.subr.bf16.mxu1 %v13666_v44  ;;  %v13748_v23 = vld [vmem:[#allocation6 + $0xd48] ss:$48 sps:$4 sm:$0xff]   ;;  %v13753_v44 = vld [vmem:[#allocation6 + $0xda4] ss:$48 sps:$4 sm:$0xff]  }
 0x348   :  { %4790 = vmatpush1.bf16.msra.mxu0 %v13661_v47  ;;  %4831 = vmatpush1.bf16.msra.mxu1 %v13664_v30  ;;  %v13756_v47 = vld [vmem:[#allocation6 + $0xdac] ss:$48 sps:$4 sm:$0xff]   ;;  %v13751_v30 = vld [vmem:[#allocation6 + $0xda0] ss:$48 sps:$4 sm:$0xff]  }
 0x349   :  { %4791 = vmatprep.subr.bf16.mxu0 %v13669_v31  ;;  %4832 = vmatprep.subr.bf16.mxu1 %v13672_v21  ;;  %v13754_v31 = vld [vmem:[#allocation6 + $0xda8] ss:$48 sps:$4 sm:$0xff]   ;;  %v13759_v21 = vld [vmem:[#allocation6 + $0xe04] ss:$48 sps:$4 sm:$0xff]  }
 0x34c   :  { %4792 = vmatpush1.bf16.msra.mxu0 %v13667_v22  ;;  %4833 = vmatpush1.bf16.msra.mxu1 %v13670_v24  ;;  %v13762_v22 = vld [vmem:[#allocation6 + $0xe0c] ss:$48 sps:$4 sm:$0xff]   ;;  %v13757_v24 = vld [vmem:[#allocation6 + $0xe00] ss:$48 sps:$4 sm:$0xff]  }
 0x34d   :  { %4793 = vmatprep.subr.bf16.mxu0 %v13675_v32  ;;  %4834 = vmatprep.subr.bf16.mxu1 %v13678_v1  ;;  %v13760_v32 = vld [vmem:[#allocation6 + $0xe08] ss:$48 sps:$4 sm:$0xff]   ;;  %v13765_v1 = vld [vmem:[#allocation6 + $0xe64] ss:$48 sps:$4 sm:$0xff]  }
 0x350   :  { %4794 = vmatpush1.bf16.msra.mxu0 %v13673_v2  ;;  %4835 = vmatpush1.bf16.msra.mxu1 %v13676_v4  ;;  %v13768_v2 = vld [vmem:[#allocation6 + $0xe6c] ss:$48 sps:$4 sm:$0xff]   ;;  %v13763_v4 = vld [vmem:[#allocation6 + $0xe60] ss:$48 sps:$4 sm:$0xff]  }
 0x351   :  { %4861 = vmatprep.subr.bf16.mxu0 %v13681_v26  ;;  %4902 = vmatprep.subr.bf16.mxu1 %v13684_v27  ;;  %v13766_v26 = vld [vmem:[#allocation6 + $0xe68] ss:$48 sps:$4 sm:$0xff]   ;;  %v13771_v27 = vld [vmem:[#allocation6 + $0xec4] ss:$48 sps:$4 sm:$0xff]  }
 0x353   :  { %4812 = vmatmul.mubr.bf16.vlgmr.msra.gmra.mrb[48].mxu0 %v15439_v28  ;;  %4853 = vmatmul.mubr.bf16.vlgmr.msra.gmra.mrb[48].mxu1 %v15439_v28 }
 0x354   :  { %4862 = vmatpush1.bf16.msra.mxu0 %v13679_v29  ;;  %4903 = vmatpush1.bf16.msra.mxu1 %v13682_v33  ;;  %v13774_v29 = vld [vmem:[#allocation6 + $0xecc] ss:$48 sps:$4 sm:$0xff]   ;;  %v13769_v33 = vld [vmem:[#allocation6 + $0xec0] ss:$48 sps:$4 sm:$0xff]  }
 0x355   :  { %4863 = vmatprep.subr.bf16.mxu0 %v13687_v49  ;;  %4904 = vmatprep.subr.bf16.mxu1 %v13690_v34  ;;  %v13772_v49 = vld [vmem:[#allocation6 + $0xec8] ss:$48 sps:$4 sm:$0xff]   ;;  %v13777_v34 = vld [vmem:[#allocation6 + $0xf04] ss:$48 sps:$4 sm:$0xff]  }
 0x356   :  { %4893 = vmatprep.mubr.bf16.mxu0 %v15019_v0  ;;  %4934 = vmatprep.mubr.bf16.mxu1 %v15019_v0 }
 0x358   :  { %4864 = vmatpush1.bf16.msra.mxu0 %v13685_v52  ;;  %4905 = vmatpush1.bf16.msra.mxu1 %v13688_v35  ;;  %v13780_v52 = vld [vmem:[#allocation6 + $0xf0c] ss:$48 sps:$4 sm:$0xff]   ;;  %v13775_v35 = vld [vmem:[#allocation6 + $0xf00] ss:$48 sps:$4 sm:$0xff]  }
 0x359   :  { %4865 = vmatprep.subr.bf16.mxu0 %v13693_v6  ;;  %4906 = vmatprep.subr.bf16.mxu1 %v13696_v7  ;;  %v13778_v6 = vld [vmem:[#allocation6 + $0xf08] ss:$48 sps:$4 sm:$0xff]   ;;  %v13783_v7 = vld [vmem:[#allocation6 + $0xf64] ss:$48 sps:$4 sm:$0xff]  }
 0x35c   :  { %4866 = vmatpush1.bf16.msra.mxu0 %v13691_v9  ;;  %4907 = vmatpush1.bf16.msra.mxu1 %v13694_v36  ;;  %v13786_v9 = vld [vmem:[#allocation6 + $0xf6c] ss:$48 sps:$4 sm:$0xff]   ;;  %v13781_v36 = vld [vmem:[#allocation6 + $0xf60] ss:$48 sps:$4 sm:$0xff]  }
 0x35d   :  { %4867 = vmatprep.subr.bf16.mxu0 %v13699_v38  ;;  %4908 = vmatprep.subr.bf16.mxu1 %v13702_v39  ;;  %v13784_v38 = vld [vmem:[#allocation6 + $0xf68] ss:$48 sps:$4 sm:$0xff]   ;;  %v13789_v39 = vld [vmem:[#allocation6 + $0xfc4] ss:$48 sps:$4 sm:$0xff]  }
 0x360   :  { %4868 = vmatpush1.bf16.msra.mxu0 %v13697_v40  ;;  %4909 = vmatpush1.bf16.msra.mxu1 %v13700_v41  ;;  %v13792_v40 = vld [vmem:[#allocation6 + $0xfcc] ss:$48 sps:$4 sm:$0xff]   ;;  %v13787_v41 = vld [vmem:[#allocation6 + $0xfc0] ss:$48 sps:$4 sm:$0xff]  }
 0x361   :  { %4869 = vmatprep.subr.bf16.mxu0 %v13705_v43  ;;  %4910 = vmatprep.subr.bf16.mxu1 %v13708_v48  ;;  %v13790_v43 = vld [vmem:[#allocation6 + $0xfc8] ss:$48 sps:$4 sm:$0xff]   ;;  %v13795_v48 = vld [vmem:[#allocation6 + $0x1024] ss:$48 sps:$4 sm:$0xff]  }
 0x364   :  { %4870 = vmatpush1.bf16.msra.mxu0 %v13703_v51  ;;  %4911 = vmatpush1.bf16.msra.mxu1 %v13706_v54  ;;  %v13798_v51 = vld [vmem:[#allocation6 + $0x102c] ss:$48 sps:$4 sm:$0xff]   ;;  %v13793_v54 = vld [vmem:[#allocation6 + $0x1020] ss:$48 sps:$4 sm:$0xff]  }
 0x365   :  { %4871 = vmatprep.subr.bf16.mxu0 %v13711_v55  ;;  %4912 = vmatprep.subr.bf16.mxu1 %v13714_v57  ;;  %v13796_v55 = vld [vmem:[#allocation6 + $0x1028] ss:$48 sps:$4 sm:$0xff]   ;;  %v13801_v57 = vld [vmem:[#allocation6 + $0x1084] ss:$48 sps:$4 sm:$0xff]  }
 0x368   :  { %4872 = vmatpush1.bf16.msra.mxu0 %v13709_v13  ;;  %4913 = vmatpush1.bf16.msra.mxu1 %v13712_v56  ;;  %v13804_v13 = vld [vmem:[#allocation6 + $0x108c] ss:$48 sps:$4 sm:$0xff]   ;;  %v13799_v56 = vld [vmem:[#allocation6 + $0x1080] ss:$48 sps:$4 sm:$0xff]  }
 0x369   :  { %4873 = vmatprep.subr.bf16.mxu0 %v13717_v58  ;;  %4914 = vmatprep.subr.bf16.mxu1 %v13720_v12  ;;  %v13802_v58 = vld [vmem:[#allocation6 + $0x1088] ss:$48 sps:$4 sm:$0xff]   ;;  %v13807_v12 = vld [vmem:[#allocation6 + $0x10e4] ss:$48 sps:$4 sm:$0xff]  }
 0x36c   :  { %4874 = vmatpush1.bf16.msra.mxu0 %v13715_v14  ;;  %4915 = vmatpush1.bf16.msra.mxu1 %v13718_v61  ;;  %v13810_v14 = vld [vmem:[#allocation6 + $0x10ec] ss:$48 sps:$4 sm:$0xff]   ;;  %v13805_v61 = vld [vmem:[#allocation6 + $0x10e0] ss:$48 sps:$4 sm:$0xff]  }
 0x36d   :  { %4875 = vmatprep.subr.bf16.mxu0 %v13723_v37  ;;  %4916 = vmatprep.subr.bf16.mxu1 %v13726_v63  ;;  %v13808_v37 = vld [vmem:[#allocation6 + $0x10e8] ss:$48 sps:$4 sm:$0xff]   ;;  %v13813_v63 = vld [vmem:[#allocation6 + $0x1144] ss:$48 sps:$4 sm:$0xff]  }
 0x370   :  { %4876 = vmatpush1.bf16.msra.mxu0 %v13721_v3  ;;  %4917 = vmatpush1.bf16.msra.mxu1 %v13724_v46  ;;  %v13816_v3 = vld [vmem:[#allocation6 + $0x114c] ss:$48 sps:$4 sm:$0xff]   ;;  %v13811_v46 = vld [vmem:[#allocation6 + $0x1140] ss:$48 sps:$4 sm:$0xff]  }
 0x371   :  { %4943 = vmatprep.subr.bf16.mxu0 %v13729_v5  ;;  %4984 = vmatprep.subr.bf16.mxu1 %v13732_v16  ;;  %v13814_v5 = vld [vmem:[#allocation6 + $0x1148] ss:$48 sps:$4 sm:$0xff]   ;;  %v13819_v16 = vld [vmem:[#allocation6 + $0x11a4] ss:$48 sps:$4 sm:$0xff]  }
 0x373   :  { %4894 = vmatmul.mubr.bf16.vlgmr.msra.gmra.mrb[52].mxu0 %v15439_v28  ;;  %4935 = vmatmul.mubr.bf16.vlgmr.msra.gmra.mrb[52].mxu1 %v15439_v28 }
 0x374   :  { %4944 = vmatpush1.bf16.msra.mxu0 %v13727_v17  ;;  %4985 = vmatpush1.bf16.msra.mxu1 %v13730_v19  ;;  %v13822_v17 = vld [vmem:[#allocation6 + $0x11ac] ss:$48 sps:$4 sm:$0xff]   ;;  %v13817_v19 = vld [vmem:[#allocation6 + $0x11a0] ss:$48 sps:$4 sm:$0xff]  }
 0x375   :  { %4945 = vmatprep.subr.bf16.mxu0 %v13735_v59  ;;  %4986 = vmatprep.subr.bf16.mxu1 %v13738_v60  ;;  %v13820_v59 = vld [vmem:[#allocation6 + $0x11a8] ss:$48 sps:$4 sm:$0xff]   ;;  %v13825_v60 = vld [vmem:[#allocation6 + $0xf14] ss:$48 sps:$4 sm:$0xff]  }
 0x376   :  { %4975 = vmatprep.mubr.bf16.mxu0 %v15019_v0  ;;  %5016 = vmatprep.mubr.bf16.mxu1 %v15019_v0 }
 0x378   :  { %4946 = vmatpush1.bf16.msra.mxu0 %v13733_v62  ;;  %4987 = vmatpush1.bf16.msra.mxu1 %v13736_v8  ;;  %v13828_v62 = vld [vmem:[#allocation6 + $0xf1c] ss:$48 sps:$4 sm:$0xff]   ;;  %v13823_v8 = vld [vmem:[#allocation6 + $0xf10] ss:$48 sps:$4 sm:$0xff]  }
 0x379   :  { %4947 = vmatprep.subr.bf16.mxu0 %v13741_v11  ;;  %4988 = vmatprep.subr.bf16.mxu1 %v13744_v42  ;;  %v13826_v11 = vld [vmem:[#allocation6 + $0xf18] ss:$48 sps:$4 sm:$0xff]   ;;  %v15528_v42 = vrot.slane %v15439_v28, 4 }
 0x37c   :  { %4948 = vmatpush1.bf16.msra.mxu0 %v13739_v45  ;;  %4989 = vmatpush1.bf16.msra.mxu1 %v13742_v10  ;;  %v13831_v45 = vld [vmem:[#allocation6 + $0xf74] ss:$48 sps:$4 sm:$0xff]   ;;  %v13834_v10 = vld [vmem:[#allocation6 + $0xf7c] ss:$48 sps:$4 sm:$0xff]  }
 0x37d   :  { %4949 = vmatprep.subr.bf16.mxu0 %v13747_v15  ;;  %4990 = vmatprep.subr.bf16.mxu1 %v13750_v18  ;;  %v13829_v15 = vld [vmem:[#allocation6 + $0xf70] ss:$48 sps:$4 sm:$0xff]   ;;  %v13832_v18 = vld [vmem:[#allocation6 + $0xf78] ss:$48 sps:$4 sm:$0xff]  }
 0x380   :  { %4950 = vmatpush1.bf16.msra.mxu0 %v13745_v20  ;;  %4991 = vmatpush1.bf16.msra.mxu1 %v13748_v23  ;;  %v13837_v20 = vld [vmem:[#allocation6 + $0xfd4] ss:$48 sps:$4 sm:$0xff]   ;;  %v13840_v23 = vld [vmem:[#allocation6 + $0xfdc] ss:$48 sps:$4 sm:$0xff]  }
 0x381   :  { %4951 = vmatprep.subr.bf16.mxu0 %v13753_v44  ;;  %4992 = vmatprep.subr.bf16.mxu1 %v13756_v47  ;;  %v13838_v44 = vld [vmem:[#allocation6 + $0xfd8] ss:$48 sps:$4 sm:$0xff]   ;;  %v13843_v47 = vld [vmem:[#allocation6 + $0x1034] ss:$48 sps:$4 sm:$0xff]  }
 0x384   :  { %4952 = vmatpush1.bf16.msra.mxu0 %v13751_v30  ;;  %4993 = vmatpush1.bf16.msra.mxu1 %v13754_v31  ;;  %v13846_v30 = vld [vmem:[#allocation6 + $0x103c] ss:$48 sps:$4 sm:$0xff]   ;;  %v13841_v31 = vld [vmem:[#allocation6 + $0x1030] ss:$48 sps:$4 sm:$0xff]  }
 0x385   :  { %4953 = vmatprep.subr.bf16.mxu0 %v13759_v21  ;;  %4994 = vmatprep.subr.bf16.mxu1 %v13762_v22  ;;  %v13844_v21 = vld [vmem:[#allocation6 + $0x1038] ss:$48 sps:$4 sm:$0xff]   ;;  %v13849_v22 = vld [vmem:[#allocation6 + $0x1094] ss:$48 sps:$4 sm:$0xff]  }
 0x388   :  { %4954 = vmatpush1.bf16.msra.mxu0 %v13757_v24  ;;  %4995 = vmatpush1.bf16.msra.mxu1 %v13760_v32  ;;  %v13852_v24 = vld [vmem:[#allocation6 + $0x109c] ss:$48 sps:$4 sm:$0xff]   ;;  %v13847_v32 = vld [vmem:[#allocation6 + $0x1090] ss:$48 sps:$4 sm:$0xff]  }
 0x389   :  { %4955 = vmatprep.subr.bf16.mxu0 %v13765_v1  ;;  %4996 = vmatprep.subr.bf16.mxu1 %v13768_v2  ;;  %v13850_v1 = vld [vmem:[#allocation6 + $0x1098] ss:$48 sps:$4 sm:$0xff]   ;;  %v13855_v2 = vld [vmem:[#allocation6 + $0x10f4] ss:$48 sps:$4 sm:$0xff]  }
 0x38c   :  { %4956 = vmatpush1.bf16.msra.mxu0 %v13763_v4  ;;  %4997 = vmatpush1.bf16.msra.mxu1 %v13766_v26  ;;  %v13858_v4 = vld [vmem:[#allocation6 + $0x10fc] ss:$48 sps:$4 sm:$0xff]   ;;  %v13853_v26 = vld [vmem:[#allocation6 + $0x10f0] ss:$48 sps:$4 sm:$0xff]  }
 0x38d   :  { %4957 = vmatprep.subr.bf16.mxu0 %v13771_v27  ;;  %4998 = vmatprep.subr.bf16.mxu1 %v13774_v29  ;;  %v13856_v27 = vld [vmem:[#allocation6 + $0x10f8] ss:$48 sps:$4 sm:$0xff]   ;;  %v13861_v29 = vld [vmem:[#allocation6 + $0x1154] ss:$48 sps:$4 sm:$0xff]  }
 0x390   :  { %4958 = vmatpush1.bf16.msra.mxu0 %v13769_v33  ;;  %4999 = vmatpush1.bf16.msra.mxu1 %v13772_v49  ;;  %v13864_v33 = vld [vmem:[#allocation6 + $0x115c] ss:$48 sps:$4 sm:$0xff]   ;;  %v13859_v49 = vld [vmem:[#allocation6 + $0x1150] ss:$48 sps:$4 sm:$0xff]  }
 0x391   :  { %5617 = vmatprep.subr.bf16.mxu0 %v13777_v34  ;;  %5658 = vmatprep.subr.bf16.mxu1 %v13780_v52  ;;  %v13862_v34 = vld [vmem:[#allocation6 + $0x1158] ss:$48 sps:$4 sm:$0xff]   ;;  %v13867_v52 = vld [vmem:[#allocation6 + $0x11b4] ss:$48 sps:$4 sm:$0xff]  }
 0x393   :  { %4976 = vmatmul.mubr.bf16.vlgmr.msra.gmra.mrb[56].mxu0 %v15439_v28  ;;  %5017 = vmatmul.mubr.bf16.vlgmr.msra.gmra.mrb[56].mxu1 %v15439_v28  ;;  %v13835_v28 = vld [vmem:[#allocation6 + $0xfd0] ss:$48 sps:$4 sm:$0xff]  }
 0x394   :  { %5618 = vmatpush1.bf16.msra.mxu0 %v13775_v35  ;;  %5659 = vmatpush1.bf16.msra.mxu1 %v13778_v6  ;;  %v13870_v35 = vld [vmem:[#allocation6 + $0x11bc] ss:$48 sps:$4 sm:$0xff]   ;;  %v13865_v6 = vld [vmem:[#allocation6 + $0x11b0] ss:$48 sps:$4 sm:$0xff]  }
 0x395   :  { %5619 = vmatprep.subr.bf16.mxu0 %v13783_v7  ;;  %5660 = vmatprep.subr.bf16.mxu1 %v13786_v9  ;;  %v13868_v7 = vld [vmem:[#allocation6 + $0x11b8] ss:$48 sps:$4 sm:$0xff]   ;;  %v13873_v9 = vld [vmem:[#allocation6 + $0xf24] ss:$48 sps:$4 sm:$0xff]  }
 0x396   :  { %5649 = vmatprep.mubr.bf16.mxu0 %v15019_v0  ;;  %5690 = vmatprep.mubr.bf16.mxu1 %v15019_v0 }
 0x398   :  { %5620 = vmatpush1.bf16.msra.mxu0 %v13781_v36  ;;  %5661 = vmatpush1.bf16.msra.mxu1 %v13784_v38  ;;  %v13876_v36 = vld [vmem:[#allocation6 + $0xf2c] ss:$48 sps:$4 sm:$0xff]   ;;  %v13871_v38 = vld [vmem:[#allocation6 + $0xf20] ss:$48 sps:$4 sm:$0xff]  }
 0x399   :  { %5621 = vmatprep.subr.bf16.mxu0 %v13789_v39  ;;  %5662 = vmatprep.subr.bf16.mxu1 %v13792_v40  ;;  %v13874_v39 = vld [vmem:[#allocation6 + $0xf28] ss:$48 sps:$4 sm:$0xff]   ;;  %v13879_v40 = vld [vmem:[#allocation6 + $0xf84] ss:$48 sps:$4 sm:$0xff]  }
 0x39c   :  { %5622 = vmatpush1.bf16.msra.mxu0 %v13787_v41  ;;  %5663 = vmatpush1.bf16.msra.mxu1 %v13790_v43  ;;  %v13882_v41 = vld [vmem:[#allocation6 + $0xf8c] ss:$48 sps:$4 sm:$0xff]   ;;  %v13877_v43 = vld [vmem:[#allocation6 + $0xf80] ss:$48 sps:$4 sm:$0xff]  }
 0x39d   :  { %5623 = vmatprep.subr.bf16.mxu0 %v13795_v48  ;;  %5664 = vmatprep.subr.bf16.mxu1 %v13798_v51  ;;  %v13880_v48 = vld [vmem:[#allocation6 + $0xf88] ss:$48 sps:$4 sm:$0xff]   ;;  %v13885_v51 = vld [vmem:[#allocation6 + $0xfe4] ss:$48 sps:$4 sm:$0xff]  }
 0x3a0   :  { %5624 = vmatpush1.bf16.msra.mxu0 %v13793_v54  ;;  %5665 = vmatpush1.bf16.msra.mxu1 %v13796_v55  ;;  %v13888_v54 = vld [vmem:[#allocation6 + $0xfec] ss:$48 sps:$4 sm:$0xff]   ;;  %v13883_v55 = vld [vmem:[#allocation6 + $0xfe0] ss:$48 sps:$4 sm:$0xff]  }
 0x3a1   :  { %5625 = vmatprep.subr.bf16.mxu0 %v13801_v57  ;;  %5666 = vmatprep.subr.bf16.mxu1 %v13804_v13  ;;  %v13886_v57 = vld [vmem:[#allocation6 + $0xfe8] ss:$48 sps:$4 sm:$0xff]   ;;  %v13891_v13 = vld [vmem:[#allocation6 + $0x1044] ss:$48 sps:$4 sm:$0xff]  }
 0x3a4   :  { %5626 = vmatpush1.bf16.msra.mxu0 %v13799_v56  ;;  %5667 = vmatpush1.bf16.msra.mxu1 %v13802_v58  ;;  %v13894_v56 = vld [vmem:[#allocation6 + $0x104c] ss:$48 sps:$4 sm:$0xff]   ;;  %v13889_v58 = vld [vmem:[#allocation6 + $0x1040] ss:$48 sps:$4 sm:$0xff]  }
 0x3a5   :  { %5627 = vmatprep.subr.bf16.mxu0 %v13807_v12  ;;  %5668 = vmatprep.subr.bf16.mxu1 %v13810_v14  ;;  %v13892_v12 = vld [vmem:[#allocation6 + $0x1048] ss:$48 sps:$4 sm:$0xff]   ;;  %v13897_v14 = vld [vmem:[#allocation6 + $0x10a4] ss:$48 sps:$4 sm:$0xff]  }
 0x3a8   :  { %5628 = vmatpush1.bf16.msra.mxu0 %v13805_v61  ;;  %5669 = vmatpush1.bf16.msra.mxu1 %v13808_v37  ;;  %v13900_v61 = vld [vmem:[#allocation6 + $0x10ac] ss:$48 sps:$4 sm:$0xff]   ;;  %v13895_v37 = vld [vmem:[#allocation6 + $0x10a0] ss:$48 sps:$4 sm:$0xff]  }
 0x3a9   :  { %5629 = vmatprep.subr.bf16.mxu0 %v13813_v63  ;;  %5670 = vmatprep.subr.bf16.mxu1 %v13816_v3  ;;  %v13898_v63 = vld [vmem:[#allocation6 + $0x10a8] ss:$48 sps:$4 sm:$0xff]   ;;  %v13903_v3 = vld [vmem:[#allocation6 + $0x1104] ss:$48 sps:$4 sm:$0xff]  }
 0x3ac   :  { %5630 = vmatpush1.bf16.msra.mxu0 %v13811_v46  ;;  %5671 = vmatpush1.bf16.msra.mxu1 %v13814_v5  ;;  %v13906_v46 = vld [vmem:[#allocation6 + $0x110c] ss:$48 sps:$4 sm:$0xff]   ;;  %v13901_v5 = vld [vmem:[#allocation6 + $0x1100] ss:$48 sps:$4 sm:$0xff]  }
 0x3ad   :  { %5631 = vmatprep.subr.bf16.mxu0 %v13819_v16  ;;  %5672 = vmatprep.subr.bf16.mxu1 %v13822_v17  ;;  %v13904_v16 = vld [vmem:[#allocation6 + $0x1108] ss:$48 sps:$4 sm:$0xff]   ;;  %v13909_v17 = vld [vmem:[#allocation6 + $0x1164] ss:$48 sps:$4 sm:$0xff]  }
 0x3b0   :  { %5632 = vmatpush1.bf16.msra.mxu0 %v13817_v19  ;;  %5673 = vmatpush1.bf16.msra.mxu1 %v13820_v59  ;;  %v13912_v19 = vld [vmem:[#allocation6 + $0x116c] ss:$48 sps:$4 sm:$0xff]   ;;  %v13907_v59 = vld [vmem:[#allocation6 + $0x1160] ss:$48 sps:$4 sm:$0xff]  }
 0x3b1   :  { %5699 = vmatprep.subr.bf16.mxu0 %v13825_v60  ;;  %5740 = vmatprep.subr.bf16.mxu1 %v13828_v62  ;;  %v13910_v60 = vld [vmem:[#allocation6 + $0x1168] ss:$48 sps:$4 sm:$0xff]   ;;  %v13915_v62 = vld [vmem:[#allocation6 + $0x11c4] ss:$48 sps:$4 sm:$0xff]  }
 0x3b3   :  { %5650 = vmatmul.mubr.bf16.vlgmr.msra.gmra.mrb[48].mxu0 %v15528_v42  ;;  %5691 = vmatmul.mubr.bf16.vlgmr.msra.gmra.mrb[48].mxu1 %v15528_v42 }
 0x3b4   :  { %5700 = vmatpush1.bf16.msra.mxu0 %v13823_v8  ;;  %5741 = vmatpush1.bf16.msra.mxu1 %v13826_v11  ;;  %v13918_v8 = vld [vmem:[#allocation6 + $0x11cc] ss:$48 sps:$4 sm:$0xff]   ;;  %v13913_v11 = vld [vmem:[#allocation6 + $0x11c0] ss:$48 sps:$4 sm:$0xff]  }
 0x3b5   :  { %5701 = vmatprep.subr.bf16.mxu0 %v13831_v45  ;;  %5742 = vmatprep.subr.bf16.mxu1 %v13834_v10  ;;  %v13916_v45 = vld [vmem:[#allocation6 + $0x11c8] ss:$48 sps:$4 sm:$0xff]   ;;  %v13921_v10 = vld [vmem:[#allocation6 + $0x1204] ss:$48 sps:$4 sm:$0xff]  }
 0x3b6   :  { %5731 = vmatprep.mubr.bf16.mxu0 %v15019_v0  ;;  %5772 = vmatprep.mubr.bf16.mxu1 %v15019_v0 }
 0x3b8   :  { %5702 = vmatpush1.bf16.msra.mxu0 %v13829_v15  ;;  %5743 = vmatpush1.bf16.msra.mxu1 %v13832_v18  ;;  %v13924_v15 = vld [vmem:[#allocation6 + $0x120c] ss:$48 sps:$4 sm:$0xff]   ;;  %v13919_v18 = vld [vmem:[#allocation6 + $0x1200] ss:$48 sps:$4 sm:$0xff]  }
 0x3b9   :  { %5703 = vmatprep.subr.bf16.mxu0 %v13837_v20  ;;  %5744 = vmatprep.subr.bf16.mxu1 %v13840_v23  ;;  %v13922_v20 = vld [vmem:[#allocation6 + $0x1208] ss:$48 sps:$4 sm:$0xff]   ;;  %v13927_v23 = vld [vmem:[#allocation6 + $0x1264] ss:$48 sps:$4 sm:$0xff]  }
 0x3bc   :  { %5704 = vmatpush1.bf16.msra.mxu0 %v13835_v28  ;;  %5745 = vmatpush1.bf16.msra.mxu1 %v13838_v44  ;;  %v13930_v28 = vld [vmem:[#allocation6 + $0x126c] ss:$48 sps:$4 sm:$0xff]   ;;  %v13925_v44 = vld [vmem:[#allocation6 + $0x1260] ss:$48 sps:$4 sm:$0xff]  }
 0x3bd   :  { %5705 = vmatprep.subr.bf16.mxu0 %v13843_v47  ;;  %5746 = vmatprep.subr.bf16.mxu1 %v13846_v30  ;;  %v13928_v47 = vld [vmem:[#allocation6 + $0x1268] ss:$48 sps:$4 sm:$0xff]   ;;  %v13933_v30 = vld [vmem:[#allocation6 + $0x12c4] ss:$48 sps:$4 sm:$0xff]  }
 0x3c0   :  { %5706 = vmatpush1.bf16.msra.mxu0 %v13841_v31  ;;  %5747 = vmatpush1.bf16.msra.mxu1 %v13844_v21  ;;  %v13936_v31 = vld [vmem:[#allocation6 + $0x12cc] ss:$48 sps:$4 sm:$0xff]   ;;  %v13931_v21 = vld [vmem:[#allocation6 + $0x12c0] ss:$48 sps:$4 sm:$0xff]  }
 0x3c1   :  { %5707 = vmatprep.subr.bf16.mxu0 %v13849_v22  ;;  %5748 = vmatprep.subr.bf16.mxu1 %v13852_v24  ;;  %v13934_v22 = vld [vmem:[#allocation6 + $0x12c8] ss:$48 sps:$4 sm:$0xff]   ;;  %v13939_v24 = vld [vmem:[#allocation6 + $0x1324] ss:$48 sps:$4 sm:$0xff]  }
 0x3c4   :  { %5708 = vmatpush1.bf16.msra.mxu0 %v13847_v32  ;;  %5749 = vmatpush1.bf16.msra.mxu1 %v13850_v1  ;;  %v13937_v32 = vld [vmem:[#allocation6 + $0x1320] ss:$48 sps:$4 sm:$0xff]   ;;  %v13940_v1 = vld [vmem:[#allocation6 + $0x1328] ss:$48 sps:$4 sm:$0xff]  }
 0x3c5   :  { %5709 = vmatprep.subr.bf16.mxu0 %v13855_v2  ;;  %5750 = vmatprep.subr.bf16.mxu1 %v13858_v4  ;;  %v13945_v2 = vld [vmem:[#allocation6 + $0x1384] ss:$48 sps:$4 sm:$0xff]   ;;  %v13948_v4 = vld [vmem:[#allocation6 + $0x138c] ss:$48 sps:$4 sm:$0xff]  }
 0x3c8   :  { %5710 = vmatpush1.bf16.msra.mxu0 %v13853_v26  ;;  %5751 = vmatpush1.bf16.msra.mxu1 %v13856_v27  ;;  %v13943_v26 = vld [vmem:[#allocation6 + $0x1380] ss:$48 sps:$4 sm:$0xff]   ;;  %v13946_v27 = vld [vmem:[#allocation6 + $0x1388] ss:$48 sps:$4 sm:$0xff]  }
 0x3c9   :  { %5711 = vmatprep.subr.bf16.mxu0 %v13861_v29  ;;  %5752 = vmatprep.subr.bf16.mxu1 %v13864_v33  ;;  %v13951_v29 = vld [vmem:[#allocation6 + $0x13e4] ss:$48 sps:$4 sm:$0xff]   ;;  %v13954_v33 = vld [vmem:[#allocation6 + $0x13ec] ss:$48 sps:$4 sm:$0xff]  }
 0x3cc   :  { %5712 = vmatpush1.bf16.msra.mxu0 %v13859_v49  ;;  %5753 = vmatpush1.bf16.msra.mxu1 %v13862_v34  ;;  %v13949_v49 = vld [vmem:[#allocation6 + $0x13e0] ss:$48 sps:$4 sm:$0xff]   ;;  %v13952_v34 = vld [vmem:[#allocation6 + $0x13e8] ss:$48 sps:$4 sm:$0xff]  }
 0x3cd   :  { %5713 = vmatprep.subr.bf16.mxu0 %v13867_v52  ;;  %5754 = vmatprep.subr.bf16.mxu1 %v13870_v35  ;;  %v13957_v52 = vld [vmem:[#allocation6 + $0x1444] ss:$48 sps:$4 sm:$0xff]   ;;  %v13960_v35 = vld [vmem:[#allocation6 + $0x144c] ss:$48 sps:$4 sm:$0xff]  }
 0x3d0   :  { %5714 = vmatpush1.bf16.msra.mxu0 %v13865_v6  ;;  %5755 = vmatpush1.bf16.msra.mxu1 %v13868_v7  ;;  %v13955_v6 = vld [vmem:[#allocation6 + $0x1440] ss:$48 sps:$4 sm:$0xff]   ;;  %v13958_v7 = vld [vmem:[#allocation6 + $0x1448] ss:$48 sps:$4 sm:$0xff]  }
 0x3d1   :  { %5781 = vmatprep.subr.bf16.mxu0 %v13873_v9  ;;  %5822 = vmatprep.subr.bf16.mxu1 %v13876_v36  ;;  %v13963_v9 = vld [vmem:[#allocation6 + $0x14a4] ss:$48 sps:$4 sm:$0xff]   ;;  %v13966_v36 = vld [vmem:[#allocation6 + $0x14ac] ss:$48 sps:$4 sm:$0xff]  }
 0x3d3   :  { %5732 = vmatmul.mubr.bf16.vlgmr.msra.gmra.mrb[52].mxu0 %v15528_v42  ;;  %5773 = vmatmul.mubr.bf16.vlgmr.msra.gmra.mrb[52].mxu1 %v15528_v42 }
 0x3d4   :  { %5782 = vmatpush1.bf16.msra.mxu0 %v13871_v38  ;;  %5823 = vmatpush1.bf16.msra.mxu1 %v13874_v39  ;;  %v13961_v38 = vld [vmem:[#allocation6 + $0x14a0] ss:$48 sps:$4 sm:$0xff]   ;;  %v13964_v39 = vld [vmem:[#allocation6 + $0x14a8] ss:$48 sps:$4 sm:$0xff]  }
 0x3d5   :  { %5783 = vmatprep.subr.bf16.mxu0 %v13879_v40  ;;  %5824 = vmatprep.subr.bf16.mxu1 %v13882_v41  ;;  %v13969_v40 = vld [vmem:[#allocation6 + $0x1214] ss:$48 sps:$4 sm:$0xff]   ;;  %v13972_v41 = vld [vmem:[#allocation6 + $0x121c] ss:$48 sps:$4 sm:$0xff]  }
 0x3d6   :  { %5813 = vmatprep.mubr.bf16.mxu0 %v15019_v0  ;;  %5854 = vmatprep.mubr.bf16.mxu1 %v15019_v0 }
 0x3d8   :  { %5784 = vmatpush1.bf16.msra.mxu0 %v13877_v43  ;;  %5825 = vmatpush1.bf16.msra.mxu1 %v13880_v48  ;;  %v13967_v43 = vld [vmem:[#allocation6 + $0x1210] ss:$48 sps:$4 sm:$0xff]   ;;  %v13970_v48 = vld [vmem:[#allocation6 + $0x1218] ss:$48 sps:$4 sm:$0xff]  }
 0x3d9   :  { %5785 = vmatprep.subr.bf16.mxu0 %v13885_v51  ;;  %5826 = vmatprep.subr.bf16.mxu1 %v13888_v54  ;;  %v13975_v51 = vld [vmem:[#allocation6 + $0x1274] ss:$48 sps:$4 sm:$0xff]   ;;  %v13978_v54 = vld [vmem:[#allocation6 + $0x127c] ss:$48 sps:$4 sm:$0xff]  }
 0x3dc   :  { %5786 = vmatpush1.bf16.msra.mxu0 %v13883_v55  ;;  %5827 = vmatpush1.bf16.msra.mxu1 %v13886_v57  ;;  %v13973_v55 = vld [vmem:[#allocation6 + $0x1270] ss:$48 sps:$4 sm:$0xff]   ;;  %v13976_v57 = vld [vmem:[#allocation6 + $0x1278] ss:$48 sps:$4 sm:$0xff]  }
 0x3dd   :  { %5787 = vmatprep.subr.bf16.mxu0 %v13891_v13  ;;  %5828 = vmatprep.subr.bf16.mxu1 %v13894_v56  ;;  %v13981_v13 = vld [vmem:[#allocation6 + $0x12d4] ss:$48 sps:$4 sm:$0xff]   ;;  %v13984_v56 = vld [vmem:[#allocation6 + $0x12dc] ss:$48 sps:$4 sm:$0xff]  }
 0x3e0   :  { %5788 = vmatpush1.bf16.msra.mxu0 %v13889_v58  ;;  %5829 = vmatpush1.bf16.msra.mxu1 %v13892_v12  ;;  %v13979_v58 = vld [vmem:[#allocation6 + $0x12d0] ss:$48 sps:$4 sm:$0xff]   ;;  %v13982_v12 = vld [vmem:[#allocation6 + $0x12d8] ss:$48 sps:$4 sm:$0xff]  }
 0x3e1   :  { %5789 = vmatprep.subr.bf16.mxu0 %v13897_v14  ;;  %5830 = vmatprep.subr.bf16.mxu1 %v13900_v61  ;;  %v13987_v14 = vld [vmem:[#allocation6 + $0x1334] ss:$48 sps:$4 sm:$0xff]   ;;  %v13990_v61 = vld [vmem:[#allocation6 + $0x133c] ss:$48 sps:$4 sm:$0xff]  }
 0x3e4   :  { %5790 = vmatpush1.bf16.msra.mxu0 %v13895_v37  ;;  %5831 = vmatpush1.bf16.msra.mxu1 %v13898_v63  ;;  %v13985_v37 = vld [vmem:[#allocation6 + $0x1330] ss:$48 sps:$4 sm:$0xff]   ;;  %v13988_v63 = vld [vmem:[#allocation6 + $0x1338] ss:$48 sps:$4 sm:$0xff]  }
 0x3e5   :  { %5791 = vmatprep.subr.bf16.mxu0 %v13903_v3  ;;  %5832 = vmatprep.subr.bf16.mxu1 %v13906_v46  ;;  %v13993_v3 = vld [vmem:[#allocation6 + $0x1394] ss:$48 sps:$4 sm:$0xff]   ;;  %v13996_v46 = vld [vmem:[#allocation6 + $0x139c] ss:$48 sps:$4 sm:$0xff]  }
 0x3e8   :  { %5792 = vmatpush1.bf16.msra.mxu0 %v13901_v5  ;;  %5833 = vmatpush1.bf16.msra.mxu1 %v13904_v16  ;;  %v13991_v5 = vld [vmem:[#allocation6 + $0x1390] ss:$48 sps:$4 sm:$0xff]   ;;  %v13994_v16 = vld [vmem:[#allocation6 + $0x1398] ss:$48 sps:$4 sm:$0xff]  }
 0x3e9   :  { %5793 = vmatprep.subr.bf16.mxu0 %v13909_v17  ;;  %5834 = vmatprep.subr.bf16.mxu1 %v13912_v19  ;;  %v13999_v17 = vld [vmem:[#allocation6 + $0x13f4] ss:$48 sps:$4 sm:$0xff]   ;;  %v14002_v19 = vld [vmem:[#allocation6 + $0x13fc] ss:$48 sps:$4 sm:$0xff]  }
 0x3ec   :  { %5794 = vmatpush1.bf16.msra.mxu0 %v13907_v59  ;;  %5835 = vmatpush1.bf16.msra.mxu1 %v13910_v60  ;;  %v13997_v59 = vld [vmem:[#allocation6 + $0x13f0] ss:$48 sps:$4 sm:$0xff]   ;;  %v14000_v60 = vld [vmem:[#allocation6 + $0x13f8] ss:$48 sps:$4 sm:$0xff]  }
 0x3ed   :  { %5795 = vmatprep.subr.bf16.mxu0 %v13915_v62  ;;  %5836 = vmatprep.subr.bf16.mxu1 %v13918_v8  ;;  %v14005_v62 = vld [vmem:[#allocation6 + $0x1454] ss:$48 sps:$4 sm:$0xff]   ;;  %v14008_v8 = vld [vmem:[#allocation6 + $0x145c] ss:$48 sps:$4 sm:$0xff]  }
 0x3f0   :  { %5796 = vmatpush1.bf16.msra.mxu0 %v13913_v11  ;;  %5837 = vmatpush1.bf16.msra.mxu1 %v13916_v45  ;;  %v14003_v11 = vld [vmem:[#allocation6 + $0x1450] ss:$48 sps:$4 sm:$0xff]   ;;  %v14006_v45 = vld [vmem:[#allocation6 + $0x1458] ss:$48 sps:$4 sm:$0xff]  }
 0x3f1   :  { %6452 = vmatprep.subr.bf16.mxu0 %v13921_v10  ;;  %6493 = vmatprep.subr.bf16.mxu1 %v13924_v15  ;;  %v14011_v10 = vld [vmem:[#allocation6 + $0x14b4] ss:$48 sps:$4 sm:$0xff]   ;;  %v14014_v15 = vld [vmem:[#allocation6 + $0x14bc] ss:$48 sps:$4 sm:$0xff]  }
 0x3f3   :  { %5814 = vmatmul.mubr.bf16.vlgmr.msra.gmra.mrb[56].mxu0 %v15528_v42  ;;  %5855 = vmatmul.mubr.bf16.vlgmr.msra.gmra.mrb[56].mxu1 %v15528_v42  ;;  %v13942_v42 = vld [vmem:[#allocation6 + $0x132c] ss:$48 sps:$4 sm:$0xff]  }
 0x3f4   :  { %6453 = vmatpush1.bf16.msra.mxu0 %v13919_v18  ;;  %6494 = vmatpush1.bf16.msra.mxu1 %v13922_v20  ;;  %v14009_v18 = vld [vmem:[#allocation6 + $0x14b0] ss:$48 sps:$4 sm:$0xff]   ;;  %v14012_v20 = vld [vmem:[#allocation6 + $0x14b8] ss:$48 sps:$4 sm:$0xff]  }
 0x3f5   :  { %6454 = vmatprep.subr.bf16.mxu0 %v13927_v23  ;;  %6495 = vmatprep.subr.bf16.mxu1 %v13930_v28  ;;  %v14017_v23 = vld [vmem:[#allocation6 + $0x1224] ss:$48 sps:$4 sm:$0xff]   ;;  %v14020_v28 = vld [vmem:[#allocation6 + $0x122c] ss:$48 sps:$4 sm:$0xff]  }
 0x3f6   :  { %6484 = vmatprep.mubr.bf16.mxu0 %v15019_v0  ;;  %6525 = vmatprep.mubr.bf16.mxu1 %v15019_v0 }
 0x3f8   :  { %6455 = vmatpush1.bf16.msra.mxu0 %v13925_v44  ;;  %6496 = vmatpush1.bf16.msra.mxu1 %v13928_v47  ;;  %v14015_v44 = vld [vmem:[#allocation6 + $0x1220] ss:$48 sps:$4 sm:$0xff]   ;;  %v14018_v47 = vld [vmem:[#allocation6 + $0x1228] ss:$48 sps:$4 sm:$0xff]  }
 0x3f9   :  { %6456 = vmatprep.subr.bf16.mxu0 %v13933_v30  ;;  %6497 = vmatprep.subr.bf16.mxu1 %v13936_v31  ;;  %v14023_v30 = vld [vmem:[#allocation6 + $0x1284] ss:$48 sps:$4 sm:$0xff]   ;;  %v14026_v31 = vld [vmem:[#allocation6 + $0x128c] ss:$48 sps:$4 sm:$0xff]  }
 0x3fc   :  { %6457 = vmatpush1.bf16.msra.mxu0 %v13931_v21  ;;  %6498 = vmatpush1.bf16.msra.mxu1 %v13934_v22  ;;  %v14021_v21 = vld [vmem:[#allocation6 + $0x1280] ss:$48 sps:$4 sm:$0xff]   ;;  %v14024_v22 = vld [vmem:[#allocation6 + $0x1288] ss:$48 sps:$4 sm:$0xff]  }
 0x3fd   :  { %6458 = vmatprep.subr.bf16.mxu0 %v13939_v24  ;;  %6499 = vmatprep.subr.bf16.mxu1 %v13942_v42  ;;  %v14029_v24 = vld [vmem:[#allocation6 + $0x12e4] ss:$48 sps:$4 sm:$0xff]   ;;  %v14032_v42 = vld [vmem:[#allocation6 + $0x12ec] ss:$48 sps:$4 sm:$0xff]  }
 0x400   :  { %6459 = vmatpush1.bf16.msra.mxu0 %v13937_v32  ;;  %6500 = vmatpush1.bf16.msra.mxu1 %v13940_v1  ;;  %v14027_v32 = vld [vmem:[#allocation6 + $0x12e0] ss:$48 sps:$4 sm:$0xff]   ;;  %v14030_v1 = vld [vmem:[#allocation6 + $0x12e8] ss:$48 sps:$4 sm:$0xff]  }
 0x401   :  { %6460 = vmatprep.subr.bf16.mxu0 %v13945_v2  ;;  %6501 = vmatprep.subr.bf16.mxu1 %v13948_v4  ;;  %v14035_v2 = vld [vmem:[#allocation6 + $0x1344] ss:$48 sps:$4 sm:$0xff]   ;;  %v14038_v4 = vld [vmem:[#allocation6 + $0x134c] ss:$48 sps:$4 sm:$0xff]  }
 0x404   :  { %6461 = vmatpush1.bf16.msra.mxu0 %v13943_v26  ;;  %6502 = vmatpush1.bf16.msra.mxu1 %v13946_v27  ;;  %v14033_v26 = vld [vmem:[#allocation6 + $0x1340] ss:$48 sps:$4 sm:$0xff]   ;;  %v14036_v27 = vld [vmem:[#allocation6 + $0x1348] ss:$48 sps:$4 sm:$0xff]  }
 0x405   :  { %6462 = vmatprep.subr.bf16.mxu0 %v13951_v29  ;;  %6503 = vmatprep.subr.bf16.mxu1 %v13954_v33  ;;  %v14041_v29 = vld [vmem:[#allocation6 + $0x13a4] ss:$48 sps:$4 sm:$0xff]   ;;  %v14044_v33 = vld [vmem:[#allocation6 + $0x13ac] ss:$48 sps:$4 sm:$0xff]  }
 0x408   :  { %6463 = vmatpush1.bf16.msra.mxu0 %v13949_v49  ;;  %6504 = vmatpush1.bf16.msra.mxu1 %v13952_v34  ;;  %v14039_v49 = vld [vmem:[#allocation6 + $0x13a0] ss:$48 sps:$4 sm:$0xff]   ;;  %v14042_v34 = vld [vmem:[#allocation6 + $0x13a8] ss:$48 sps:$4 sm:$0xff]  }
 0x409   :  { %6464 = vmatprep.subr.bf16.mxu0 %v13957_v52  ;;  %6505 = vmatprep.subr.bf16.mxu1 %v13960_v35  ;;  %v14047_v52 = vld [vmem:[#allocation6 + $0x1404] ss:$48 sps:$4 sm:$0xff]   ;;  %v14050_v35 = vld [vmem:[#allocation6 + $0x140c] ss:$48 sps:$4 sm:$0xff]  }
 0x40c   :  { %6465 = vmatpush1.bf16.msra.mxu0 %v13955_v6  ;;  %6506 = vmatpush1.bf16.msra.mxu1 %v13958_v7  ;;  %v14045_v6 = vld [vmem:[#allocation6 + $0x1400] ss:$48 sps:$4 sm:$0xff]   ;;  %v14048_v7 = vld [vmem:[#allocation6 + $0x1408] ss:$48 sps:$4 sm:$0xff]  }
 0x40d   :  { %6466 = vmatprep.subr.bf16.mxu0 %v13963_v9  ;;  %6507 = vmatprep.subr.bf16.mxu1 %v13966_v36  ;;  %v14053_v9 = vld [vmem:[#allocation6 + $0x1464] ss:$48 sps:$4 sm:$0xff]   ;;  %v14056_v36 = vld [vmem:[#allocation6 + $0x146c] ss:$48 sps:$4 sm:$0xff]  }
 0x410   :  { %6467 = vmatpush1.bf16.msra.mxu0 %v13961_v38  ;;  %6508 = vmatpush1.bf16.msra.mxu1 %v13964_v39  ;;  %v14051_v38 = vld [vmem:[#allocation6 + $0x1460] ss:$48 sps:$4 sm:$0xff]   ;;  %v14054_v39 = vld [vmem:[#allocation6 + $0x1468] ss:$48 sps:$4 sm:$0xff]  }
 0x411   :  { %6534 = vmatprep.subr.bf16.mxu0 %v13969_v40  ;;  %6575 = vmatprep.subr.bf16.mxu1 %v13972_v41  ;;  %v14059_v40 = vld [vmem:[#allocation6 + $0x14c4] ss:$48 sps:$4 sm:$0xff]   ;;  %v14062_v41 = vld [vmem:[#allocation6 + $0x14cc] ss:$48 sps:$4 sm:$0xff]  }
 0x413   :  { %6485 = vmatmul.mubr.bf16.vlgmr.msra.gmra.mrb[48].mxu0 %v15449_v53  ;;  %6526 = vmatmul.mubr.bf16.vlgmr.msra.gmra.mrb[48].mxu1 %v15449_v53 }
 0x414   :  { %6535 = vmatpush1.bf16.msra.mxu0 %v13967_v43  ;;  %6576 = vmatpush1.bf16.msra.mxu1 %v13970_v48  ;;  %v14057_v43 = vld [vmem:[#allocation6 + $0x14c0] ss:$48 sps:$4 sm:$0xff]   ;;  %v14060_v48 = vld [vmem:[#allocation6 + $0x14c8] ss:$48 sps:$4 sm:$0xff]  }
 0x415   :  { %6536 = vmatprep.subr.bf16.mxu0 %v13975_v51  ;;  %6577 = vmatprep.subr.bf16.mxu1 %v13978_v54  ;;  %v14065_v51 = vld [vmem:[#allocation6 + $0x1504] ss:$48 sps:$4 sm:$0xff]   ;;  %v14068_v54 = vld [vmem:[#allocation6 + $0x150c] ss:$48 sps:$4 sm:$0xff]  }
 0x416   :  { %6566 = vmatprep.mubr.bf16.mxu0 %v15019_v0  ;;  %6607 = vmatprep.mubr.bf16.mxu1 %v15019_v0 }
 0x418   :  { %6537 = vmatpush1.bf16.msra.mxu0 %v13973_v55  ;;  %6578 = vmatpush1.bf16.msra.mxu1 %v13976_v57  ;;  %v14063_v55 = vld [vmem:[#allocation6 + $0x1500] ss:$48 sps:$4 sm:$0xff]   ;;  %v14066_v57 = vld [vmem:[#allocation6 + $0x1508] ss:$48 sps:$4 sm:$0xff]  }
 0x419   :  { %6538 = vmatprep.subr.bf16.mxu0 %v13981_v13  ;;  %6579 = vmatprep.subr.bf16.mxu1 %v13984_v56  ;;  %v14071_v13 = vld [vmem:[#allocation6 + $0x1564] ss:$48 sps:$4 sm:$0xff]   ;;  %v14074_v56 = vld [vmem:[#allocation6 + $0x156c] ss:$48 sps:$4 sm:$0xff]  }
 0x41c   :  { %6539 = vmatpush1.bf16.msra.mxu0 %v13979_v58  ;;  %6580 = vmatpush1.bf16.msra.mxu1 %v13982_v12  ;;  %v14069_v58 = vld [vmem:[#allocation6 + $0x1560] ss:$48 sps:$4 sm:$0xff]   ;;  %v14072_v12 = vld [vmem:[#allocation6 + $0x1568] ss:$48 sps:$4 sm:$0xff]  }
 0x41d   :  { %6540 = vmatprep.subr.bf16.mxu0 %v13987_v14  ;;  %6581 = vmatprep.subr.bf16.mxu1 %v13990_v61  ;;  %v14077_v14 = vld [vmem:[#allocation6 + $0x15c4] ss:$48 sps:$4 sm:$0xff]   ;;  %v14080_v61 = vld [vmem:[#allocation6 + $0x15cc] ss:$48 sps:$4 sm:$0xff]  }
 0x420   :  { %6541 = vmatpush1.bf16.msra.mxu0 %v13985_v37  ;;  %6582 = vmatpush1.bf16.msra.mxu1 %v13988_v63  ;;  %v14075_v37 = vld [vmem:[#allocation6 + $0x15c0] ss:$48 sps:$4 sm:$0xff]   ;;  %v14078_v63 = vld [vmem:[#allocation6 + $0x15c8] ss:$48 sps:$4 sm:$0xff]  }
 0x421   :  { %6542 = vmatprep.subr.bf16.mxu0 %v13993_v3  ;;  %6583 = vmatprep.subr.bf16.mxu1 %v13996_v46  ;;  %v14083_v3 = vld [vmem:[#allocation6 + $0x1624] ss:$48 sps:$4 sm:$0xff]   ;;  %v14086_v46 = vld [vmem:[#allocation6 + $0x162c] ss:$48 sps:$4 sm:$0xff]  }
 0x424   :  { %6543 = vmatpush1.bf16.msra.mxu0 %v13991_v5  ;;  %6584 = vmatpush1.bf16.msra.mxu1 %v13994_v16  ;;  %v14081_v5 = vld [vmem:[#allocation6 + $0x1620] ss:$48 sps:$4 sm:$0xff]   ;;  %v14084_v16 = vld [vmem:[#allocation6 + $0x1628] ss:$48 sps:$4 sm:$0xff]  }
 0x425   :  { %6544 = vmatprep.subr.bf16.mxu0 %v13999_v17  ;;  %6585 = vmatprep.subr.bf16.mxu1 %v14002_v19  ;;  %v14089_v17 = vld [vmem:[#allocation6 + $0x1684] ss:$48 sps:$4 sm:$0xff]   ;;  %v14092_v19 = vld [vmem:[#allocation6 + $0x168c] ss:$48 sps:$4 sm:$0xff]  }
 0x428   :  { %6545 = vmatpush1.bf16.msra.mxu0 %v13997_v59  ;;  %6586 = vmatpush1.bf16.msra.mxu1 %v14000_v60  ;;  %v14087_v59 = vld [vmem:[#allocation6 + $0x1680] ss:$48 sps:$4 sm:$0xff]   ;;  %v14090_v60 = vld [vmem:[#allocation6 + $0x1688] ss:$48 sps:$4 sm:$0xff]  }
 0x429   :  { %6546 = vmatprep.subr.bf16.mxu0 %v14005_v62  ;;  %6587 = vmatprep.subr.bf16.mxu1 %v14008_v8  ;;  %v14095_v62 = vld [vmem:[#allocation6 + $0x16e4] ss:$48 sps:$4 sm:$0xff]   ;;  %v14098_v8 = vld [vmem:[#allocation6 + $0x16ec] ss:$48 sps:$4 sm:$0xff]  }
 0x42c   :  { %6547 = vmatpush1.bf16.msra.mxu0 %v14003_v11  ;;  %6588 = vmatpush1.bf16.msra.mxu1 %v14006_v45  ;;  %v14093_v11 = vld [vmem:[#allocation6 + $0x16e0] ss:$48 sps:$4 sm:$0xff]   ;;  %v14096_v45 = vld [vmem:[#allocation6 + $0x16e8] ss:$48 sps:$4 sm:$0xff]  }
 0x42d   :  { %6548 = vmatprep.subr.bf16.mxu0 %v14011_v10  ;;  %6589 = vmatprep.subr.bf16.mxu1 %v14014_v15  ;;  %v14101_v10 = vld [vmem:[#allocation6 + $0x1744] ss:$48 sps:$4 sm:$0xff]   ;;  %v14104_v15 = vld [vmem:[#allocation6 + $0x174c] ss:$48 sps:$4 sm:$0xff]  }
 0x430   :  { %6549 = vmatpush1.bf16.msra.mxu0 %v14009_v18  ;;  %6590 = vmatpush1.bf16.msra.mxu1 %v14012_v20  ;;  %v14099_v18 = vld [vmem:[#allocation6 + $0x1740] ss:$48 sps:$4 sm:$0xff]   ;;  %v14102_v20 = vld [vmem:[#allocation6 + $0x1748] ss:$48 sps:$4 sm:$0xff]  }
 0x431   :  { %6616 = vmatprep.subr.bf16.mxu0 %v14017_v23  ;;  %6657 = vmatprep.subr.bf16.mxu1 %v14020_v28  ;;  %v14107_v23 = vld [vmem:[#allocation6 + $0x17a4] ss:$48 sps:$4 sm:$0xff]   ;;  %v14110_v28 = vld [vmem:[#allocation6 + $0x17ac] ss:$48 sps:$4 sm:$0xff]  }
 0x433   :  { %6567 = vmatmul.mubr.bf16.vlgmr.msra.gmra.mrb[52].mxu0 %v15449_v53  ;;  %6608 = vmatmul.mubr.bf16.vlgmr.msra.gmra.mrb[52].mxu1 %v15449_v53 }
 0x434   :  { %6617 = vmatpush1.bf16.msra.mxu0 %v14015_v44  ;;  %6658 = vmatpush1.bf16.msra.mxu1 %v14018_v47  ;;  %v14105_v44 = vld [vmem:[#allocation6 + $0x17a0] ss:$48 sps:$4 sm:$0xff]   ;;  %v14108_v47 = vld [vmem:[#allocation6 + $0x17a8] ss:$48 sps:$4 sm:$0xff]  }
 0x435   :  { %6618 = vmatprep.subr.bf16.mxu0 %v14023_v30  ;;  %6659 = vmatprep.subr.bf16.mxu1 %v14026_v31  ;;  %v14113_v30 = vld [vmem:[#allocation6 + $0x1514] ss:$48 sps:$4 sm:$0xff]   ;;  %v14116_v31 = vld [vmem:[#allocation6 + $0x151c] ss:$48 sps:$4 sm:$0xff]  }
 0x436   :  { %6648 = vmatprep.mubr.bf16.mxu0 %v15019_v0  ;;  %6689 = vmatprep.mubr.bf16.mxu1 %v15019_v0 }
 0x438   :  { %6619 = vmatpush1.bf16.msra.mxu0 %v14021_v21  ;;  %6660 = vmatpush1.bf16.msra.mxu1 %v14024_v22  ;;  %v14111_v21 = vld [vmem:[#allocation6 + $0x1510] ss:$48 sps:$4 sm:$0xff]   ;;  %v14114_v22 = vld [vmem:[#allocation6 + $0x1518] ss:$48 sps:$4 sm:$0xff]  }
 0x439   :  { %6620 = vmatprep.subr.bf16.mxu0 %v14029_v24  ;;  %6661 = vmatprep.subr.bf16.mxu1 %v14032_v42  ;;  %v15555_v24 = vrot.slane %v15449_v53, 4  ;;  %v14119_v42 = vld [vmem:[#allocation6 + $0x1574] ss:$48 sps:$4 sm:$0xff]  }
 0x43c   :  { %6621 = vmatpush1.bf16.msra.mxu0 %v14027_v32  ;;  %6662 = vmatpush1.bf16.msra.mxu1 %v14030_v1  ;;  %v14122_v32 = vld [vmem:[#allocation6 + $0x157c] ss:$48 sps:$4 sm:$0xff]   ;;  %v14117_v1 = vld [vmem:[#allocation6 + $0x1570] ss:$48 sps:$4 sm:$0xff]  }
 0x43d   :  { %6622 = vmatprep.subr.bf16.mxu0 %v14035_v2  ;;  %6663 = vmatprep.subr.bf16.mxu1 %v14038_v4  ;;  %v14120_v2 = vld [vmem:[#allocation6 + $0x1578] ss:$48 sps:$4 sm:$0xff]   ;;  %v14125_v4 = vld [vmem:[#allocation6 + $0x15d4] ss:$48 sps:$4 sm:$0xff]  }
 0x440   :  { %6623 = vmatpush1.bf16.msra.mxu0 %v14033_v26  ;;  %6664 = vmatpush1.bf16.msra.mxu1 %v14036_v27  ;;  %v14128_v26 = vld [vmem:[#allocation6 + $0x15dc] ss:$48 sps:$4 sm:$0xff]   ;;  %v14126_v27 = vld [vmem:[#allocation6 + $0x15d8] ss:$48 sps:$4 sm:$0xff]  }
 0x441   :  { %6624 = vmatprep.subr.bf16.mxu0 %v14041_v29  ;;  %6665 = vmatprep.subr.bf16.mxu1 %v14044_v33  ;;  %v14131_v29 = vld [vmem:[#allocation6 + $0x1634] ss:$48 sps:$4 sm:$0xff]   ;;  %v14134_v33 = vld [vmem:[#allocation6 + $0x163c] ss:$48 sps:$4 sm:$0xff]  }
 0x444   :  { %6625 = vmatpush1.bf16.msra.mxu0 %v14039_v49  ;;  %6666 = vmatpush1.bf16.msra.mxu1 %v14042_v34  ;;  %v14129_v49 = vld [vmem:[#allocation6 + $0x1630] ss:$48 sps:$4 sm:$0xff]   ;;  %v14132_v34 = vld [vmem:[#allocation6 + $0x1638] ss:$48 sps:$4 sm:$0xff]  }
 0x445   :  { %6626 = vmatprep.subr.bf16.mxu0 %v14047_v52  ;;  %6667 = vmatprep.subr.bf16.mxu1 %v14050_v35  ;;  %v14137_v52 = vld [vmem:[#allocation6 + $0x1694] ss:$48 sps:$4 sm:$0xff]   ;;  %v14140_v35 = vld [vmem:[#allocation6 + $0x169c] ss:$48 sps:$4 sm:$0xff]  }
 0x448   :  { %6627 = vmatpush1.bf16.msra.mxu0 %v14045_v6  ;;  %6668 = vmatpush1.bf16.msra.mxu1 %v14048_v7  ;;  %v14135_v6 = vld [vmem:[#allocation6 + $0x1690] ss:$48 sps:$4 sm:$0xff]   ;;  %v14138_v7 = vld [vmem:[#allocation6 + $0x1698] ss:$48 sps:$4 sm:$0xff]  }
 0x449   :  { %6628 = vmatprep.subr.bf16.mxu0 %v14053_v9  ;;  %6669 = vmatprep.subr.bf16.mxu1 %v14056_v36  ;;  %v14143_v9 = vld [vmem:[#allocation6 + $0x16f4] ss:$48 sps:$4 sm:$0xff]   ;;  %v14146_v36 = vld [vmem:[#allocation6 + $0x16fc] ss:$48 sps:$4 sm:$0xff]  }
 0x44c   :  { %6629 = vmatpush1.bf16.msra.mxu0 %v14051_v38  ;;  %6670 = vmatpush1.bf16.msra.mxu1 %v14054_v39  ;;  %v14141_v38 = vld [vmem:[#allocation6 + $0x16f0] ss:$48 sps:$4 sm:$0xff]   ;;  %v14144_v39 = vld [vmem:[#allocation6 + $0x16f8] ss:$48 sps:$4 sm:$0xff]  }
 0x44d   :  { %6630 = vmatprep.subr.bf16.mxu0 %v14059_v40  ;;  %6671 = vmatprep.subr.bf16.mxu1 %v14062_v41  ;;  %v14149_v40 = vld [vmem:[#allocation6 + $0x1754] ss:$48 sps:$4 sm:$0xff]   ;;  %v14152_v41 = vld [vmem:[#allocation6 + $0x175c] ss:$48 sps:$4 sm:$0xff]  }
 0x450   :  { %6631 = vmatpush1.bf16.msra.mxu0 %v14057_v43  ;;  %6672 = vmatpush1.bf16.msra.mxu1 %v14060_v48  ;;  %v14147_v43 = vld [vmem:[#allocation6 + $0x1750] ss:$48 sps:$4 sm:$0xff]   ;;  %v14150_v48 = vld [vmem:[#allocation6 + $0x1758] ss:$48 sps:$4 sm:$0xff]  }
 0x451   :  { %7290 = vmatprep.subr.bf16.mxu0 %v14065_v51  ;;  %7331 = vmatprep.subr.bf16.mxu1 %v14068_v54  ;;  %v14155_v51 = vld [vmem:[#allocation6 + $0x17b4] ss:$48 sps:$4 sm:$0xff]   ;;  %v14158_v54 = vld [vmem:[#allocation6 + $0x17bc] ss:$48 sps:$4 sm:$0xff]  }
 0x453   :  { %6649 = vmatmul.mubr.bf16.vlgmr.msra.gmra.mrb[56].mxu0 %v15449_v53  ;;  %6690 = vmatmul.mubr.bf16.vlgmr.msra.gmra.mrb[56].mxu1 %v15449_v53  ;;  %v14123_v53 = vld [vmem:[#allocation6 + $0x15d0] ss:$48 sps:$4 sm:$0xff]  }
 0x454   :  { %7291 = vmatpush1.bf16.msra.mxu0 %v14063_v55  ;;  %7332 = vmatpush1.bf16.msra.mxu1 %v14066_v57  ;;  %v14153_v55 = vld [vmem:[#allocation6 + $0x17b0] ss:$48 sps:$4 sm:$0xff]   ;;  %v14156_v57 = vld [vmem:[#allocation6 + $0x17b8] ss:$48 sps:$4 sm:$0xff]  }
 0x455   :  { %7292 = vmatprep.subr.bf16.mxu0 %v14071_v13  ;;  %7333 = vmatprep.subr.bf16.mxu1 %v14074_v56  ;;  %v14161_v13 = vld [vmem:[#allocation6 + $0x1524] ss:$48 sps:$4 sm:$0xff]   ;;  %v14164_v56 = vld [vmem:[#allocation6 + $0x152c] ss:$48 sps:$4 sm:$0xff]  }
 0x456   :  { %7322 = vmatprep.mubr.bf16.mxu0 %v15019_v0  ;;  %7363 = vmatprep.mubr.bf16.mxu1 %v15019_v0 }
 0x458   :  { %7293 = vmatpush1.bf16.msra.mxu0 %v14069_v58  ;;  %7334 = vmatpush1.bf16.msra.mxu1 %v14072_v12  ;;  %v14159_v58 = vld [vmem:[#allocation6 + $0x1520] ss:$48 sps:$4 sm:$0xff]   ;;  %v14162_v12 = vld [vmem:[#allocation6 + $0x1528] ss:$48 sps:$4 sm:$0xff]  }
 0x459   :  { %7294 = vmatprep.subr.bf16.mxu0 %v14077_v14  ;;  %7335 = vmatprep.subr.bf16.mxu1 %v14080_v61  ;;  %v14167_v14 = vld [vmem:[#allocation6 + $0x1584] ss:$48 sps:$4 sm:$0xff]   ;;  %v14170_v61 = vld [vmem:[#allocation6 + $0x158c] ss:$48 sps:$4 sm:$0xff]  }
 0x45c   :  { %7295 = vmatpush1.bf16.msra.mxu0 %v14075_v37  ;;  %7336 = vmatpush1.bf16.msra.mxu1 %v14078_v63  ;;  %v14165_v37 = vld [vmem:[#allocation6 + $0x1580] ss:$48 sps:$4 sm:$0xff]   ;;  %v14168_v63 = vld [vmem:[#allocation6 + $0x1588] ss:$48 sps:$4 sm:$0xff]  }
 0x45d   :  { %7296 = vmatprep.subr.bf16.mxu0 %v14083_v3  ;;  %7337 = vmatprep.subr.bf16.mxu1 %v14086_v46  ;;  %v14173_v3 = vld [vmem:[#allocation6 + $0x15e4] ss:$48 sps:$4 sm:$0xff]   ;;  %v14176_v46 = vld [vmem:[#allocation6 + $0x15ec] ss:$48 sps:$4 sm:$0xff]  }
 0x460   :  { %7297 = vmatpush1.bf16.msra.mxu0 %v14081_v5  ;;  %7338 = vmatpush1.bf16.msra.mxu1 %v14084_v16  ;;  %v14171_v5 = vld [vmem:[#allocation6 + $0x15e0] ss:$48 sps:$4 sm:$0xff]   ;;  %v14174_v16 = vld [vmem:[#allocation6 + $0x15e8] ss:$48 sps:$4 sm:$0xff]  }
 0x461   :  { %7298 = vmatprep.subr.bf16.mxu0 %v14089_v17  ;;  %7339 = vmatprep.subr.bf16.mxu1 %v14092_v19  ;;  %v14179_v17 = vld [vmem:[#allocation6 + $0x1644] ss:$48 sps:$4 sm:$0xff]   ;;  %v14182_v19 = vld [vmem:[#allocation6 + $0x164c] ss:$48 sps:$4 sm:$0xff]  }
 0x464   :  { %7299 = vmatpush1.bf16.msra.mxu0 %v14087_v59  ;;  %7340 = vmatpush1.bf16.msra.mxu1 %v14090_v60  ;;  %v14177_v59 = vld [vmem:[#allocation6 + $0x1640] ss:$48 sps:$4 sm:$0xff]   ;;  %v14180_v60 = vld [vmem:[#allocation6 + $0x1648] ss:$48 sps:$4 sm:$0xff]  }
 0x465   :  { %7300 = vmatprep.subr.bf16.mxu0 %v14095_v62  ;;  %7341 = vmatprep.subr.bf16.mxu1 %v14098_v8  ;;  %v14185_v62 = vld [vmem:[#allocation6 + $0x16a4] ss:$48 sps:$4 sm:$0xff]   ;;  %v14188_v8 = vld [vmem:[#allocation6 + $0x16ac] ss:$48 sps:$4 sm:$0xff]  }
 0x468   :  { %7301 = vmatpush1.bf16.msra.mxu0 %v14093_v11  ;;  %7342 = vmatpush1.bf16.msra.mxu1 %v14096_v45  ;;  %v14183_v11 = vld [vmem:[#allocation6 + $0x16a0] ss:$48 sps:$4 sm:$0xff]   ;;  %v14186_v45 = vld [vmem:[#allocation6 + $0x16a8] ss:$48 sps:$4 sm:$0xff]  }
 0x469   :  { %7302 = vmatprep.subr.bf16.mxu0 %v14101_v10  ;;  %7343 = vmatprep.subr.bf16.mxu1 %v14104_v15  ;;  %v14191_v10 = vld [vmem:[#allocation6 + $0x1704] ss:$48 sps:$4 sm:$0xff]   ;;  %v14194_v15 = vld [vmem:[#allocation6 + $0x170c] ss:$48 sps:$4 sm:$0xff]  }
 0x46c   :  { %7303 = vmatpush1.bf16.msra.mxu0 %v14099_v18  ;;  %7344 = vmatpush1.bf16.msra.mxu1 %v14102_v20  ;;  %v14189_v18 = vld [vmem:[#allocation6 + $0x1700] ss:$48 sps:$4 sm:$0xff]   ;;  %v14192_v20 = vld [vmem:[#allocation6 + $0x1708] ss:$48 sps:$4 sm:$0xff]  }
 0x46d   :  { %7304 = vmatprep.subr.bf16.mxu0 %v14107_v23  ;;  %7345 = vmatprep.subr.bf16.mxu1 %v14110_v28  ;;  %v14197_v23 = vld [vmem:[#allocation6 + $0x1764] ss:$48 sps:$4 sm:$0xff]   ;;  %v14200_v28 = vld [vmem:[#allocation6 + $0x176c] ss:$48 sps:$4 sm:$0xff]  }
 0x470   :  { %7305 = vmatpush1.bf16.msra.mxu0 %v14105_v44  ;;  %7346 = vmatpush1.bf16.msra.mxu1 %v14108_v47  ;;  %v14195_v44 = vld [vmem:[#allocation6 + $0x1760] ss:$48 sps:$4 sm:$0xff]   ;;  %v14198_v47 = vld [vmem:[#allocation6 + $0x1768] ss:$48 sps:$4 sm:$0xff]  }
 0x471   :  { %7372 = vmatprep.subr.bf16.mxu0 %v14113_v30  ;;  %7413 = vmatprep.subr.bf16.mxu1 %v14116_v31  ;;  %v14203_v30 = vld [vmem:[#allocation6 + $0x17c4] ss:$48 sps:$4 sm:$0xff]   ;;  %v14206_v31 = vld [vmem:[#allocation6 + $0x17cc] ss:$48 sps:$4 sm:$0xff]  }
 0x473   :  { %7323 = vmatmul.mubr.bf16.vlgmr.msra.gmra.mrb[48].mxu0 %v15555_v24  ;;  %7364 = vmatmul.mubr.bf16.vlgmr.msra.gmra.mrb[48].mxu1 %v15555_v24 }
 0x474   :  { %7373 = vmatpush1.bf16.msra.mxu0 %v14111_v21  ;;  %7414 = vmatpush1.bf16.msra.mxu1 %v14114_v22  ;;  %v14201_v21 = vld [vmem:[#allocation6 + $0x17c0] ss:$48 sps:$4 sm:$0xff]   ;;  %v14204_v22 = vld [vmem:[#allocation6 + $0x17c8] ss:$48 sps:$4 sm:$0xff]  }
 0x475   :  { %7374 = vmatprep.subr.bf16.mxu0 %v14119_v42  ;;  %7415 = vmatprep.subr.bf16.mxu1 %v14122_v32  ;;  %v14209_v42 = vld [vmem:[#allocation6 + $0x1804] ss:$48 sps:$4 sm:$0xff]   ;;  %v14212_v32 = vld [vmem:[#allocation6 + $0x180c] ss:$48 sps:$4 sm:$0xff]  }
 0x476   :  { %7404 = vmatprep.mubr.bf16.mxu0 %v15019_v0  ;;  %7445 = vmatprep.mubr.bf16.mxu1 %v15019_v0 }
 0x478   :  { %7375 = vmatpush1.bf16.msra.mxu0 %v14117_v1  ;;  %7416 = vmatpush1.bf16.msra.mxu1 %v14120_v2  ;;  %v14207_v1 = vld [vmem:[#allocation6 + $0x1800] ss:$48 sps:$4 sm:$0xff]   ;;  %v14210_v2 = vld [vmem:[#allocation6 + $0x1808] ss:$48 sps:$4 sm:$0xff]  }
 0x479   :  { %7376 = vmatprep.subr.bf16.mxu0 %v14125_v4  ;;  %7417 = vmatprep.subr.bf16.mxu1 %v14128_v26  ;;  %v14215_v4 = vld [vmem:[#allocation6 + $0x1864] ss:$48 sps:$4 sm:$0xff]   ;;  %v14218_v26 = vld [vmem:[#allocation6 + $0x186c] ss:$48 sps:$4 sm:$0xff]  }
 0x47c   :  { %7377 = vmatpush1.bf16.msra.mxu0 %v14123_v53  ;;  %7418 = vmatpush1.bf16.msra.mxu1 %v14126_v27  ;;  %v14213_v53 = vld [vmem:[#allocation6 + $0x1860] ss:$48 sps:$4 sm:$0xff]   ;;  %v14216_v27 = vld [vmem:[#allocation6 + $0x1868] ss:$48 sps:$4 sm:$0xff]  }
 0x47d   :  { %7378 = vmatprep.subr.bf16.mxu0 %v14131_v29  ;;  %7419 = vmatprep.subr.bf16.mxu1 %v14134_v33  ;;  %v14221_v29 = vld [vmem:[#allocation6 + $0x18c4] ss:$48 sps:$4 sm:$0xff]   ;;  %v14224_v33 = vld [vmem:[#allocation6 + $0x18cc] ss:$48 sps:$4 sm:$0xff]  }
 0x480   :  { %7379 = vmatpush1.bf16.msra.mxu0 %v14129_v49  ;;  %7420 = vmatpush1.bf16.msra.mxu1 %v14132_v34  ;;  %v14219_v49 = vld [vmem:[#allocation6 + $0x18c0] ss:$48 sps:$4 sm:$0xff]   ;;  %v14222_v34 = vld [vmem:[#allocation6 + $0x18c8] ss:$48 sps:$4 sm:$0xff]  }
 0x481   :  { %7380 = vmatprep.subr.bf16.mxu0 %v14137_v52  ;;  %7421 = vmatprep.subr.bf16.mxu1 %v14140_v35  ;;  %v14227_v52 = vld [vmem:[#allocation6 + $0x1924] ss:$48 sps:$4 sm:$0xff]   ;;  %v14225_v35 = vld [vmem:[#allocation6 + $0x1920] ss:$48 sps:$4 sm:$0xff]  }
 0x484   :  { %7381 = vmatpush1.bf16.msra.mxu0 %v14135_v6  ;;  %7422 = vmatpush1.bf16.msra.mxu1 %v14138_v7  ;;  %v14228_v6 = vld [vmem:[#allocation6 + $0x1928] ss:$48 sps:$4 sm:$0xff]   ;;  %v14233_v7 = vld [vmem:[#allocation6 + $0x1984] ss:$48 sps:$4 sm:$0xff]  }
 0x485   :  { %7382 = vmatprep.subr.bf16.mxu0 %v14143_v9  ;;  %7423 = vmatprep.subr.bf16.mxu1 %v14146_v36  ;;  %v14236_v9 = vld [vmem:[#allocation6 + $0x198c] ss:$48 sps:$4 sm:$0xff]   ;;  %v14231_v36 = vld [vmem:[#allocation6 + $0x1980] ss:$48 sps:$4 sm:$0xff]  }
 0x488   :  { %7383 = vmatpush1.bf16.msra.mxu0 %v14141_v38  ;;  %7424 = vmatpush1.bf16.msra.mxu1 %v14144_v39  ;;  %v14234_v38 = vld [vmem:[#allocation6 + $0x1988] ss:$48 sps:$4 sm:$0xff]   ;;  %v14239_v39 = vld [vmem:[#allocation6 + $0x19e4] ss:$48 sps:$4 sm:$0xff]  }
 0x489   :  { %7384 = vmatprep.subr.bf16.mxu0 %v14149_v40  ;;  %7425 = vmatprep.subr.bf16.mxu1 %v14152_v41  ;;  %v14242_v40 = vld [vmem:[#allocation6 + $0x19ec] ss:$48 sps:$4 sm:$0xff]   ;;  %v14237_v41 = vld [vmem:[#allocation6 + $0x19e0] ss:$48 sps:$4 sm:$0xff]  }
 0x48c   :  { %7385 = vmatpush1.bf16.msra.mxu0 %v14147_v43  ;;  %7426 = vmatpush1.bf16.msra.mxu1 %v14150_v48  ;;  %v14240_v43 = vld [vmem:[#allocation6 + $0x19e8] ss:$48 sps:$4 sm:$0xff]   ;;  %v14245_v48 = vld [vmem:[#allocation6 + $0x1a44] ss:$48 sps:$4 sm:$0xff]  }
 0x48d   :  { %7386 = vmatprep.subr.bf16.mxu0 %v14155_v51  ;;  %7427 = vmatprep.subr.bf16.mxu1 %v14158_v54  ;;  %v14248_v51 = vld [vmem:[#allocation6 + $0x1a4c] ss:$48 sps:$4 sm:$0xff]   ;;  %v14243_v54 = vld [vmem:[#allocation6 + $0x1a40] ss:$48 sps:$4 sm:$0xff]  }
 0x490   :  { %7387 = vmatpush1.bf16.msra.mxu0 %v14153_v55  ;;  %7428 = vmatpush1.bf16.msra.mxu1 %v14156_v57  ;;  %v14246_v55 = vld [vmem:[#allocation6 + $0x1a48] ss:$48 sps:$4 sm:$0xff]   ;;  %v14251_v57 = vld [vmem:[#allocation6 + $0x1aa4] ss:$48 sps:$4 sm:$0xff]  }
 0x491   :  { %7454 = vmatprep.subr.bf16.mxu0 %v14161_v13  ;;  %7495 = vmatprep.subr.bf16.mxu1 %v14164_v56  ;;  %v14254_v13 = vld [vmem:[#allocation6 + $0x1aac] ss:$48 sps:$4 sm:$0xff]   ;;  %v14249_v56 = vld [vmem:[#allocation6 + $0x1aa0] ss:$48 sps:$4 sm:$0xff]  }
 0x493   :  { %7405 = vmatmul.mubr.bf16.vlgmr.msra.gmra.mrb[52].mxu0 %v15555_v24  ;;  %7446 = vmatmul.mubr.bf16.vlgmr.msra.gmra.mrb[52].mxu1 %v15555_v24 }
 0x494   :  { %7455 = vmatpush1.bf16.msra.mxu0 %v14159_v58  ;;  %7496 = vmatpush1.bf16.msra.mxu1 %v14162_v12  ;;  %v14252_v58 = vld [vmem:[#allocation6 + $0x1aa8] ss:$48 sps:$4 sm:$0xff]   ;;  %v14257_v12 = vld [vmem:[#allocation6 + $0x1814] ss:$48 sps:$4 sm:$0xff]  }
 0x495   :  { %7456 = vmatprep.subr.bf16.mxu0 %v14167_v14  ;;  %7497 = vmatprep.subr.bf16.mxu1 %v14170_v61  ;;  %v14260_v14 = vld [vmem:[#allocation6 + $0x181c] ss:$48 sps:$4 sm:$0xff]   ;;  %v14255_v61 = vld [vmem:[#allocation6 + $0x1810] ss:$48 sps:$4 sm:$0xff]  }
 0x496   :  { %7486 = vmatprep.mubr.bf16.mxu0 %v15019_v0  ;;  %7527 = vmatprep.mubr.bf16.mxu1 %v15019_v0 }
 0x498   :  { %7457 = vmatpush1.bf16.msra.mxu0 %v14165_v37  ;;  %7498 = vmatpush1.bf16.msra.mxu1 %v14168_v63  ;;  %v14258_v37 = vld [vmem:[#allocation6 + $0x1818] ss:$48 sps:$4 sm:$0xff]   ;;  %v14263_v63 = vld [vmem:[#allocation6 + $0x1874] ss:$48 sps:$4 sm:$0xff]  }
 0x499   :  { %7458 = vmatprep.subr.bf16.mxu0 %v14173_v3  ;;  %7499 = vmatprep.subr.bf16.mxu1 %v14176_v46  ;;  %v14266_v3 = vld [vmem:[#allocation6 + $0x187c] ss:$48 sps:$4 sm:$0xff]   ;;  %v14261_v46 = vld [vmem:[#allocation6 + $0x1870] ss:$48 sps:$4 sm:$0xff]  }
 0x49c   :  { %7459 = vmatpush1.bf16.msra.mxu0 %v14171_v5  ;;  %7500 = vmatpush1.bf16.msra.mxu1 %v14174_v16  ;;  %v14264_v5 = vld [vmem:[#allocation6 + $0x1878] ss:$48 sps:$4 sm:$0xff]   ;;  %v14269_v16 = vld [vmem:[#allocation6 + $0x18d4] ss:$48 sps:$4 sm:$0xff]  }
 0x49d   :  { %7460 = vmatprep.subr.bf16.mxu0 %v14179_v17  ;;  %7501 = vmatprep.subr.bf16.mxu1 %v14182_v19  ;;  %v14272_v17 = vld [vmem:[#allocation6 + $0x18dc] ss:$48 sps:$4 sm:$0xff]   ;;  %v14267_v19 = vld [vmem:[#allocation6 + $0x18d0] ss:$48 sps:$4 sm:$0xff]  }
 0x4a0   :  { %7461 = vmatpush1.bf16.msra.mxu0 %v14177_v59  ;;  %7502 = vmatpush1.bf16.msra.mxu1 %v14180_v60  ;;  %v14270_v59 = vld [vmem:[#allocation6 + $0x18d8] ss:$48 sps:$4 sm:$0xff]   ;;  %v14275_v60 = vld [vmem:[#allocation6 + $0x1934] ss:$48 sps:$4 sm:$0xff]  }
 0x4a1   :  { %7462 = vmatprep.subr.bf16.mxu0 %v14185_v62  ;;  %7503 = vmatprep.subr.bf16.mxu1 %v14188_v8  ;;  %v14278_v62 = vld [vmem:[#allocation6 + $0x193c] ss:$48 sps:$4 sm:$0xff]   ;;  %v14273_v8 = vld [vmem:[#allocation6 + $0x1930] ss:$48 sps:$4 sm:$0xff]  }
 0x4a4   :  { %7463 = vmatpush1.bf16.msra.mxu0 %v14183_v11  ;;  %7504 = vmatpush1.bf16.msra.mxu1 %v14186_v45  ;;  %v14276_v11 = vld [vmem:[#allocation6 + $0x1938] ss:$48 sps:$4 sm:$0xff]   ;;  %v14281_v45 = vld [vmem:[#allocation6 + $0x1994] ss:$48 sps:$4 sm:$0xff]  }
 0x4a5   :  { %7464 = vmatprep.subr.bf16.mxu0 %v14191_v10  ;;  %7505 = vmatprep.subr.bf16.mxu1 %v14194_v15  ;;  %v14284_v10 = vld [vmem:[#allocation6 + $0x199c] ss:$48 sps:$4 sm:$0xff]   ;;  %v14279_v15 = vld [vmem:[#allocation6 + $0x1990] ss:$48 sps:$4 sm:$0xff]  }
 0x4a8   :  { %7465 = vmatpush1.bf16.msra.mxu0 %v14189_v18  ;;  %7506 = vmatpush1.bf16.msra.mxu1 %v14192_v20  ;;  %v14282_v18 = vld [vmem:[#allocation6 + $0x1998] ss:$48 sps:$4 sm:$0xff]   ;;  %v14287_v20 = vld [vmem:[#allocation6 + $0x19f4] ss:$48 sps:$4 sm:$0xff]  }
 0x4a9   :  { %7466 = vmatprep.subr.bf16.mxu0 %v14197_v23  ;;  %7507 = vmatprep.subr.bf16.mxu1 %v14200_v28  ;;  %v14290_v23 = vld [vmem:[#allocation6 + $0x19fc] ss:$48 sps:$4 sm:$0xff]   ;;  %v14285_v28 = vld [vmem:[#allocation6 + $0x19f0] ss:$48 sps:$4 sm:$0xff]  }
 0x4ac   :  { %7467 = vmatpush1.bf16.msra.mxu0 %v14195_v44  ;;  %7508 = vmatpush1.bf16.msra.mxu1 %v14198_v47  ;;  %v14288_v44 = vld [vmem:[#allocation6 + $0x19f8] ss:$48 sps:$4 sm:$0xff]   ;;  %v14293_v47 = vld [vmem:[#allocation6 + $0x1a54] ss:$48 sps:$4 sm:$0xff]  }
 0x4ad   :  { %7468 = vmatprep.subr.bf16.mxu0 %v14203_v30  ;;  %7509 = vmatprep.subr.bf16.mxu1 %v14206_v31  ;;  %v14296_v30 = vld [vmem:[#allocation6 + $0x1a5c] ss:$48 sps:$4 sm:$0xff]   ;;  %v14291_v31 = vld [vmem:[#allocation6 + $0x1a50] ss:$48 sps:$4 sm:$0xff]  }
 0x4b0   :  { %7469 = vmatpush1.bf16.msra.mxu0 %v14201_v21  ;;  %7510 = vmatpush1.bf16.msra.mxu1 %v14204_v22  ;;  %v14294_v21 = vld [vmem:[#allocation6 + $0x1a58] ss:$48 sps:$4 sm:$0xff]   ;;  %v14299_v22 = vld [vmem:[#allocation6 + $0x1ab4] ss:$48 sps:$4 sm:$0xff]  }
 0x4b1   :  { %8125 = vmatprep.subr.bf16.mxu0 %v14209_v42  ;;  %8166 = vmatprep.subr.bf16.mxu1 %v14212_v32  ;;  %v14302_v42 = vld [vmem:[#allocation6 + $0x1abc] ss:$48 sps:$4 sm:$0xff]   ;;  %v14297_v32 = vld [vmem:[#allocation6 + $0x1ab0] ss:$48 sps:$4 sm:$0xff]  }
 0x4b3   :  { %7487 = vmatmul.mubr.bf16.vlgmr.msra.gmra.mrb[56].mxu0 %v15555_v24  ;;  %7528 = vmatmul.mubr.bf16.vlgmr.msra.gmra.mrb[56].mxu1 %v15555_v24  ;;  %v14230_v24 = vld [vmem:[#allocation6 + $0x192c] ss:$48 sps:$4 sm:$0xff]  }
 0x4b4   :  { %8126 = vmatpush1.bf16.msra.mxu0 %v14207_v1  ;;  %8167 = vmatpush1.bf16.msra.mxu1 %v14210_v2  ;;  %v14300_v1 = vld [vmem:[#allocation6 + $0x1ab8] ss:$48 sps:$4 sm:$0xff]   ;;  %v14305_v2 = vld [vmem:[#allocation6 + $0x1824] ss:$48 sps:$4 sm:$0xff]  }
 0x4b5   :  { %8127 = vmatprep.subr.bf16.mxu0 %v14215_v4  ;;  %8168 = vmatprep.subr.bf16.mxu1 %v14218_v26  ;;  %v14308_v4 = vld [vmem:[#allocation6 + $0x182c] ss:$48 sps:$4 sm:$0xff]   ;;  %v14303_v26 = vld [vmem:[#allocation6 + $0x1820] ss:$48 sps:$4 sm:$0xff]  }
 0x4b6   :  { %8157 = vmatprep.mubr.bf16.mxu0 %v15019_v0  ;;  %8198 = vmatprep.mubr.bf16.mxu1 %v15019_v0 }
 0x4b8   :  { %8128 = vmatpush1.bf16.msra.mxu0 %v14213_v53  ;;  %8169 = vmatpush1.bf16.msra.mxu1 %v14216_v27  ;;  %v14306_v53 = vld [vmem:[#allocation6 + $0x1828] ss:$48 sps:$4 sm:$0xff]   ;;  %v14311_v27 = vld [vmem:[#allocation6 + $0x1884] ss:$48 sps:$4 sm:$0xff]  }
 0x4b9   :  { %8129 = vmatprep.subr.bf16.mxu0 %v14221_v29  ;;  %8170 = vmatprep.subr.bf16.mxu1 %v14224_v33  ;;  %v14314_v29 = vld [vmem:[#allocation6 + $0x188c] ss:$48 sps:$4 sm:$0xff]   ;;  %v14309_v33 = vld [vmem:[#allocation6 + $0x1880] ss:$48 sps:$4 sm:$0xff]  }
 0x4bc   :  { %8130 = vmatpush1.bf16.msra.mxu0 %v14219_v49  ;;  %8171 = vmatpush1.bf16.msra.mxu1 %v14222_v34  ;;  %v14312_v49 = vld [vmem:[#allocation6 + $0x1888] ss:$48 sps:$4 sm:$0xff]   ;;  %v14317_v34 = vld [vmem:[#allocation6 + $0x18e4] ss:$48 sps:$4 sm:$0xff]  }
 0x4bd   :  { %8131 = vmatprep.subr.bf16.mxu0 %v14227_v52  ;;  %8172 = vmatprep.subr.bf16.mxu1 %v14230_v24  ;;  %v14320_v52 = vld [vmem:[#allocation6 + $0x18ec] ss:$48 sps:$4 sm:$0xff]   ;;  %v14315_v24 = vld [vmem:[#allocation6 + $0x18e0] ss:$48 sps:$4 sm:$0xff]  }
 0x4c0   :  { %8132 = vmatpush1.bf16.msra.mxu0 %v14225_v35  ;;  %8173 = vmatpush1.bf16.msra.mxu1 %v14228_v6  ;;  %v14318_v35 = vld [vmem:[#allocation6 + $0x18e8] ss:$48 sps:$4 sm:$0xff]   ;;  %v14323_v6 = vld [vmem:[#allocation6 + $0x1944] ss:$48 sps:$4 sm:$0xff]  }
 0x4c1   :  { %8133 = vmatprep.subr.bf16.mxu0 %v14233_v7  ;;  %8174 = vmatprep.subr.bf16.mxu1 %v14236_v9  ;;  %v14326_v7 = vld [vmem:[#allocation6 + $0x194c] ss:$48 sps:$4 sm:$0xff]   ;;  %v14321_v9 = vld [vmem:[#allocation6 + $0x1940] ss:$48 sps:$4 sm:$0xff]  }
 0x4c4   :  { %8134 = vmatpush1.bf16.msra.mxu0 %v14231_v36  ;;  %8175 = vmatpush1.bf16.msra.mxu1 %v14234_v38  ;;  %v14324_v36 = vld [vmem:[#allocation6 + $0x1948] ss:$48 sps:$4 sm:$0xff]   ;;  %v14329_v38 = vld [vmem:[#allocation6 + $0x19a4] ss:$48 sps:$4 sm:$0xff]  }
 0x4c5   :  { %8135 = vmatprep.subr.bf16.mxu0 %v14239_v39  ;;  %8176 = vmatprep.subr.bf16.mxu1 %v14242_v40  ;;  %v14332_v39 = vld [vmem:[#allocation6 + $0x19ac] ss:$48 sps:$4 sm:$0xff]   ;;  %v14327_v40 = vld [vmem:[#allocation6 + $0x19a0] ss:$48 sps:$4 sm:$0xff]  }
 0x4c8   :  { %8136 = vmatpush1.bf16.msra.mxu0 %v14237_v41  ;;  %8177 = vmatpush1.bf16.msra.mxu1 %v14240_v43  ;;  %v14330_v41 = vld [vmem:[#allocation6 + $0x19a8] ss:$48 sps:$4 sm:$0xff]   ;;  %v14335_v43 = vld [vmem:[#allocation6 + $0x1a04] ss:$48 sps:$4 sm:$0xff]  }
 0x4c9   :  { %8137 = vmatprep.subr.bf16.mxu0 %v14245_v48  ;;  %8178 = vmatprep.subr.bf16.mxu1 %v14248_v51  ;;  %v14338_v48 = vld [vmem:[#allocation6 + $0x1a0c] ss:$48 sps:$4 sm:$0xff]   ;;  %v14333_v51 = vld [vmem:[#allocation6 + $0x1a00] ss:$48 sps:$4 sm:$0xff]  }
 0x4cc   :  { %8138 = vmatpush1.bf16.msra.mxu0 %v14243_v54  ;;  %8179 = vmatpush1.bf16.msra.mxu1 %v14246_v55  ;;  %v14336_v54 = vld [vmem:[#allocation6 + $0x1a08] ss:$48 sps:$4 sm:$0xff]   ;;  %v14341_v55 = vld [vmem:[#allocation6 + $0x1a64] ss:$48 sps:$4 sm:$0xff]  }
 0x4cd   :  { %8139 = vmatprep.subr.bf16.mxu0 %v14251_v57  ;;  %8180 = vmatprep.subr.bf16.mxu1 %v14254_v13  ;;  %v14344_v57 = vld [vmem:[#allocation6 + $0x1a6c] ss:$48 sps:$4 sm:$0xff]   ;;  %v14339_v13 = vld [vmem:[#allocation6 + $0x1a60] ss:$48 sps:$4 sm:$0xff]  }
 0x4d0   :  { %8140 = vmatpush1.bf16.msra.mxu0 %v14249_v56  ;;  %8181 = vmatpush1.bf16.msra.mxu1 %v14252_v58  ;;  %v14342_v56 = vld [vmem:[#allocation6 + $0x1a68] ss:$48 sps:$4 sm:$0xff]   ;;  %v14347_v58 = vld [vmem:[#allocation6 + $0x1ac4] ss:$48 sps:$4 sm:$0xff]  }
 0x4d1   :  { %8207 = vmatprep.subr.bf16.mxu0 %v14257_v12  ;;  %8248 = vmatprep.subr.bf16.mxu1 %v14260_v14  ;;  %v14350_v12 = vld [vmem:[#allocation6 + $0x1acc] ss:$48 sps:$4 sm:$0xff]   ;;  %v14345_v14 = vld [vmem:[#allocation6 + $0x1ac0] ss:$48 sps:$4 sm:$0xff]  }
 0x4d3   :  { %8158 = vmatmul.mubr.bf16.vlgmr.msra.gmra.mrb[48].mxu0 %v15459_v25  ;;  %8199 = vmatmul.mubr.bf16.vlgmr.msra.gmra.mrb[48].mxu1 %v15459_v25 }
 0x4d4   :  { %8208 = vmatpush1.bf16.msra.mxu0 %v14255_v61  ;;  %8249 = vmatpush1.bf16.msra.mxu1 %v14258_v37  ;;  %v14348_v61 = vld [vmem:[#allocation6 + $0x1ac8] ss:$48 sps:$4 sm:$0xff]   ;;  %v14353_v37 = vld [vmem:[#allocation6 + $0x1b04] ss:$48 sps:$4 sm:$0xff]  }
 0x4d5   :  { %8209 = vmatprep.subr.bf16.mxu0 %v14263_v63  ;;  %8250 = vmatprep.subr.bf16.mxu1 %v14266_v3  ;;  %v14356_v63 = vld [vmem:[#allocation6 + $0x1b0c] ss:$48 sps:$4 sm:$0xff]   ;;  %v14351_v3 = vld [vmem:[#allocation6 + $0x1b00] ss:$48 sps:$4 sm:$0xff]  }
 0x4d6   :  { %8239 = vmatprep.mubr.bf16.mxu0 %v15019_v0  ;;  %8280 = vmatprep.mubr.bf16.mxu1 %v15019_v0 }
 0x4d8   :  { %8210 = vmatpush1.bf16.msra.mxu0 %v14261_v46  ;;  %8251 = vmatpush1.bf16.msra.mxu1 %v14264_v5  ;;  %v14354_v46 = vld [vmem:[#allocation6 + $0x1b08] ss:$48 sps:$4 sm:$0xff]   ;;  %v14359_v5 = vld [vmem:[#allocation6 + $0x1b64] ss:$48 sps:$4 sm:$0xff]  }
 0x4d9   :  { %8211 = vmatprep.subr.bf16.mxu0 %v14269_v16  ;;  %8252 = vmatprep.subr.bf16.mxu1 %v14272_v17  ;;  %v14362_v16 = vld [vmem:[#allocation6 + $0x1b6c] ss:$48 sps:$4 sm:$0xff]   ;;  %v14357_v17 = vld [vmem:[#allocation6 + $0x1b60] ss:$48 sps:$4 sm:$0xff]  }
 0x4dc   :  { %8212 = vmatpush1.bf16.msra.mxu0 %v14267_v19  ;;  %8253 = vmatpush1.bf16.msra.mxu1 %v14270_v59  ;;  %v14360_v19 = vld [vmem:[#allocation6 + $0x1b68] ss:$48 sps:$4 sm:$0xff]   ;;  %v14365_v59 = vld [vmem:[#allocation6 + $0x1bc4] ss:$48 sps:$4 sm:$0xff]  }
 0x4dd   :  { %8213 = vmatprep.subr.bf16.mxu0 %v14275_v60  ;;  %8254 = vmatprep.subr.bf16.mxu1 %v14278_v62  ;;  %v14368_v60 = vld [vmem:[#allocation6 + $0x1bcc] ss:$48 sps:$4 sm:$0xff]   ;;  %v14363_v62 = vld [vmem:[#allocation6 + $0x1bc0] ss:$48 sps:$4 sm:$0xff]  }
 0x4e0   :  { %8214 = vmatpush1.bf16.msra.mxu0 %v14273_v8  ;;  %8255 = vmatpush1.bf16.msra.mxu1 %v14276_v11  ;;  %v14366_v8 = vld [vmem:[#allocation6 + $0x1bc8] ss:$48 sps:$4 sm:$0xff]   ;;  %v14371_v11 = vld [vmem:[#allocation6 + $0x1c24] ss:$48 sps:$4 sm:$0xff]  }
 0x4e1   :  { %8215 = vmatprep.subr.bf16.mxu0 %v14281_v45  ;;  %8256 = vmatprep.subr.bf16.mxu1 %v14284_v10  ;;  %v14374_v45 = vld [vmem:[#allocation6 + $0x1c2c] ss:$48 sps:$4 sm:$0xff]   ;;  %v14369_v10 = vld [vmem:[#allocation6 + $0x1c20] ss:$48 sps:$4 sm:$0xff]  }
 0x4e4   :  { %8216 = vmatpush1.bf16.msra.mxu0 %v14279_v15  ;;  %8257 = vmatpush1.bf16.msra.mxu1 %v14282_v18  ;;  %v14372_v15 = vld [vmem:[#allocation6 + $0x1c28] ss:$48 sps:$4 sm:$0xff]   ;;  %v14377_v18 = vld [vmem:[#allocation6 + $0x1c84] ss:$48 sps:$4 sm:$0xff]  }
 0x4e5   :  { %8217 = vmatprep.subr.bf16.mxu0 %v14287_v20  ;;  %8258 = vmatprep.subr.bf16.mxu1 %v14290_v23  ;;  %v14380_v20 = vld [vmem:[#allocation6 + $0x1c8c] ss:$48 sps:$4 sm:$0xff]   ;;  %v14375_v23 = vld [vmem:[#allocation6 + $0x1c80] ss:$48 sps:$4 sm:$0xff]  }
 0x4e8   :  { %8218 = vmatpush1.bf16.msra.mxu0 %v14285_v28  ;;  %8259 = vmatpush1.bf16.msra.mxu1 %v14288_v44  ;;  %v14378_v28 = vld [vmem:[#allocation6 + $0x1c88] ss:$48 sps:$4 sm:$0xff]   ;;  %v14383_v44 = vld [vmem:[#allocation6 + $0x1ce4] ss:$48 sps:$4 sm:$0xff]  }
 0x4e9   :  { %8219 = vmatprep.subr.bf16.mxu0 %v14293_v47  ;;  %8260 = vmatprep.subr.bf16.mxu1 %v14296_v30  ;;  %v14386_v47 = vld [vmem:[#allocation6 + $0x1cec] ss:$48 sps:$4 sm:$0xff]   ;;  %v14381_v30 = vld [vmem:[#allocation6 + $0x1ce0] ss:$48 sps:$4 sm:$0xff]  }
 0x4ec   :  { %8220 = vmatpush1.bf16.msra.mxu0 %v14291_v31  ;;  %8261 = vmatpush1.bf16.msra.mxu1 %v14294_v21  ;;  %v14384_v31 = vld [vmem:[#allocation6 + $0x1ce8] ss:$48 sps:$4 sm:$0xff]   ;;  %v14389_v21 = vld [vmem:[#allocation6 + $0x1d44] ss:$48 sps:$4 sm:$0xff]  }
 0x4ed   :  { %8221 = vmatprep.subr.bf16.mxu0 %v14299_v22  ;;  %8262 = vmatprep.subr.bf16.mxu1 %v14302_v42  ;;  %v14392_v22 = vld [vmem:[#allocation6 + $0x1d4c] ss:$48 sps:$4 sm:$0xff]   ;;  %v14387_v42 = vld [vmem:[#allocation6 + $0x1d40] ss:$48 sps:$4 sm:$0xff]  }
 0x4f0   :  { %8222 = vmatpush1.bf16.msra.mxu0 %v14297_v32  ;;  %8263 = vmatpush1.bf16.msra.mxu1 %v14300_v1  ;;  %v14390_v32 = vld [vmem:[#allocation6 + $0x1d48] ss:$48 sps:$4 sm:$0xff]   ;;  %v14395_v1 = vld [vmem:[#allocation6 + $0x1da4] ss:$48 sps:$4 sm:$0xff]  }
 0x4f1   :  { %8289 = vmatprep.subr.bf16.mxu0 %v14305_v2  ;;  %8330 = vmatprep.subr.bf16.mxu1 %v14308_v4  ;;  %v14398_v2 = vld [vmem:[#allocation6 + $0x1dac] ss:$48 sps:$4 sm:$0xff]   ;;  %v14393_v4 = vld [vmem:[#allocation6 + $0x1da0] ss:$48 sps:$4 sm:$0xff]  }
 0x4f3   :  { %8240 = vmatmul.mubr.bf16.vlgmr.msra.gmra.mrb[52].mxu0 %v15459_v25  ;;  %8281 = vmatmul.mubr.bf16.vlgmr.msra.gmra.mrb[52].mxu1 %v15459_v25 }
 0x4f4   :  { %8290 = vmatpush1.bf16.msra.mxu0 %v14303_v26  ;;  %8331 = vmatpush1.bf16.msra.mxu1 %v14306_v53  ;;  %v14396_v26 = vld [vmem:[#allocation6 + $0x1da8] ss:$48 sps:$4 sm:$0xff]   ;;  %v14401_v53 = vld [vmem:[#allocation6 + $0x1b14] ss:$48 sps:$4 sm:$0xff]  }
 0x4f5   :  { %8291 = vmatprep.subr.bf16.mxu0 %v14311_v27  ;;  %8332 = vmatprep.subr.bf16.mxu1 %v14314_v29  ;;  %v14404_v27 = vld [vmem:[#allocation6 + $0x1b1c] ss:$48 sps:$4 sm:$0xff]   ;;  %v14399_v29 = vld [vmem:[#allocation6 + $0x1b10] ss:$48 sps:$4 sm:$0xff]  }
 0x4f6   :  { %8321 = vmatprep.mubr.bf16.mxu0 %v15019_v0  ;;  %8362 = vmatprep.mubr.bf16.mxu1 %v15019_v0 }
 0x4f8   :  { %8292 = vmatpush1.bf16.msra.mxu0 %v14309_v33  ;;  %8333 = vmatpush1.bf16.msra.mxu1 %v14312_v49  ;;  %v14402_v33 = vld [vmem:[#allocation6 + $0x1b18] ss:$48 sps:$4 sm:$0xff]   ;;  %v15582_v49 = vrot.slane %v15459_v25, 4 }
 0x4f9   :  { %8293 = vmatprep.subr.bf16.mxu0 %v14317_v34  ;;  %8334 = vmatprep.subr.bf16.mxu1 %v14320_v52  ;;  %v14407_v34 = vld [vmem:[#allocation6 + $0x1b74] ss:$48 sps:$4 sm:$0xff]   ;;  %v14410_v52 = vld [vmem:[#allocation6 + $0x1b7c] ss:$48 sps:$4 sm:$0xff]  }
 0x4fc   :  { %8294 = vmatpush1.bf16.msra.mxu0 %v14315_v24  ;;  %8335 = vmatpush1.bf16.msra.mxu1 %v14318_v35  ;;  %v14405_v24 = vld [vmem:[#allocation6 + $0x1b70] ss:$48 sps:$4 sm:$0xff]   ;;  %v14408_v35 = vld [vmem:[#allocation6 + $0x1b78] ss:$48 sps:$4 sm:$0xff]  }
 0x4fd   :  { %8295 = vmatprep.subr.bf16.mxu0 %v14323_v6  ;;  %8336 = vmatprep.subr.bf16.mxu1 %v14326_v7  ;;  %v14413_v6 = vld [vmem:[#allocation6 + $0x1bd4] ss:$48 sps:$4 sm:$0xff]   ;;  %v14416_v7 = vld [vmem:[#allocation6 + $0x1bdc] ss:$48 sps:$4 sm:$0xff]  }
 0x500   :  { %8296 = vmatpush1.bf16.msra.mxu0 %v14321_v9  ;;  %8337 = vmatpush1.bf16.msra.mxu1 %v14324_v36  ;;  %v14414_v9 = vld [vmem:[#allocation6 + $0x1bd8] ss:$48 sps:$4 sm:$0xff]   ;;  %v14419_v36 = vld [vmem:[#allocation6 + $0x1c34] ss:$48 sps:$4 sm:$0xff]  }
 0x501   :  { %8297 = vmatprep.subr.bf16.mxu0 %v14329_v38  ;;  %8338 = vmatprep.subr.bf16.mxu1 %v14332_v39  ;;  %v14422_v38 = vld [vmem:[#allocation6 + $0x1c3c] ss:$48 sps:$4 sm:$0xff]   ;;  %v14417_v39 = vld [vmem:[#allocation6 + $0x1c30] ss:$48 sps:$4 sm:$0xff]  }
 0x504   :  { %8298 = vmatpush1.bf16.msra.mxu0 %v14327_v40  ;;  %8339 = vmatpush1.bf16.msra.mxu1 %v14330_v41  ;;  %v14420_v40 = vld [vmem:[#allocation6 + $0x1c38] ss:$48 sps:$4 sm:$0xff]   ;;  %v14425_v41 = vld [vmem:[#allocation6 + $0x1c94] ss:$48 sps:$4 sm:$0xff]  }
 0x505   :  { %8299 = vmatprep.subr.bf16.mxu0 %v14335_v43  ;;  %8340 = vmatprep.subr.bf16.mxu1 %v14338_v48  ;;  %v14428_v43 = vld [vmem:[#allocation6 + $0x1c9c] ss:$48 sps:$4 sm:$0xff]   ;;  %v14423_v48 = vld [vmem:[#allocation6 + $0x1c90] ss:$48 sps:$4 sm:$0xff]  }
 0x508   :  { %8300 = vmatpush1.bf16.msra.mxu0 %v14333_v51  ;;  %8341 = vmatpush1.bf16.msra.mxu1 %v14336_v54  ;;  %v14426_v51 = vld [vmem:[#allocation6 + $0x1c98] ss:$48 sps:$4 sm:$0xff]   ;;  %v14431_v54 = vld [vmem:[#allocation6 + $0x1cf4] ss:$48 sps:$4 sm:$0xff]  }
 0x509   :  { %8301 = vmatprep.subr.bf16.mxu0 %v14341_v55  ;;  %8342 = vmatprep.subr.bf16.mxu1 %v14344_v57  ;;  %v14434_v55 = vld [vmem:[#allocation6 + $0x1cfc] ss:$48 sps:$4 sm:$0xff]   ;;  %v14429_v57 = vld [vmem:[#allocation6 + $0x1cf0] ss:$48 sps:$4 sm:$0xff]  }
 0x50c   :  { %8302 = vmatpush1.bf16.msra.mxu0 %v14339_v13  ;;  %8343 = vmatpush1.bf16.msra.mxu1 %v14342_v56  ;;  %v14432_v13 = vld [vmem:[#allocation6 + $0x1cf8] ss:$48 sps:$4 sm:$0xff]   ;;  %v14437_v56 = vld [vmem:[#allocation6 + $0x1d54] ss:$48 sps:$4 sm:$0xff]  }
 0x50d   :  { %8303 = vmatprep.subr.bf16.mxu0 %v14347_v58  ;;  %8344 = vmatprep.subr.bf16.mxu1 %v14350_v12  ;;  %v14440_v58 = vld [vmem:[#allocation6 + $0x1d5c] ss:$48 sps:$4 sm:$0xff]   ;;  %v14435_v12 = vld [vmem:[#allocation6 + $0x1d50] ss:$48 sps:$4 sm:$0xff]  }
 0x510   :  { %8304 = vmatpush1.bf16.msra.mxu0 %v14345_v14  ;;  %8345 = vmatpush1.bf16.msra.mxu1 %v14348_v61  ;;  %v14438_v14 = vld [vmem:[#allocation6 + $0x1d58] ss:$48 sps:$4 sm:$0xff]   ;;  %v14443_v61 = vld [vmem:[#allocation6 + $0x1db4] ss:$48 sps:$4 sm:$0xff]  }
 0x511   :  { %8963 = vmatprep.subr.bf16.mxu0 %v14353_v37  ;;  %9004 = vmatprep.subr.bf16.mxu1 %v14356_v63  ;;  %v14446_v37 = vld [vmem:[#allocation6 + $0x1dbc] ss:$48 sps:$4 sm:$0xff]   ;;  %v14441_v63 = vld [vmem:[#allocation6 + $0x1db0] ss:$48 sps:$4 sm:$0xff]  }
 0x513   :  { %8322 = vmatmul.mubr.bf16.vlgmr.msra.gmra.mrb[56].mxu0 %v15459_v25  ;;  %8363 = vmatmul.mubr.bf16.vlgmr.msra.gmra.mrb[56].mxu1 %v15459_v25  ;;  %v14411_v25 = vld [vmem:[#allocation6 + $0x1bd0] ss:$48 sps:$4 sm:$0xff]  }
 0x514   :  { %8964 = vmatpush1.bf16.msra.mxu0 %v14351_v3  ;;  %9005 = vmatpush1.bf16.msra.mxu1 %v14354_v46  ;;  %v14444_v3 = vld [vmem:[#allocation6 + $0x1db8] ss:$48 sps:$4 sm:$0xff]   ;;  %v14449_v46 = vld [vmem:[#allocation6 + $0x1b24] ss:$48 sps:$4 sm:$0xff]  }
 0x515   :  { %8965 = vmatprep.subr.bf16.mxu0 %v14359_v5  ;;  %9006 = vmatprep.subr.bf16.mxu1 %v14362_v16  ;;  %v14452_v5 = vld [vmem:[#allocation6 + $0x1b2c] ss:$48 sps:$4 sm:$0xff]   ;;  %v14447_v16 = vld [vmem:[#allocation6 + $0x1b20] ss:$48 sps:$4 sm:$0xff]  }
 0x516   :  { %8995 = vmatprep.mubr.bf16.mxu0 %v15019_v0  ;;  %9036 = vmatprep.mubr.bf16.mxu1 %v15019_v0 }
 0x518   :  { %8966 = vmatpush1.bf16.msra.mxu0 %v14357_v17  ;;  %9007 = vmatpush1.bf16.msra.mxu1 %v14360_v19  ;;  %v14450_v17 = vld [vmem:[#allocation6 + $0x1b28] ss:$48 sps:$4 sm:$0xff]   ;;  %v14455_v19 = vld [vmem:[#allocation6 + $0x1b84] ss:$48 sps:$4 sm:$0xff]  }
 0x519   :  { %8967 = vmatprep.subr.bf16.mxu0 %v14365_v59  ;;  %9008 = vmatprep.subr.bf16.mxu1 %v14368_v60  ;;  %v14458_v59 = vld [vmem:[#allocation6 + $0x1b8c] ss:$48 sps:$4 sm:$0xff]   ;;  %v14453_v60 = vld [vmem:[#allocation6 + $0x1b80] ss:$48 sps:$4 sm:$0xff]  }
 0x51c   :  { %8968 = vmatpush1.bf16.msra.mxu0 %v14363_v62  ;;  %9009 = vmatpush1.bf16.msra.mxu1 %v14366_v8  ;;  %v14456_v62 = vld [vmem:[#allocation6 + $0x1b88] ss:$48 sps:$4 sm:$0xff]   ;;  %v14461_v8 = vld [vmem:[#allocation6 + $0x1be4] ss:$48 sps:$4 sm:$0xff]  }
 0x51d   :  { %8969 = vmatprep.subr.bf16.mxu0 %v14371_v11  ;;  %9010 = vmatprep.subr.bf16.mxu1 %v14374_v45  ;;  %v14464_v11 = vld [vmem:[#allocation6 + $0x1bec] ss:$48 sps:$4 sm:$0xff]   ;;  %v14459_v45 = vld [vmem:[#allocation6 + $0x1be0] ss:$48 sps:$4 sm:$0xff]  }
 0x520   :  { %8970 = vmatpush1.bf16.msra.mxu0 %v14369_v10  ;;  %9011 = vmatpush1.bf16.msra.mxu1 %v14372_v15  ;;  %v14462_v10 = vld [vmem:[#allocation6 + $0x1be8] ss:$48 sps:$4 sm:$0xff]   ;;  %v14467_v15 = vld [vmem:[#allocation6 + $0x1c44] ss:$48 sps:$4 sm:$0xff]  }
 0x521   :  { %8971 = vmatprep.subr.bf16.mxu0 %v14377_v18  ;;  %9012 = vmatprep.subr.bf16.mxu1 %v14380_v20  ;;  %v14470_v18 = vld [vmem:[#allocation6 + $0x1c4c] ss:$48 sps:$4 sm:$0xff]   ;;  %v14465_v20 = vld [vmem:[#allocation6 + $0x1c40] ss:$48 sps:$4 sm:$0xff]  }
 0x524   :  { %8972 = vmatpush1.bf16.msra.mxu0 %v14375_v23  ;;  %9013 = vmatpush1.bf16.msra.mxu1 %v14378_v28  ;;  %v14468_v23 = vld [vmem:[#allocation6 + $0x1c48] ss:$48 sps:$4 sm:$0xff]   ;;  %v14473_v28 = vld [vmem:[#allocation6 + $0x1ca4] ss:$48 sps:$4 sm:$0xff]  }
 0x525   :  { %8973 = vmatprep.subr.bf16.mxu0 %v14383_v44  ;;  %9014 = vmatprep.subr.bf16.mxu1 %v14386_v47  ;;  %v14476_v44 = vld [vmem:[#allocation6 + $0x1cac] ss:$48 sps:$4 sm:$0xff]   ;;  %v14471_v47 = vld [vmem:[#allocation6 + $0x1ca0] ss:$48 sps:$4 sm:$0xff]  }
 0x528   :  { %8974 = vmatpush1.bf16.msra.mxu0 %v14381_v30  ;;  %9015 = vmatpush1.bf16.msra.mxu1 %v14384_v31  ;;  %v14474_v30 = vld [vmem:[#allocation6 + $0x1ca8] ss:$48 sps:$4 sm:$0xff]   ;;  %v14479_v31 = vld [vmem:[#allocation6 + $0x1d04] ss:$48 sps:$4 sm:$0xff]  }
 0x529   :  { %8975 = vmatprep.subr.bf16.mxu0 %v14389_v21  ;;  %9016 = vmatprep.subr.bf16.mxu1 %v14392_v22  ;;  %v14482_v21 = vld [vmem:[#allocation6 + $0x1d0c] ss:$48 sps:$4 sm:$0xff]   ;;  %v14477_v22 = vld [vmem:[#allocation6 + $0x1d00] ss:$48 sps:$4 sm:$0xff]  }
 0x52c   :  { %8976 = vmatpush1.bf16.msra.mxu0 %v14387_v42  ;;  %9017 = vmatpush1.bf16.msra.mxu1 %v14390_v32  ;;  %v14480_v42 = vld [vmem:[#allocation6 + $0x1d08] ss:$48 sps:$4 sm:$0xff]   ;;  %v14485_v32 = vld [vmem:[#allocation6 + $0x1d64] ss:$48 sps:$4 sm:$0xff]  }
 0x52d   :  { %8977 = vmatprep.subr.bf16.mxu0 %v14395_v1  ;;  %9018 = vmatprep.subr.bf16.mxu1 %v14398_v2  ;;  %v14488_v1 = vld [vmem:[#allocation6 + $0x1d6c] ss:$48 sps:$4 sm:$0xff]   ;;  %v14483_v2 = vld [vmem:[#allocation6 + $0x1d60] ss:$48 sps:$4 sm:$0xff]  }
 0x530   :  { %8978 = vmatpush1.bf16.msra.mxu0 %v14393_v4  ;;  %9019 = vmatpush1.bf16.msra.mxu1 %v14396_v26  ;;  %v14486_v4 = vld [vmem:[#allocation6 + $0x1d68] ss:$48 sps:$4 sm:$0xff]   ;;  %v14491_v26 = vld [vmem:[#allocation6 + $0x1dc4] ss:$48 sps:$4 sm:$0xff]  }
 0x531   :  { %9045 = vmatprep.subr.bf16.mxu0 %v14401_v53  ;;  %9086 = vmatprep.subr.bf16.mxu1 %v14404_v27  ;;  %v14494_v53 = vld [vmem:[#allocation6 + $0x1dcc] ss:$48 sps:$4 sm:$0xff]   ;;  %v14489_v27 = vld [vmem:[#allocation6 + $0x1dc0] ss:$48 sps:$4 sm:$0xff]  }
 0x533   :  { %8996 = vmatmul.mubr.bf16.vlgmr.msra.gmra.mrb[48].mxu0 %v15582_v49  ;;  %9037 = vmatmul.mubr.bf16.vlgmr.msra.gmra.mrb[48].mxu1 %v15582_v49 }
 0x534   :  { %9046 = vmatpush1.bf16.msra.mxu0 %v14399_v29  ;;  %9087 = vmatpush1.bf16.msra.mxu1 %v14402_v33  ;;  %v14492_v29 = vld [vmem:[#allocation6 + $0x1dc8] ss:$48 sps:$4 sm:$0xff]   ;;  %v14497_v33 = vld [vmem:[#allocation6 + $0x1e04] ss:$48 sps:$4 sm:$0xff]  }
 0x535   :  { %9047 = vmatprep.subr.bf16.mxu0 %v14407_v34  ;;  %9088 = vmatprep.subr.bf16.mxu1 %v14410_v52  ;;  %v14500_v34 = vld [vmem:[#allocation6 + $0x1e0c] ss:$48 sps:$4 sm:$0xff]   ;;  %v14495_v52 = vld [vmem:[#allocation6 + $0x1e00] ss:$48 sps:$4 sm:$0xff]  }
 0x536   :  { %9077 = vmatprep.mubr.bf16.mxu0 %v15019_v0  ;;  %9118 = vmatprep.mubr.bf16.mxu1 %v15019_v0 }
 0x538   :  { %9048 = vmatpush1.bf16.msra.mxu0 %v14405_v24  ;;  %9089 = vmatpush1.bf16.msra.mxu1 %v14408_v35  ;;  %v14498_v24 = vld [vmem:[#allocation6 + $0x1e08] ss:$48 sps:$4 sm:$0xff]   ;;  %v14503_v35 = vld [vmem:[#allocation6 + $0x1e64] ss:$48 sps:$4 sm:$0xff]  }
 0x539   :  { %9049 = vmatprep.subr.bf16.mxu0 %v14413_v6  ;;  %9090 = vmatprep.subr.bf16.mxu1 %v14416_v7  ;;  %v14506_v6 = vld [vmem:[#allocation6 + $0x1e6c] ss:$48 sps:$4 sm:$0xff]   ;;  %v14501_v7 = vld [vmem:[#allocation6 + $0x1e60] ss:$48 sps:$4 sm:$0xff]  }
 0x53c   :  { %9050 = vmatpush1.bf16.msra.mxu0 %v14411_v25  ;;  %9091 = vmatpush1.bf16.msra.mxu1 %v14414_v9  ;;  %v14504_v25 = vld [vmem:[#allocation6 + $0x1e68] ss:$48 sps:$4 sm:$0xff]   ;;  %v14509_v9 = vld [vmem:[#allocation6 + $0x1ec4] ss:$48 sps:$4 sm:$0xff]  }
 0x53d   :  { %9051 = vmatprep.subr.bf16.mxu0 %v14419_v36  ;;  %9092 = vmatprep.subr.bf16.mxu1 %v14422_v38  ;;  %v14512_v36 = vld [vmem:[#allocation6 + $0x1ecc] ss:$48 sps:$4 sm:$0xff]   ;;  %v14507_v38 = vld [vmem:[#allocation6 + $0x1ec0] ss:$48 sps:$4 sm:$0xff]  }
 0x540   :  { %9052 = vmatpush1.bf16.msra.mxu0 %v14417_v39  ;;  %9093 = vmatpush1.bf16.msra.mxu1 %v14420_v40  ;;  %v14510_v39 = vld [vmem:[#allocation6 + $0x1ec8] ss:$48 sps:$4 sm:$0xff]   ;;  %v14515_v40 = vld [vmem:[#allocation6 + $0x1f24] ss:$48 sps:$4 sm:$0xff]  }
 0x541   :  { %9053 = vmatprep.subr.bf16.mxu0 %v14425_v41  ;;  %9094 = vmatprep.subr.bf16.mxu1 %v14428_v43  ;;  %v14513_v41 = vld [vmem:[#allocation6 + $0x1f20] ss:$48 sps:$4 sm:$0xff]   ;;  %v14516_v43 = vld [vmem:[#allocation6 + $0x1f28] ss:$48 sps:$4 sm:$0xff]  }
 0x544   :  { %9054 = vmatpush1.bf16.msra.mxu0 %v14423_v48  ;;  %9095 = vmatpush1.bf16.msra.mxu1 %v14426_v51  ;;  %v14521_v48 = vld [vmem:[#allocation6 + $0x1f84] ss:$48 sps:$4 sm:$0xff]   ;;  %v14524_v51 = vld [vmem:[#allocation6 + $0x1f8c] ss:$48 sps:$4 sm:$0xff]  }
 0x545   :  { %9055 = vmatprep.subr.bf16.mxu0 %v14431_v54  ;;  %9096 = vmatprep.subr.bf16.mxu1 %v14434_v55  ;;  %v14519_v54 = vld [vmem:[#allocation6 + $0x1f80] ss:$48 sps:$4 sm:$0xff]   ;;  %v14522_v55 = vld [vmem:[#allocation6 + $0x1f88] ss:$48 sps:$4 sm:$0xff]  }
 0x548   :  { %9056 = vmatpush1.bf16.msra.mxu0 %v14429_v57  ;;  %9097 = vmatpush1.bf16.msra.mxu1 %v14432_v13  ;;  %v14527_v57 = vld [vmem:[#allocation6 + $0x1fe4] ss:$48 sps:$4 sm:$0xff]   ;;  %v14530_v13 = vld [vmem:[#allocation6 + $0x1fec] ss:$48 sps:$4 sm:$0xff]  }
 0x549   :  { %9057 = vmatprep.subr.bf16.mxu0 %v14437_v56  ;;  %9098 = vmatprep.subr.bf16.mxu1 %v14440_v58  ;;  %v14525_v56 = vld [vmem:[#allocation6 + $0x1fe0] ss:$48 sps:$4 sm:$0xff]   ;;  %v14528_v58 = vld [vmem:[#allocation6 + $0x1fe8] ss:$48 sps:$4 sm:$0xff]  }
 0x54c   :  { %9058 = vmatpush1.bf16.msra.mxu0 %v14435_v12  ;;  %9099 = vmatpush1.bf16.msra.mxu1 %v14438_v14  ;;  %v14533_v12 = vld [vmem:[#allocation6 + $0x2044] ss:$48 sps:$4 sm:$0xff]   ;;  %v14536_v14 = vld [vmem:[#allocation6 + $0x204c] ss:$48 sps:$4 sm:$0xff]  }
 0x54d   :  { %9059 = vmatprep.subr.bf16.mxu0 %v14443_v61  ;;  %9100 = vmatprep.subr.bf16.mxu1 %v14446_v37  ;;  %v14531_v61 = vld [vmem:[#allocation6 + $0x2040] ss:$48 sps:$4 sm:$0xff]   ;;  %v14534_v37 = vld [vmem:[#allocation6 + $0x2048] ss:$48 sps:$4 sm:$0xff]  }
 0x550   :  { %9060 = vmatpush1.bf16.msra.mxu0 %v14441_v63  ;;  %9101 = vmatpush1.bf16.msra.mxu1 %v14444_v3  ;;  %v14539_v63 = vld [vmem:[#allocation6 + $0x20a4] ss:$48 sps:$4 sm:$0xff]   ;;  %v14542_v3 = vld [vmem:[#allocation6 + $0x20ac] ss:$48 sps:$4 sm:$0xff]  }
 0x551   :  { %9127 = vmatprep.subr.bf16.mxu0 %v14449_v46  ;;  %9168 = vmatprep.subr.bf16.mxu1 %v14452_v5  ;;  %v14537_v46 = vld [vmem:[#allocation6 + $0x20a0] ss:$48 sps:$4 sm:$0xff]   ;;  %v14540_v5 = vld [vmem:[#allocation6 + $0x20a8] ss:$48 sps:$4 sm:$0xff]  }
 0x553   :  { %9078 = vmatmul.mubr.bf16.vlgmr.msra.gmra.mrb[52].mxu0 %v15582_v49  ;;  %9119 = vmatmul.mubr.bf16.vlgmr.msra.gmra.mrb[52].mxu1 %v15582_v49 }
 0x554   :  { %9128 = vmatpush1.bf16.msra.mxu0 %v14447_v16  ;;  %9169 = vmatpush1.bf16.msra.mxu1 %v14450_v17  ;;  %v14545_v16 = vld [vmem:[#allocation6 + $0x1e14] ss:$48 sps:$4 sm:$0xff]   ;;  %v14548_v17 = vld [vmem:[#allocation6 + $0x1e1c] ss:$48 sps:$4 sm:$0xff]  }
 0x555   :  { %9129 = vmatprep.subr.bf16.mxu0 %v14455_v19  ;;  %9170 = vmatprep.subr.bf16.mxu1 %v14458_v59  ;;  %v14543_v19 = vld [vmem:[#allocation6 + $0x1e10] ss:$48 sps:$4 sm:$0xff]   ;;  %v14546_v59 = vld [vmem:[#allocation6 + $0x1e18] ss:$48 sps:$4 sm:$0xff]  }
 0x556   :  { %9159 = vmatprep.mubr.bf16.mxu0 %v15019_v0  ;;  %9200 = vmatprep.mubr.bf16.mxu1 %v15019_v0 }
 0x558   :  { %9130 = vmatpush1.bf16.msra.mxu0 %v14453_v60  ;;  %9171 = vmatpush1.bf16.msra.mxu1 %v14456_v62  ;;  %v14551_v60 = vld [vmem:[#allocation6 + $0x1e74] ss:$48 sps:$4 sm:$0xff]   ;;  %v14554_v62 = vld [vmem:[#allocation6 + $0x1e7c] ss:$48 sps:$4 sm:$0xff]  }
 0x559   :  { %9131 = vmatprep.subr.bf16.mxu0 %v14461_v8  ;;  %9172 = vmatprep.subr.bf16.mxu1 %v14464_v11  ;;  %v14549_v8 = vld [vmem:[#allocation6 + $0x1e70] ss:$48 sps:$4 sm:$0xff]   ;;  %v14552_v11 = vld [vmem:[#allocation6 + $0x1e78] ss:$48 sps:$4 sm:$0xff]  }
 0x55c   :  { %9132 = vmatpush1.bf16.msra.mxu0 %v14459_v45  ;;  %9173 = vmatpush1.bf16.msra.mxu1 %v14462_v10  ;;  %v14557_v45 = vld [vmem:[#allocation6 + $0x1ed4] ss:$48 sps:$4 sm:$0xff]   ;;  %v14560_v10 = vld [vmem:[#allocation6 + $0x1edc] ss:$48 sps:$4 sm:$0xff]  }
 0x55d   :  { %9133 = vmatprep.subr.bf16.mxu0 %v14467_v15  ;;  %9174 = vmatprep.subr.bf16.mxu1 %v14470_v18  ;;  %v14555_v15 = vld [vmem:[#allocation6 + $0x1ed0] ss:$48 sps:$4 sm:$0xff]   ;;  %v14558_v18 = vld [vmem:[#allocation6 + $0x1ed8] ss:$48 sps:$4 sm:$0xff]  }
 0x560   :  { %9134 = vmatpush1.bf16.msra.mxu0 %v14465_v20  ;;  %9175 = vmatpush1.bf16.msra.mxu1 %v14468_v23  ;;  %v14563_v20 = vld [vmem:[#allocation6 + $0x1f34] ss:$48 sps:$4 sm:$0xff]   ;;  %v14566_v23 = vld [vmem:[#allocation6 + $0x1f3c] ss:$48 sps:$4 sm:$0xff]  }
 0x561   :  { %9135 = vmatprep.subr.bf16.mxu0 %v14473_v28  ;;  %9176 = vmatprep.subr.bf16.mxu1 %v14476_v44  ;;  %v14561_v28 = vld [vmem:[#allocation6 + $0x1f30] ss:$48 sps:$4 sm:$0xff]   ;;  %v14564_v44 = vld [vmem:[#allocation6 + $0x1f38] ss:$48 sps:$4 sm:$0xff]  }
 0x564   :  { %9136 = vmatpush1.bf16.msra.mxu0 %v14471_v47  ;;  %9177 = vmatpush1.bf16.msra.mxu1 %v14474_v30  ;;  %v14569_v47 = vld [vmem:[#allocation6 + $0x1f94] ss:$48 sps:$4 sm:$0xff]   ;;  %v14572_v30 = vld [vmem:[#allocation6 + $0x1f9c] ss:$48 sps:$4 sm:$0xff]  }
 0x565   :  { %9137 = vmatprep.subr.bf16.mxu0 %v14479_v31  ;;  %9178 = vmatprep.subr.bf16.mxu1 %v14482_v21  ;;  %v14567_v31 = vld [vmem:[#allocation6 + $0x1f90] ss:$48 sps:$4 sm:$0xff]   ;;  %v14570_v21 = vld [vmem:[#allocation6 + $0x1f98] ss:$48 sps:$4 sm:$0xff]  }
 0x568   :  { %9138 = vmatpush1.bf16.msra.mxu0 %v14477_v22  ;;  %9179 = vmatpush1.bf16.msra.mxu1 %v14480_v42  ;;  %v14575_v22 = vld [vmem:[#allocation6 + $0x1ff4] ss:$48 sps:$4 sm:$0xff]   ;;  %v14578_v42 = vld [vmem:[#allocation6 + $0x1ffc] ss:$48 sps:$4 sm:$0xff]  }
 0x569   :  { %9139 = vmatprep.subr.bf16.mxu0 %v14485_v32  ;;  %9180 = vmatprep.subr.bf16.mxu1 %v14488_v1  ;;  %v14573_v32 = vld [vmem:[#allocation6 + $0x1ff0] ss:$48 sps:$4 sm:$0xff]   ;;  %v14576_v1 = vld [vmem:[#allocation6 + $0x1ff8] ss:$48 sps:$4 sm:$0xff]  }
 0x56c   :  { %9140 = vmatpush1.bf16.msra.mxu0 %v14483_v2  ;;  %9181 = vmatpush1.bf16.msra.mxu1 %v14486_v4  ;;  %v14581_v2 = vld [vmem:[#allocation6 + $0x2054] ss:$48 sps:$4 sm:$0xff]   ;;  %v14584_v4 = vld [vmem:[#allocation6 + $0x205c] ss:$48 sps:$4 sm:$0xff]  }
 0x56d   :  { %9141 = vmatprep.subr.bf16.mxu0 %v14491_v26  ;;  %9182 = vmatprep.subr.bf16.mxu1 %v14494_v53  ;;  %v14579_v26 = vld [vmem:[#allocation6 + $0x2050] ss:$48 sps:$4 sm:$0xff]   ;;  %v14582_v53 = vld [vmem:[#allocation6 + $0x2058] ss:$48 sps:$4 sm:$0xff]  }
 0x570   :  { %9142 = vmatpush1.bf16.msra.mxu0 %v14489_v27  ;;  %9183 = vmatpush1.bf16.msra.mxu1 %v14492_v29  ;;  %v14587_v27 = vld [vmem:[#allocation6 + $0x20b4] ss:$48 sps:$4 sm:$0xff]   ;;  %v14590_v29 = vld [vmem:[#allocation6 + $0x20bc] ss:$48 sps:$4 sm:$0xff]  }
 0x571   :  { %9798 = vmatprep.subr.bf16.mxu0 %v14497_v33  ;;  %9839 = vmatprep.subr.bf16.mxu1 %v14500_v34  ;;  %v14585_v33 = vld [vmem:[#allocation6 + $0x20b0] ss:$48 sps:$4 sm:$0xff]   ;;  %v14588_v34 = vld [vmem:[#allocation6 + $0x20b8] ss:$48 sps:$4 sm:$0xff]  }
 0x573   :  { %9160 = vmatmul.mubr.bf16.vlgmr.msra.gmra.mrb[56].mxu0 %v15582_v49  ;;  %9201 = vmatmul.mubr.bf16.vlgmr.msra.gmra.mrb[56].mxu1 %v15582_v49  ;;  %v14518_v49 = vld [vmem:[#allocation6 + $0x1f2c] ss:$48 sps:$4 sm:$0xff]  }
 0x574   :  { %9799 = vmatpush1.bf16.msra.mxu0 %v14495_v52  ;;  %9840 = vmatpush1.bf16.msra.mxu1 %v14498_v24  ;;  %v14593_v52 = vld [vmem:[#allocation6 + $0x1e24] ss:$48 sps:$4 sm:$0xff]   ;;  %v14596_v24 = vld [vmem:[#allocation6 + $0x1e2c] ss:$48 sps:$4 sm:$0xff]  }
 0x575   :  { %9800 = vmatprep.subr.bf16.mxu0 %v14503_v35  ;;  %9841 = vmatprep.subr.bf16.mxu1 %v14506_v6  ;;  %v14591_v35 = vld [vmem:[#allocation6 + $0x1e20] ss:$48 sps:$4 sm:$0xff]   ;;  %v14594_v6 = vld [vmem:[#allocation6 + $0x1e28] ss:$48 sps:$4 sm:$0xff]  }
 0x576   :  { %9830 = vmatprep.mubr.bf16.mxu0 %v15019_v0  ;;  %9871 = vmatprep.mubr.bf16.mxu1 %v15019_v0 }
 0x578   :  { %9801 = vmatpush1.bf16.msra.mxu0 %v14501_v7  ;;  %9842 = vmatpush1.bf16.msra.mxu1 %v14504_v25  ;;  %v14599_v7 = vld [vmem:[#allocation6 + $0x1e84] ss:$48 sps:$4 sm:$0xff]   ;;  %v14602_v25 = vld [vmem:[#allocation6 + $0x1e8c] ss:$48 sps:$4 sm:$0xff]  }
 0x579   :  { %9802 = vmatprep.subr.bf16.mxu0 %v14509_v9  ;;  %9843 = vmatprep.subr.bf16.mxu1 %v14512_v36  ;;  %v14597_v9 = vld [vmem:[#allocation6 + $0x1e80] ss:$48 sps:$4 sm:$0xff]   ;;  %v14600_v36 = vld [vmem:[#allocation6 + $0x1e88] ss:$48 sps:$4 sm:$0xff]  }
 0x57c   :  { %9803 = vmatpush1.bf16.msra.mxu0 %v14507_v38  ;;  %9844 = vmatpush1.bf16.msra.mxu1 %v14510_v39  ;;  %v14605_v38 = vld [vmem:[#allocation6 + $0x1ee4] ss:$48 sps:$4 sm:$0xff]   ;;  %v14608_v39 = vld [vmem:[#allocation6 + $0x1eec] ss:$48 sps:$4 sm:$0xff]  }
 0x57d   :  { %9804 = vmatprep.subr.bf16.mxu0 %v14515_v40  ;;  %9845 = vmatprep.subr.bf16.mxu1 %v14518_v49  ;;  %v14603_v40 = vld [vmem:[#allocation6 + $0x1ee0] ss:$48 sps:$4 sm:$0xff]   ;;  %v14606_v49 = vld [vmem:[#allocation6 + $0x1ee8] ss:$48 sps:$4 sm:$0xff]  }
 0x580   :  { %9805 = vmatpush1.bf16.msra.mxu0 %v14513_v41  ;;  %9846 = vmatpush1.bf16.msra.mxu1 %v14516_v43  ;;  %v14611_v41 = vld [vmem:[#allocation6 + $0x1f44] ss:$48 sps:$4 sm:$0xff]   ;;  %v14614_v43 = vld [vmem:[#allocation6 + $0x1f4c] ss:$48 sps:$4 sm:$0xff]  }
 0x581   :  { %9806 = vmatprep.subr.bf16.mxu0 %v14521_v48  ;;  %9847 = vmatprep.subr.bf16.mxu1 %v14524_v51  ;;  %v14609_v48 = vld [vmem:[#allocation6 + $0x1f40] ss:$48 sps:$4 sm:$0xff]   ;;  %v14612_v51 = vld [vmem:[#allocation6 + $0x1f48] ss:$48 sps:$4 sm:$0xff]  }
 0x584   :  { %9807 = vmatpush1.bf16.msra.mxu0 %v14519_v54  ;;  %9848 = vmatpush1.bf16.msra.mxu1 %v14522_v55  ;;  %v14617_v54 = vld [vmem:[#allocation6 + $0x1fa4] ss:$48 sps:$4 sm:$0xff]   ;;  %v14620_v55 = vld [vmem:[#allocation6 + $0x1fac] ss:$48 sps:$4 sm:$0xff]  }
 0x585   :  { %9808 = vmatprep.subr.bf16.mxu0 %v14527_v57  ;;  %9849 = vmatprep.subr.bf16.mxu1 %v14530_v13  ;;  %v14615_v57 = vld [vmem:[#allocation6 + $0x1fa0] ss:$48 sps:$4 sm:$0xff]   ;;  %v14618_v13 = vld [vmem:[#allocation6 + $0x1fa8] ss:$48 sps:$4 sm:$0xff]  }
 0x588   :  { %9809 = vmatpush1.bf16.msra.mxu0 %v14525_v56  ;;  %9850 = vmatpush1.bf16.msra.mxu1 %v14528_v58  ;;  %v14623_v56 = vld [vmem:[#allocation6 + $0x2004] ss:$48 sps:$4 sm:$0xff]   ;;  %v14626_v58 = vld [vmem:[#allocation6 + $0x200c] ss:$48 sps:$4 sm:$0xff]  }
 0x589   :  { %9810 = vmatprep.subr.bf16.mxu0 %v14533_v12  ;;  %9851 = vmatprep.subr.bf16.mxu1 %v14536_v14  ;;  %v14621_v12 = vld [vmem:[#allocation6 + $0x2000] ss:$48 sps:$4 sm:$0xff]   ;;  %v14624_v14 = vld [vmem:[#allocation6 + $0x2008] ss:$48 sps:$4 sm:$0xff]  }
 0x58c   :  { %9811 = vmatpush1.bf16.msra.mxu0 %v14531_v61  ;;  %9852 = vmatpush1.bf16.msra.mxu1 %v14534_v37  ;;  %v14629_v61 = vld [vmem:[#allocation6 + $0x2064] ss:$48 sps:$4 sm:$0xff]   ;;  %v14632_v37 = vld [vmem:[#allocation6 + $0x206c] ss:$48 sps:$4 sm:$0xff]  }
 0x58d   :  { %9812 = vmatprep.subr.bf16.mxu0 %v14539_v63  ;;  %9853 = vmatprep.subr.bf16.mxu1 %v14542_v3  ;;  %v14627_v63 = vld [vmem:[#allocation6 + $0x2060] ss:$48 sps:$4 sm:$0xff]   ;;  %v14630_v3 = vld [vmem:[#allocation6 + $0x2068] ss:$48 sps:$4 sm:$0xff]  }
 0x590   :  { %9813 = vmatpush1.bf16.msra.mxu0 %v14537_v46  ;;  %9854 = vmatpush1.bf16.msra.mxu1 %v14540_v5  ;;  %v14635_v46 = vld [vmem:[#allocation6 + $0x20c4] ss:$48 sps:$4 sm:$0xff]   ;;  %v14638_v5 = vld [vmem:[#allocation6 + $0x20cc] ss:$48 sps:$4 sm:$0xff]  }
 0x591   :  { %9880 = vmatprep.subr.bf16.mxu0 %v14545_v16  ;;  %9921 = vmatprep.subr.bf16.mxu1 %v14548_v17  ;;  %v14633_v16 = vld [vmem:[#allocation6 + $0x20c0] ss:$48 sps:$4 sm:$0xff]   ;;  %v14636_v17 = vld [vmem:[#allocation6 + $0x20c8] ss:$48 sps:$4 sm:$0xff]  }
 0x593   :  { %9831 = vmatmul.mubr.bf16.vlgmr.msra.gmra.mrb[48].mxu0 %v15470_v50  ;;  %9872 = vmatmul.mubr.bf16.vlgmr.msra.gmra.mrb[48].mxu1 %v15470_v50 }
 0x594   :  { %9881 = vmatpush1.bf16.msra.mxu0 %v14543_v19  ;;  %9922 = vmatpush1.bf16.msra.mxu1 %v14546_v59  ;;  %v14641_v19 = vld [vmem:[#allocation6 + $0x2104] ss:$48 sps:$4 sm:$0xff]   ;;  %v14644_v59 = vld [vmem:[#allocation6 + $0x210c] ss:$48 sps:$4 sm:$0xff]  }
 0x595   :  { %9882 = vmatprep.subr.bf16.mxu0 %v14551_v60  ;;  %9923 = vmatprep.subr.bf16.mxu1 %v14554_v62  ;;  %v14639_v60 = vld [vmem:[#allocation6 + $0x2100] ss:$48 sps:$4 sm:$0xff]   ;;  %v14642_v62 = vld [vmem:[#allocation6 + $0x2108] ss:$48 sps:$4 sm:$0xff]  }
 0x596   :  { %9912 = vmatprep.mubr.bf16.mxu0 %v15019_v0  ;;  %9953 = vmatprep.mubr.bf16.mxu1 %v15019_v0 }
 0x598   :  { %9883 = vmatpush1.bf16.msra.mxu0 %v14549_v8  ;;  %9924 = vmatpush1.bf16.msra.mxu1 %v14552_v11  ;;  %v14647_v8 = vld [vmem:[#allocation6 + $0x2164] ss:$48 sps:$4 sm:$0xff]   ;;  %v14650_v11 = vld [vmem:[#allocation6 + $0x216c] ss:$48 sps:$4 sm:$0xff]  }
 0x599   :  { %9884 = vmatprep.subr.bf16.mxu0 %v14557_v45  ;;  %9925 = vmatprep.subr.bf16.mxu1 %v14560_v10  ;;  %v14645_v45 = vld [vmem:[#allocation6 + $0x2160] ss:$48 sps:$4 sm:$0xff]   ;;  %v14648_v10 = vld [vmem:[#allocation6 + $0x2168] ss:$48 sps:$4 sm:$0xff]  }
 0x59c   :  { %9885 = vmatpush1.bf16.msra.mxu0 %v14555_v15  ;;  %9926 = vmatpush1.bf16.msra.mxu1 %v14558_v18  ;;  %v14653_v15 = vld [vmem:[#allocation6 + $0x21c4] ss:$48 sps:$4 sm:$0xff]   ;;  %v14656_v18 = vld [vmem:[#allocation6 + $0x21cc] ss:$48 sps:$4 sm:$0xff]  }
 0x59d   :  { %9886 = vmatprep.subr.bf16.mxu0 %v14563_v20  ;;  %9927 = vmatprep.subr.bf16.mxu1 %v14566_v23  ;;  %v14651_v20 = vld [vmem:[#allocation6 + $0x21c0] ss:$48 sps:$4 sm:$0xff]   ;;  %v14654_v23 = vld [vmem:[#allocation6 + $0x21c8] ss:$48 sps:$4 sm:$0xff]  }
 0x5a0   :  { %9887 = vmatpush1.bf16.msra.mxu0 %v14561_v28  ;;  %9928 = vmatpush1.bf16.msra.mxu1 %v14564_v44  ;;  %v14659_v28 = vld [vmem:[#allocation6 + $0x2224] ss:$48 sps:$4 sm:$0xff]   ;;  %v14662_v44 = vld [vmem:[#allocation6 + $0x222c] ss:$48 sps:$4 sm:$0xff]  }
 0x5a1   :  { %9888 = vmatprep.subr.bf16.mxu0 %v14569_v47  ;;  %9929 = vmatprep.subr.bf16.mxu1 %v14572_v30  ;;  %v14657_v47 = vld [vmem:[#allocation6 + $0x2220] ss:$48 sps:$4 sm:$0xff]   ;;  %v14660_v30 = vld [vmem:[#allocation6 + $0x2228] ss:$48 sps:$4 sm:$0xff]  }
 0x5a4   :  { %9889 = vmatpush1.bf16.msra.mxu0 %v14567_v31  ;;  %9930 = vmatpush1.bf16.msra.mxu1 %v14570_v21  ;;  %v14665_v31 = vld [vmem:[#allocation6 + $0x2284] ss:$48 sps:$4 sm:$0xff]   ;;  %v14668_v21 = vld [vmem:[#allocation6 + $0x228c] ss:$48 sps:$4 sm:$0xff]  }
 0x5a5   :  { %9890 = vmatprep.subr.bf16.mxu0 %v14575_v22  ;;  %9931 = vmatprep.subr.bf16.mxu1 %v14578_v42  ;;  %v14663_v22 = vld [vmem:[#allocation6 + $0x2280] ss:$48 sps:$4 sm:$0xff]   ;;  %v14666_v42 = vld [vmem:[#allocation6 + $0x2288] ss:$48 sps:$4 sm:$0xff]  }
 0x5a8   :  { %9891 = vmatpush1.bf16.msra.mxu0 %v14573_v32  ;;  %9932 = vmatpush1.bf16.msra.mxu1 %v14576_v1  ;;  %v14671_v32 = vld [vmem:[#allocation6 + $0x22e4] ss:$48 sps:$4 sm:$0xff]   ;;  %v14674_v1 = vld [vmem:[#allocation6 + $0x22ec] ss:$48 sps:$4 sm:$0xff]  }
 0x5a9   :  { %9892 = vmatprep.subr.bf16.mxu0 %v14581_v2  ;;  %9933 = vmatprep.subr.bf16.mxu1 %v14584_v4  ;;  %v14669_v2 = vld [vmem:[#allocation6 + $0x22e0] ss:$48 sps:$4 sm:$0xff]   ;;  %v14672_v4 = vld [vmem:[#allocation6 + $0x22e8] ss:$48 sps:$4 sm:$0xff]  }
 0x5ac   :  { %9893 = vmatpush1.bf16.msra.mxu0 %v14579_v26  ;;  %9934 = vmatpush1.bf16.msra.mxu1 %v14582_v53  ;;  %v14677_v26 = vld [vmem:[#allocation6 + $0x2344] ss:$48 sps:$4 sm:$0xff]   ;;  %v14680_v53 = vld [vmem:[#allocation6 + $0x234c] ss:$48 sps:$4 sm:$0xff]  }
 0x5ad   :  { %9894 = vmatprep.subr.bf16.mxu0 %v14587_v27  ;;  %9935 = vmatprep.subr.bf16.mxu1 %v14590_v29  ;;  %v14675_v27 = vld [vmem:[#allocation6 + $0x2340] ss:$48 sps:$4 sm:$0xff]   ;;  %v14678_v29 = vld [vmem:[#allocation6 + $0x2348] ss:$48 sps:$4 sm:$0xff]  }
 0x5b0   :  { %9895 = vmatpush1.bf16.msra.mxu0 %v14585_v33  ;;  %9936 = vmatpush1.bf16.msra.mxu1 %v14588_v34  ;;  %v14683_v33 = vld [vmem:[#allocation6 + $0x23a4] ss:$48 sps:$4 sm:$0xff]   ;;  %v14686_v34 = vld [vmem:[#allocation6 + $0x23ac] ss:$48 sps:$4 sm:$0xff]  }
 0x5b1   :  { %9962 = vmatprep.subr.bf16.mxu0 %v14593_v52  ;;  %10003 = vmatprep.subr.bf16.mxu1 %v14596_v24  ;;  %v14681_v52 = vld [vmem:[#allocation6 + $0x23a0] ss:$48 sps:$4 sm:$0xff]   ;;  %v14684_v24 = vld [vmem:[#allocation6 + $0x23a8] ss:$48 sps:$4 sm:$0xff]  }
 0x5b3   :  { %9913 = vmatmul.mubr.bf16.vlgmr.msra.gmra.mrb[52].mxu0 %v15470_v50  ;;  %9954 = vmatmul.mubr.bf16.vlgmr.msra.gmra.mrb[52].mxu1 %v15470_v50 }
 0x5b4   :  { %9963 = vmatpush1.bf16.msra.mxu0 %v14591_v35  ;;  %10004 = vmatpush1.bf16.msra.mxu1 %v14594_v6  ;;  %v14689_v35 = vld [vmem:[#allocation6 + $0x2114] ss:$48 sps:$4 sm:$0xff]   ;;  %v14692_v6 = vld [vmem:[#allocation6 + $0x211c] ss:$48 sps:$4 sm:$0xff]  }
 0x5b5   :  { %9964 = vmatprep.subr.bf16.mxu0 %v14599_v7  ;;  %10005 = vmatprep.subr.bf16.mxu1 %v14602_v25  ;;  %v14687_v7 = vld [vmem:[#allocation6 + $0x2110] ss:$48 sps:$4 sm:$0xff]   ;;  %v14690_v25 = vld [vmem:[#allocation6 + $0x2118] ss:$48 sps:$4 sm:$0xff]  }
 0x5b6   :  { %9994 = vmatprep.mubr.bf16.mxu0 %v15019_v0  ;;  %10035 = vmatprep.mubr.bf16.mxu1 %v15019_v0 }
 0x5b8   :  { %9965 = vmatpush1.bf16.msra.mxu0 %v14597_v9  ;;  %10006 = vmatpush1.bf16.msra.mxu1 %v14600_v36  ;;  %v15609_v9 = vrot.slane %v15470_v50, 4  ;;  %v14695_v36 = vld [vmem:[#allocation6 + $0x2174] ss:$48 sps:$4 sm:$0xff]  }
 0x5b9   :  { %9966 = vmatprep.subr.bf16.mxu0 %v14605_v38  ;;  %10007 = vmatprep.subr.bf16.mxu1 %v14608_v39  ;;  %v14698_v38 = vld [vmem:[#allocation6 + $0x217c] ss:$48 sps:$4 sm:$0xff]   ;;  %v14693_v39 = vld [vmem:[#allocation6 + $0x2170] ss:$48 sps:$4 sm:$0xff]  }
 0x5bc   :  { %9967 = vmatpush1.bf16.msra.mxu0 %v14603_v40  ;;  %10008 = vmatpush1.bf16.msra.mxu1 %v14606_v49  ;;  %v14696_v40 = vld [vmem:[#allocation6 + $0x2178] ss:$48 sps:$4 sm:$0xff]   ;;  %v14701_v49 = vld [vmem:[#allocation6 + $0x21d4] ss:$48 sps:$4 sm:$0xff]  }
 0x5bd   :  { %9968 = vmatprep.subr.bf16.mxu0 %v14611_v41  ;;  %10009 = vmatprep.subr.bf16.mxu1 %v14614_v43  ;;  %v14704_v41 = vld [vmem:[#allocation6 + $0x21dc] ss:$48 sps:$4 sm:$0xff]   ;;  %v14702_v43 = vld [vmem:[#allocation6 + $0x21d8] ss:$48 sps:$4 sm:$0xff]  }
 0x5c0   :  { %9969 = vmatpush1.bf16.msra.mxu0 %v14609_v48  ;;  %10010 = vmatpush1.bf16.msra.mxu1 %v14612_v51  ;;  %v14707_v48 = vld [vmem:[#allocation6 + $0x2234] ss:$48 sps:$4 sm:$0xff]   ;;  %v14710_v51 = vld [vmem:[#allocation6 + $0x223c] ss:$48 sps:$4 sm:$0xff]  }
 0x5c1   :  { %9970 = vmatprep.subr.bf16.mxu0 %v14617_v54  ;;  %10011 = vmatprep.subr.bf16.mxu1 %v14620_v55  ;;  %v14705_v54 = vld [vmem:[#allocation6 + $0x2230] ss:$48 sps:$4 sm:$0xff]   ;;  %v14708_v55 = vld [vmem:[#allocation6 + $0x2238] ss:$48 sps:$4 sm:$0xff]  }
 0x5c4   :  { %9971 = vmatpush1.bf16.msra.mxu0 %v14615_v57  ;;  %10012 = vmatpush1.bf16.msra.mxu1 %v14618_v13  ;;  %v14713_v57 = vld [vmem:[#allocation6 + $0x2294] ss:$48 sps:$4 sm:$0xff]   ;;  %v14716_v13 = vld [vmem:[#allocation6 + $0x229c] ss:$48 sps:$4 sm:$0xff]  }
 0x5c5   :  { %9972 = vmatprep.subr.bf16.mxu0 %v14623_v56  ;;  %10013 = vmatprep.subr.bf16.mxu1 %v14626_v58  ;;  %v14711_v56 = vld [vmem:[#allocation6 + $0x2290] ss:$48 sps:$4 sm:$0xff]   ;;  %v14714_v58 = vld [vmem:[#allocation6 + $0x2298] ss:$48 sps:$4 sm:$0xff]  }
 0x5c8   :  { %9973 = vmatpush1.bf16.msra.mxu0 %v14621_v12  ;;  %10014 = vmatpush1.bf16.msra.mxu1 %v14624_v14  ;;  %v14719_v12 = vld [vmem:[#allocation6 + $0x22f4] ss:$48 sps:$4 sm:$0xff]   ;;  %v14722_v14 = vld [vmem:[#allocation6 + $0x22fc] ss:$48 sps:$4 sm:$0xff]  }
 0x5c9   :  { %9974 = vmatprep.subr.bf16.mxu0 %v14629_v61  ;;  %10015 = vmatprep.subr.bf16.mxu1 %v14632_v37  ;;  %v14717_v61 = vld [vmem:[#allocation6 + $0x22f0] ss:$48 sps:$4 sm:$0xff]   ;;  %v14720_v37 = vld [vmem:[#allocation6 + $0x22f8] ss:$48 sps:$4 sm:$0xff]  }
 0x5cc   :  { %9975 = vmatpush1.bf16.msra.mxu0 %v14627_v63  ;;  %10016 = vmatpush1.bf16.msra.mxu1 %v14630_v3  ;;  %v14725_v63 = vld [vmem:[#allocation6 + $0x2354] ss:$48 sps:$4 sm:$0xff]   ;;  %v14728_v3 = vld [vmem:[#allocation6 + $0x235c] ss:$48 sps:$4 sm:$0xff]  }
 0x5cd   :  { %9976 = vmatprep.subr.bf16.mxu0 %v14635_v46  ;;  %10017 = vmatprep.subr.bf16.mxu1 %v14638_v5  ;;  %v14723_v46 = vld [vmem:[#allocation6 + $0x2350] ss:$48 sps:$4 sm:$0xff]   ;;  %v14726_v5 = vld [vmem:[#allocation6 + $0x2358] ss:$48 sps:$4 sm:$0xff]  }
 0x5d0   :  { %9977 = vmatpush1.bf16.msra.mxu0 %v14633_v16  ;;  %10018 = vmatpush1.bf16.msra.mxu1 %v14636_v17  ;;  %v14731_v16 = vld [vmem:[#allocation6 + $0x23b4] ss:$48 sps:$4 sm:$0xff]   ;;  %v14734_v17 = vld [vmem:[#allocation6 + $0x23bc] ss:$48 sps:$4 sm:$0xff]  }
 0x5d1   :  { %10636 = vmatprep.subr.bf16.mxu0 %v14641_v19  ;;  %10677 = vmatprep.subr.bf16.mxu1 %v14644_v59  ;;  %v14729_v19 = vld [vmem:[#allocation6 + $0x23b0] ss:$48 sps:$4 sm:$0xff]   ;;  %v14732_v59 = vld [vmem:[#allocation6 + $0x23b8] ss:$48 sps:$4 sm:$0xff]  }
 0x5d3   :  { %9995 = vmatmul.mubr.bf16.vlgmr.msra.gmra.mrb[56].mxu0 %v15470_v50  ;;  %10036 = vmatmul.mubr.bf16.vlgmr.msra.gmra.mrb[56].mxu1 %v15470_v50  ;;  %v14699_v50 = vld [vmem:[#allocation6 + $0x21d0] ss:$48 sps:$4 sm:$0xff]  }
 0x5d4   :  { %10637 = vmatpush1.bf16.msra.mxu0 %v14639_v60  ;;  %10678 = vmatpush1.bf16.msra.mxu1 %v14642_v62  ;;  %v14737_v60 = vld [vmem:[#allocation6 + $0x2124] ss:$48 sps:$4 sm:$0xff]   ;;  %v14740_v62 = vld [vmem:[#allocation6 + $0x212c] ss:$48 sps:$4 sm:$0xff]  }
 0x5d5   :  { %10638 = vmatprep.subr.bf16.mxu0 %v14647_v8  ;;  %10679 = vmatprep.subr.bf16.mxu1 %v14650_v11  ;;  %v14735_v8 = vld [vmem:[#allocation6 + $0x2120] ss:$48 sps:$4 sm:$0xff]   ;;  %v14738_v11 = vld [vmem:[#allocation6 + $0x2128] ss:$48 sps:$4 sm:$0xff]  }
 0x5d6   :  { %10668 = vmatprep.mubr.bf16.mxu0 %v15019_v0  ;;  %10709 = vmatprep.mubr.bf16.mxu1 %v15019_v0 }
 0x5d8   :  { %10639 = vmatpush1.bf16.msra.mxu0 %v14645_v45  ;;  %10680 = vmatpush1.bf16.msra.mxu1 %v14648_v10  ;;  %v14743_v45 = vld [vmem:[#allocation6 + $0x2184] ss:$48 sps:$4 sm:$0xff]   ;;  %v14746_v10 = vld [vmem:[#allocation6 + $0x218c] ss:$48 sps:$4 sm:$0xff]  }
 0x5d9   :  { %10640 = vmatprep.subr.bf16.mxu0 %v14653_v15  ;;  %10681 = vmatprep.subr.bf16.mxu1 %v14656_v18  ;;  %v14741_v15 = vld [vmem:[#allocation6 + $0x2180] ss:$48 sps:$4 sm:$0xff]   ;;  %v14744_v18 = vld [vmem:[#allocation6 + $0x2188] ss:$48 sps:$4 sm:$0xff]  }
 0x5dc   :  { %10641 = vmatpush1.bf16.msra.mxu0 %v14651_v20  ;;  %10682 = vmatpush1.bf16.msra.mxu1 %v14654_v23  ;;  %v14749_v20 = vld [vmem:[#allocation6 + $0x21e4] ss:$48 sps:$4 sm:$0xff]   ;;  %v14752_v23 = vld [vmem:[#allocation6 + $0x21ec] ss:$48 sps:$4 sm:$0xff]  }
 0x5dd   :  { %10642 = vmatprep.subr.bf16.mxu0 %v14659_v28  ;;  %10683 = vmatprep.subr.bf16.mxu1 %v14662_v44  ;;  %v14747_v28 = vld [vmem:[#allocation6 + $0x21e0] ss:$48 sps:$4 sm:$0xff]   ;;  %v14750_v44 = vld [vmem:[#allocation6 + $0x21e8] ss:$48 sps:$4 sm:$0xff]  }
 0x5e0   :  { %10643 = vmatpush1.bf16.msra.mxu0 %v14657_v47  ;;  %10684 = vmatpush1.bf16.msra.mxu1 %v14660_v30  ;;  %v14755_v47 = vld [vmem:[#allocation6 + $0x2244] ss:$48 sps:$4 sm:$0xff]   ;;  %v14758_v30 = vld [vmem:[#allocation6 + $0x224c] ss:$48 sps:$4 sm:$0xff]  }
 0x5e1   :  { %10644 = vmatprep.subr.bf16.mxu0 %v14665_v31  ;;  %10685 = vmatprep.subr.bf16.mxu1 %v14668_v21  ;;  %v14753_v31 = vld [vmem:[#allocation6 + $0x2240] ss:$48 sps:$4 sm:$0xff]   ;;  %v14756_v21 = vld [vmem:[#allocation6 + $0x2248] ss:$48 sps:$4 sm:$0xff]  }
 0x5e4   :  { %10645 = vmatpush1.bf16.msra.mxu0 %v14663_v22  ;;  %10686 = vmatpush1.bf16.msra.mxu1 %v14666_v42  ;;  %v14761_v22 = vld [vmem:[#allocation6 + $0x22a4] ss:$48 sps:$4 sm:$0xff]   ;;  %v14764_v42 = vld [vmem:[#allocation6 + $0x22ac] ss:$48 sps:$4 sm:$0xff]  }
 0x5e5   :  { %10646 = vmatprep.subr.bf16.mxu0 %v14671_v32  ;;  %10687 = vmatprep.subr.bf16.mxu1 %v14674_v1  ;;  %v14759_v32 = vld [vmem:[#allocation6 + $0x22a0] ss:$48 sps:$4 sm:$0xff]   ;;  %v14767_v1 = vld [vmem:[#allocation6 + $0x2304] ss:$48 sps:$4 sm:$0xff]  }
 0x5e8   :  { %10647 = vmatpush1.bf16.msra.mxu0 %v14669_v2  ;;  %10688 = vmatpush1.bf16.msra.mxu1 %v14672_v4  ;;  %v14770_v2 = vld [vmem:[#allocation6 + $0x230c] ss:$48 sps:$4 sm:$0xff]   ;;  %v14765_v4 = vld [vmem:[#allocation6 + $0x2300] ss:$48 sps:$4 sm:$0xff]  }
 0x5e9   :  { %10648 = vmatprep.subr.bf16.mxu0 %v14677_v26  ;;  %10689 = vmatprep.subr.bf16.mxu1 %v14680_v53  ;;  %v14768_v26 = vld [vmem:[#allocation6 + $0x2308] ss:$48 sps:$4 sm:$0xff]   ;;  %v14773_v53 = vld [vmem:[#allocation6 + $0x2364] ss:$48 sps:$4 sm:$0xff]  }
 0x5ec   :  { %10649 = vmatpush1.bf16.msra.mxu0 %v14675_v27  ;;  %10690 = vmatpush1.bf16.msra.mxu1 %v14678_v29  ;;  %v14776_v27 = vld [vmem:[#allocation6 + $0x236c] ss:$48 sps:$4 sm:$0xff]   ;;  %v14771_v29 = vld [vmem:[#allocation6 + $0x2360] ss:$48 sps:$4 sm:$0xff]  }
 0x5ed   :  { %10650 = vmatprep.subr.bf16.mxu0 %v14683_v33  ;;  %10691 = vmatprep.subr.bf16.mxu1 %v14686_v34  ;;  %v14774_v33 = vld [vmem:[#allocation6 + $0x2368] ss:$48 sps:$4 sm:$0xff]   ;;  %v14779_v34 = vld [vmem:[#allocation6 + $0x23c4] ss:$48 sps:$4 sm:$0xff]  }
 0x5f0   :  { %10651 = vmatpush1.bf16.msra.mxu0 %v14681_v52  ;;  %10692 = vmatpush1.bf16.msra.mxu1 %v14684_v24  ;;  %v14782_v52 = vld [vmem:[#allocation6 + $0x23cc] ss:$48 sps:$4 sm:$0xff]   ;;  %v14777_v24 = vld [vmem:[#allocation6 + $0x23c0] ss:$48 sps:$4 sm:$0xff]  }
 0x5f1   :  { %10718 = vmatprep.subr.bf16.mxu0 %v14689_v35  ;;  %10759 = vmatprep.subr.bf16.mxu1 %v14692_v6  ;;  %v14780_v35 = vld [vmem:[#allocation6 + $0x23c8] ss:$48 sps:$4 sm:$0xff]  }
 0x5f2   :  { %v14783_v6 = vld [vmem:[#allocation9 + $0x40] sm:$0xff]  }
 0x5f3   :  { %10669 = vmatmul.mubr.bf16.vlgmr.msra.gmra.mrb[48].mxu0 %v15609_v9  ;;  %10710 = vmatmul.mubr.bf16.vlgmr.msra.gmra.mrb[48].mxu1 %v15609_v9 }
 0x5f4   :  { %10719 = vmatpush1.bf16.msra.mxu0 %v14687_v7  ;;  %10760 = vmatpush1.bf16.msra.mxu1 %v14690_v25  ;;  %v14784_v7 = vld [vmem:[#allocation9] sm:$0xff]  }
 0x5f5   :  { %10720 = vmatprep.subr.bf16.mxu0 %v14695_v36  ;;  %10761 = vmatprep.subr.bf16.mxu1 %v14698_v38  ;;  %v14785_v25 = vld [vmem:[#allocation9 + $0x80] sm:$0xff]   ;;  %v15020_v36 = vmov 0.0   ;;  %v14786_v38 = vld [vmem:[#allocation9 + $0x48] sm:$0xff]  }
 0x5f6   :  { %10750 = vmatprep.mubr.bf16.mxu0 %v15019_v0  ;;  %10791 = vmatprep.mubr.bf16.mxu1 %v15019_v0 }
 0x5f8   :  { %10721 = vmatpush1.bf16.msra.mxu0 %v14693_v39  ;;  %10762 = vmatpush1.bf16.msra.mxu1 %v14696_v40  ;;  %v14788_v39 = vld [vmem:[#allocation9 + $0x88] sm:$0xff]  }
 0x5f9   :  { %10722 = vmatprep.subr.bf16.mxu0 %v14701_v49  ;;  %10763 = vmatprep.subr.bf16.mxu1 %v14704_v41  ;;  %v14787_v40 = vld [vmem:[#allocation9 + $0x8] sm:$0xff]   ;;  %v14789_v49 = vld [vmem:[#allocation9 + $0x50] sm:$0xff]  }
 0x5fa   :  { %v14791_v41 = vld [vmem:[#allocation9 + $0x90] sm:$0xff]  }
 0x5fc   :  { %10723 = vmatpush1.bf16.msra.mxu0 %v14699_v50  ;;  %10764 = vmatpush1.bf16.msra.mxu1 %v14702_v43  ;;  %v14792_v50 = vld [vmem:[#allocation9 + $0x58] sm:$0xff]  }
 0x5fd   :  { %10724 = vmatprep.subr.bf16.mxu0 %v14707_v48  ;;  %10765 = vmatprep.subr.bf16.mxu1 %v14710_v51  ;;  %v14794_v43 = vld [vmem:[#allocation9 + $0x98] sm:$0xff]   ;;  %v14795_v51 = vld [vmem:[#allocation9 + $0x60] sm:$0xff]  }
 0x5fe   :  { %v14793_v48 = vld [vmem:[#allocation9 + $0x18] sm:$0xff]  }
 0x600   :  { %10725 = vmatpush1.bf16.msra.mxu0 %v14705_v54  ;;  %10766 = vmatpush1.bf16.msra.mxu1 %v14708_v55  ;;  %v14797_v54 = vld [vmem:[#allocation9 + $0xa0] sm:$0xff]  }
 0x601   :  { %10726 = vmatprep.subr.bf16.mxu0 %v14713_v57  ;;  %10767 = vmatprep.subr.bf16.mxu1 %v14716_v13  ;;  %v14796_v55 = vld [vmem:[#allocation9 + $0x20] sm:$0xff]   ;;  %v14798_v57 = vld [vmem:[#allocation9 + $0x68] sm:$0xff]  }
 0x602   :  { %v14799_v13 = vld [vmem:[#allocation9 + $0x28] sm:$0xff]  }
 0x604   :  { %10727 = vmatpush1.bf16.msra.mxu0 %v14711_v56  ;;  %10768 = vmatpush1.bf16.msra.mxu1 %v14714_v58  ;;  %v14800_v56 = vld [vmem:[#allocation9 + $0xa8] sm:$0xff]   ;;  %v14801_v58 = vld [vmem:[#allocation9 + $0x70] sm:$0xff]  }
 0x605   :  { %10728 = vmatprep.subr.bf16.mxu0 %v14719_v12  ;;  %10769 = vmatprep.subr.bf16.mxu1 %v14722_v14  ;;  %v14802_v12 = vld [vmem:[#allocation9 + $0x30] sm:$0xff]  }
 0x606   :  { %v14803_v14 = vld [vmem:[#allocation9 + $0xb0] sm:$0xff]  }
 0x608   :  { %10729 = vmatpush1.bf16.msra.mxu0 %v14717_v61  ;;  %10770 = vmatpush1.bf16.msra.mxu1 %v14720_v37  ;;  %v14804_v61 = vld [vmem:[#allocation9 + $0x78] sm:$0xff]  }
 0x609   :  { %10730 = vmatprep.subr.bf16.mxu0 %v14725_v63  ;;  %10771 = vmatprep.subr.bf16.mxu1 %v14728_v3  ;;  %v14805_v37 = vld [vmem:[#allocation9 + $0x38] sm:$0xff]  }
 0x60a   :  { %v14806_v63 = vld [vmem:[#allocation9 + $0xb8] sm:$0xff]  }
 0x60c   :  { %10731 = vmatpush1.bf16.msra.mxu0 %v14723_v46  ;;  %10772 = vmatpush1.bf16.msra.mxu1 %v14726_v5 }
 0x60d   :  { %10732 = vmatprep.subr.bf16.mxu0 %v14731_v16  ;;  %10773 = vmatprep.subr.bf16.mxu1 %v14734_v17 }
 0x610   :  { %10733 = vmatpush1.bf16.msra.mxu0 %v14729_v19  ;;  %10774 = vmatpush1.bf16.msra.mxu1 %v14732_v59 }
 0x611   :  { %10800 = vmatprep.subr.bf16.mxu0 %v14737_v60  ;;  %10841 = vmatprep.subr.bf16.mxu1 %v14740_v62 }
 0x613   :  { %10751 = vmatmul.mubr.bf16.vlgmr.msra.gmra.mrb[52].mxu0 %v15609_v9  ;;  %10792 = vmatmul.mubr.bf16.vlgmr.msra.gmra.mrb[52].mxu1 %v15609_v9 }
 0x614   :  { %10801 = vmatpush1.bf16.msra.mxu0 %v14735_v8  ;;  %10842 = vmatpush1.bf16.msra.mxu1 %v14738_v11 }
 0x615   :  { %10802 = vmatprep.subr.bf16.mxu0 %v14743_v45  ;;  %10843 = vmatprep.subr.bf16.mxu1 %v14746_v10 }
 0x616   :  { %10832 = vmatprep.mubr.bf16.mxu0 %v15019_v0  ;;  %10873 = vmatprep.mubr.bf16.mxu1 %v15019_v0  ;;  %v14762_v0 = vld [vmem:[#allocation6 + $0x22a8] ss:$48 sps:$4 sm:$0xff]  }
 0x618   :  { %10803 = vmatpush1.bf16.msra.mxu0 %v14741_v15  ;;  %10844 = vmatpush1.bf16.msra.mxu1 %v14744_v18 }
 0x619   :  { %10804 = vmatprep.subr.bf16.mxu0 %v14749_v20  ;;  %10845 = vmatprep.subr.bf16.mxu1 %v14752_v23 }
 0x61c   :  { %10805 = vmatpush1.bf16.msra.mxu0 %v14747_v28  ;;  %10846 = vmatpush1.bf16.msra.mxu1 %v14750_v44 }
 0x61d   :  { %10806 = vmatprep.subr.bf16.mxu0 %v14755_v47  ;;  %10847 = vmatprep.subr.bf16.mxu1 %v14758_v30  ;;  %v10905_v47 = vlaneseq }
 0x61f   :  { %v10906_v30 = vshrl.u32 %v10905_v47, 7 }
 0x620   :  { %10807 = vmatpush1.bf16.msra.mxu0 %v14753_v31  ;;  %10848 = vmatpush1.bf16.msra.mxu1 %v14756_v21  ;;  %v10903_v21 = vld [vmem:[#allocation7] sm:$0x7] }
 0x621   :  { %10808 = vmatprep.subr.bf16.mxu0 %v14761_v22  ;;  %10849 = vmatprep.subr.bf16.mxu1 %v14764_v42  ;;  %v10911_v31 = vsub.s32 1, %v10906_v30  ;;  %v10907_v22 = vsub.s32 0, %v10906_v30  ;;  %v10915_v42 = vsub.s32 2, %v10906_v30 }
 0x624   :  { %10809 = vmatpush1.bf16.msra.mxu0 %v14759_v32  ;;  %10850 = vmatpush1.bf16.msra.mxu1 %v14762_v0 }
 0x625   :  { %10810 = vmatprep.subr.bf16.mxu0 %v14767_v1  ;;  %10851 = vmatprep.subr.bf16.mxu1 %v14770_v2  ;;  %v10912_v2 = vrot.slane %v10903_v21, %v10911_v31 }
 0x628   :  { %10811 = vmatpush1.bf16.msra.mxu0 %v14765_v4  ;;  %10852 = vmatpush1.bf16.msra.mxu1 %v14768_v26 }
 0x629   :  { %10812 = vmatprep.subr.bf16.mxu0 %v14773_v53  ;;  %10853 = vmatprep.subr.bf16.mxu1 %v14776_v27  ;;  %v10908_v27 = vrot.slane %v10903_v21, %v10907_v22 }
 0x62c   :  { %10813 = vmatpush1.bf16.msra.mxu0 %v14771_v29  ;;  %10854 = vmatpush1.bf16.msra.mxu1 %v14774_v33  ;;  %v10916_v33 = vrot.slane %v10903_v21, %v10915_v42 }
 0x62d   :  { %10814 = vmatprep.subr.bf16.mxu0 %v14779_v34  ;;  %10855 = vmatprep.subr.bf16.mxu1 %v14782_v52 }
 0x630   :  { %10815 = vmatpush1.bf16.msra.mxu0 %v14777_v24  ;;  %10856 = vmatpush1.bf16.msra.mxu1 %v14780_v35 }
 0x631   :  { %12652 = vmatprep.subr.bf16.mxu1 %v15020_v36  ;;  %12612 = vmatprep.subr.bf16.mxu0 %v14783_v6 }
 0x633   :  { %10833 = vmatmul.mubr.bf16.vlgmr.msra.gmra.mrb[56].mxu0 %v15609_v9  ;;  %10874 = vmatmul.mubr.bf16.vlgmr.msra.gmra.mrb[56].mxu1 %v15609_v9  ;;  %v14790_v9 = vld [vmem:[#allocation9 + $0x10] sm:$0xff]  }
 0x634   :  { %12653 = vmatpush3.bf16.msra.mxu1 %v14785_v25  ;;  %12613 = vmatpush3.bf16.msra.mxu0 %v14784_v7 }
 0x635   :  { %12654 = vmatprep.subr.bf16.mxu1 %v15020_v36  ;;  %12614 = vmatprep.subr.bf16.mxu0 %v14786_v38 }
 0x636   :  { %12668 = vmatprep.mubr.msk.bf16.mxu1 %vm15021_vm2, %v15020_v36 }
 0x638   :  { %12655 = vmatpush3.bf16.msra.mxu1 %v14788_v39  ;;  %12615 = vmatpush3.bf16.msra.mxu0 %v14787_v40 }
 0x639   :  { %12656 = vmatprep.subr.bf16.mxu1 %v15020_v36  ;;  %12616 = vmatprep.subr.bf16.mxu0 %v14789_v49 }
 0x63c   :  { %12657 = vmatpush3.bf16.msra.mxu1 %v14791_v41  ;;  %12617 = vmatpush3.bf16.msra.mxu0 %v14790_v9 }
 0x63d   :  { %12658 = vmatprep.subr.bf16.mxu1 %v15020_v36  ;;  %12618 = vmatprep.subr.bf16.mxu0 %v14792_v50 }
 0x640   :  { %12659 = vmatpush3.bf16.msra.mxu1 %v14794_v43  ;;  %12619 = vmatpush3.bf16.msra.mxu0 %v14793_v48  ;;  %v14807_v43 = vld [vmem:[#allocation12] sm:$0xff]  }
 0x641   :  { %12660 = vmatprep.subr.bf16.mxu1 %v15020_v36  ;;  %12620 = vmatprep.subr.bf16.mxu0 %v14795_v51 }
 0x644   :  { %12661 = vmatpush3.bf16.msra.mxu1 %v14797_v54  ;;  %12621 = vmatpush3.bf16.msra.mxu0 %v14796_v55  ;;  %v14808_v54 = vld [vmem:[#allocation12 + $0x8] sm:$0xff]   ;;  %v14809_v55 = vld [vmem:[#allocation12 + $0x10] sm:$0xff]  }
 0x645   :  { %12662 = vmatprep.subr.bf16.mxu1 %v15020_v36  ;;  %12622 = vmatprep.subr.bf16.mxu0 %v14798_v57  ;;  %v14810_v57 = vld [vmem:[#allocation12 + $0x18] sm:$0xff]  }
 0x648   :  { %12623 = vmatpush3.bf16.msra.mxu0 %v14799_v13  ;;  %12663 = vmatpush3.bf16.msra.mxu1 %v14800_v56  ;;  %v14811_v13 = vld [vmem:[#allocation12 + $0x20] sm:$0xff]   ;;  %v14812_v56 = vld [vmem:[#allocation12 + $0x28] sm:$0xff]  }
 0x649   :  { %12664 = vmatprep.subr.bf16.mxu1 %v15020_v36  ;;  %12624 = vmatprep.subr.bf16.mxu0 %v14801_v58  ;;  %v14813_v58 = vld [vmem:[#allocation12 + $0x30] sm:$0xff]  }
 0x64c   :  { %12625 = vmatpush3.bf16.msra.mxu0 %v14802_v12  ;;  %12665 = vmatpush3.bf16.msra.mxu1 %v14803_v14  ;;  %v14814_v12 = vld [vmem:[#allocation12 + $0x38] sm:$0xff]  }
 0x64d   :  { %12666 = vmatprep.subr.bf16.mxu1 %v15020_v36  ;;  %12626 = vmatprep.subr.bf16.mxu0 %v14804_v61 }
 0x650   :  { %12627 = vmatpush3.bf16.msra.mxu0 %v14805_v37  ;;  %12667 = vmatpush3.bf16.msra.mxu1 %v14806_v63  ;;  %v12578_v37 = vld [vmem:[#allocation10] ss:$0 sm:$0xff] }
 0x651   :  { %12672 = vmatprep.subr.bf16.mxu0 %v15020_v36 }
 0x6c6   :  { %v10670_v3 = vpop.f32.mrb[48].mxu0  ;;  %v10711_v46 = vpop.f32.mrb[48].mxu1 }
 0x6c7   :  { %v10672_v5 = vpop.f32.mrb[49].mxu0  ;;  %v10713_v16 = vpop.f32.mrb[49].mxu1 }
 0x6c8   :  { %v10894_v17 = vmax.f32 %v10670_v3, %v10713_v16  ;;  %v10674_v19 = vpop.f32.mrb[50].mxu0  ;;  %v10715_v59 = vpop.f32.mrb[50].mxu1 }
 0x6c9   :  { %v10675_v60 = vpop.f32.mrb[51].mxu0  ;;  %v10716_v62 = vpop.f32.mrb[51].mxu1 }
 0x6e6   :  { %v10752_v8 = vpop.f32.mrb[52].mxu0  ;;  %v10793_v11 = vpop.f32.mrb[52].mxu1 }
 0x6e7   :  { %v10895_v45 = vmax.f32 %v10672_v5, %v10752_v8  ;;  %v10754_v10 = vpop.f32.mrb[53].mxu0  ;;  %v10795_v15 = vpop.f32.mrb[53].mxu1 }
 0x6e8   :  { %v10896_v18 = vmax.f32 %v10711_v46, %v10754_v10  ;;  %v10756_v20 = vpop.f32.mrb[54].mxu0  ;;  %v10797_v23 = vpop.f32.mrb[54].mxu1 }
 0x6e9   :  { %v10757_v28 = vpop.f32.mrb[55].mxu0  ;;  %v10798_v44 = vpop.f32.mrb[55].mxu1 }
 0x706   :  { %v10834_v32 = vpop.f32.mrb[56].mxu0  ;;  %v10875_v0 = vpop.f32.mrb[56].mxu1 }
 0x707   :  { %v10898_v1 = vmax.f32 %v10795_v15, %v10875_v0  ;;  %v10836_v4 = vpop.f32.mrb[57].mxu0  ;;  %v10877_v26 = vpop.f32.mrb[57].mxu1 }
 0x708   :  { %v10897_v53 = vmax.f32 %v10793_v11, %v10836_v4  ;;  %v10899_v29 = vmax.f32 %v10834_v32, %v10877_v26  ;;  %v10838_v34 = vpop.f32.mrb[58].mxu0  ;;  %v10879_v52 = vpop.f32.mrb[58].mxu1  ;;  %v11322_v11 = vand.u32 127, %v10905_v47 }
 0x709   :  { %v10901_v24 = vmax.f32 %v10895_v45, %v10898_v1  ;;  %v10839_v35 = vpop.f32.mrb[59].mxu0  ;;  %v10880_v6 = vpop.f32.mrb[59].mxu1 }
 0x70a   :  { %v10900_v7 = vmax.f32 %v10894_v17, %v10897_v53  ;;  %v10902_v25 = vmax.f32 %v10896_v18, %v10899_v29  ;;  %vm11323_vm3 = vcmp.lt.s32.totalorder %v11322_v11, 10 }
 0x70b   :  { %v10921_v38 = vadd.f32 %v10912_v2, %v10901_v24 }
 0x70c   :  { %v10920_v39 = vadd.f32 %v10908_v27, %v10900_v7  ;;  %v10922_v40 = vadd.f32 %v10916_v33, %v10902_v25 }
 0x70d   :  { %v10924_v49 = vmax.f32 %v10921_v38, 0.0 }
 0x70e   :  { %v10923_v41 = vmax.f32 %v10920_v39, 0.0  ;;  %v10925_v9 = vmax.f32 %v10922_v40, 0.0 }
 0x70f   :  { %v10927_v50 = vpack.c.bf16 %v10924_v49, %v10924_v49 }
 0x710   :  { %v10926_v48 = vpack.c.bf16 %v10923_v41, %v10923_v41  ;;  %v10928_v51 = vpack.c.bf16 %v10925_v9, %v10925_v9 }
 0x711   :  { %11160 = vmatprep.mubr.bf16.mxu0 %v10927_v50 }
 0x712   :  { %11161 = vmatmul.mubr.bf16.vlgmr.msra.gmra.mrb[60].mxu0 %v10926_v48  ;;  %12669 = vmatmul.mubr.bf16.vlgmr.msra.gmra.mrb[60].mxu1 %v10928_v51 }
 0x713   :  { %12673 = vmatpush3.bf16.msra.mxu0 %v14807_v43  ;;  %12688 = vmatprep.mubr.msk.bf16.mxu0 %vm15021_vm2, %v15020_v36 }
 0x714   :  { %12674 = vmatprep.subr.bf16.mxu0 %v15020_v36 }
 0x717   :  { %12675 = vmatpush3.bf16.msra.mxu0 %v14808_v54 }
 0x718   :  { %12676 = vmatprep.subr.bf16.mxu0 %v15020_v36 }
 0x71b   :  { %12677 = vmatpush3.bf16.msra.mxu0 %v14809_v55 }
 0x71c   :  { %12678 = vmatprep.subr.bf16.mxu0 %v15020_v36 }
 0x71f   :  { %12679 = vmatpush3.bf16.msra.mxu0 %v14810_v57 }
 0x720   :  { %12680 = vmatprep.subr.bf16.mxu0 %v15020_v36 }
 0x723   :  { %12681 = vmatpush3.bf16.msra.mxu0 %v14811_v13 }
 0x724   :  { %12682 = vmatprep.subr.bf16.mxu0 %v15020_v36 }
 0x727   :  { %12683 = vmatpush3.bf16.msra.mxu0 %v14812_v56 }
 0x728   :  { %12684 = vmatprep.subr.bf16.mxu0 %v15020_v36 }
 0x72b   :  { %12685 = vmatpush3.bf16.msra.mxu0 %v14813_v58 }
 0x72c   :  { %12686 = vmatprep.subr.bf16.mxu0 %v15020_v36  ;;  %v12603_v36 = vld [vmem:[#allocation13] ss:$0 sm:$0xff] }
 0x72f   :  { %12687 = vmatpush3.bf16.msra.mxu0 %v14814_v12 }
 0x7e5   :  { %v12628_v14 = vpop.f32.mrb[60].mxu0  ;;  %v11202_v61 = vpop.f32.mrb[60].mxu1 }
 0x7e6   :  { %v12629_v63 = vpop.f32.mrb[61].mxu0  ;;  %v12670_v3 = vpop.f32.mrb[61].mxu1 }
 0x7e7   :  { %v12630_v46 = vadd.f32 %v12629_v63, %v12628_v14  ;;  %v12631_v5 = vpop.f32.mrb[62].mxu0  ;;  %v11205_v16 = vpop.f32.mrb[62].mxu1 }
 0x7e8   :  { %v12632_v17 = vpop.f32.mrb[63].mxu0  ;;  %v12671_v19 = vpop.f32.mrb[63].mxu1 }
 0x7e9   :  { %v11163_v59 = vadd.f32 %v12630_v46, %v12578_v37 }
 0x7eb   :  { %v11203_v60 = vadd.f32 %v11202_v61, %v11163_v59 }
 0x7ed   :  { %v11208_v62 = vmax.f32 %v11203_v60, 0.0 }
 0x7ef   :  { %v11209_v8 = vpack.c.bf16 %v11208_v62, %v11208_v62 }
 0x7f1   :  { %12689 = vmatmul.mubr.bf16.vlgmr.msra.gmra.mrb[64].mxu0 %v11209_v8 }
 0x8c4   :  { %v11315_v45 = vpop.f32.mrb[64].mxu0 }
 0x8c5   :  { %v11316_v10 = vadd.f32 %v12603_v36, %v11315_v45  ;;  %v12690_v15 = vpop.f32.mrb[65].mxu0 }
 0x8c6   :  { %v11318_v18 = vpop.f32.mrb[66].mxu0 }
 0x8c7   :  { %v12691_v20 = vpop.f32.mrb[67].mxu0  ;;  %v11324_v23 = vsel %vm11323_vm3, %v11316_v10, -1e+30 }
 0x8c8   :  { %11325 = vmax.xlane.f32.xlu0 %v11324_v23 }
 0x955   :  { %v11326_v28 = vpop.xlane.xlu0 %11325 }
 0x956   :  { %v11327_v44 = vsub.f32 %v11324_v23, %v11326_v28 }
 0x958   :  { %v11328_v30 = vmul.f32 1.442695, %v11327_v44 }
 0x95a   :  { %14815 = vpow2.f32 %v11328_v30 }
 0x964   :  { %v14816_v31 = vpop.eup %14815 }
 0x965   :  { %11330 = vadd.xlane.f32.xlu0 %v14816_v31 }
 0x9f2   :  { %v11331_v21 = vpop.xlane.xlu0 %11330 }
 0x9f3   :  { %14817 = vlog2.f32 %v11331_v21 }
 0x9fd   :  { %v14818_v22 = vpop.eup %14817 }
 0x9fe   :  { %v11333_v42 = vmul.f32 0.6931472, %v14818_v22 }
 0xa00   :  { %v11334_v47 = vsub.f32 %v11327_v44, %v11333_v42 }
 0xa02   :  { %11335 = vst [vmem:[%s15655_s9] sm:$0xff] %v11334_v47 }
 0xa03   :  { %11340 = vsyncpa [#allocation3], 1 }
 0xa04   :  { %11341 = vsyncpa [#allocation5], 1 }
 0xa05   :  { %11342 = vsyncpa [#allocation8], 1 }
 0xa06   :  { %11343 = vsyncpa [#allocation11], 1 }
 0xa07   :  { %11344 = vsyncpa [#allocation14], 1 }

</bundles_post_ra>
